<compile_context>
chip_gen: v5e
topology: v5e:2x2
jax: 0.10.0
libtpu: 0.0.40
codegen_flags: <defaults>
</compile_context>

<pallas_src>
import functools

import numpy as np

import jax
import jax.numpy as jnp
from jax.experimental import pallas as pl
from jax.experimental.pallas import tpu as pltpu


# ---------------------------------------------------------------------------
# Static packing of weights into matmul-friendly operands (host side, once)
# ---------------------------------------------------------------------------
def _banded_weights(w_oihw, w_in):
    """Banded (Toeplitz-block) conv weights.

    out[di, (j+dj)*IC + c, j*OC + o] = w[o, c, di, dj], zero elsewhere, so that
    conv(x)[i, j*OC+o] = sum_di (x[i+di, :] @ out[di])[j*OC+o]  for x laid out
    as (rows, W*IC) channel-fast.
    """
    w = np.asarray(w_oihw, np.float32)
    oc, ic, kh, kw = w.shape
    ow = w_in - kw + 1
    wt = np.transpose(w, (2, 3, 1, 0))                      # (kh, kw, ic, oc)
    out = np.zeros((kh, w_in * ic, ow * oc), np.float32)
    for di in range(kh):
        for dj in range(kw):
            for j in range(ow):
                out[di, (j + dj) * ic:(j + dj + 1) * ic,
                    j * oc:(j + 1) * oc] = wt[di, dj]
    return out


def _pool_row_select(batch, in_stride, out_rows, k_total, h_major):
    """Block-diagonal even/odd row-selection matrices for 2x2 max-pool rows.

    P[par][dst, b*in_stride + 2r + par] = 1, with
      dst = b*out_rows + r   (h_major=False)  or  dst = r*batch + b  (h_major=True).
    max(P[0] @ Y, P[1] @ Y) row-pools all B images in one batched matmul pair and
    compacts the stride-`in_stride` per-image row layout.
    """
    p = np.zeros((2, batch * out_rows, k_total), np.float32)
    for b in range(batch):
        for r in range(out_rows):
            dst = r * batch + b if h_major else b * out_rows + r
            p[0, dst, b * in_stride + 2 * r] = 1.0
            p[1, dst, b * in_stride + 2 * r + 1] = 1.0
    return p


def _col_pool(ow, oc):
    """Q[0]/Q[1] select even/odd column groups: Y @ Q[k] -> (rows, ow//2*oc)."""
    q = np.zeros((2, ow * oc, (ow // 2) * oc), np.float32)
    for j in range(ow // 2):
        for o in range(oc):
            q[0, (2 * j) * oc + o, j * oc + o] = 1.0
            q[1, (2 * j + 1) * oc + o, j * oc + o] = 1.0
    return q


def _fc1_rearranged(fc1_w, h=5, w=5, c=16):
    """A[hh, ww*c+cc, k] = fc1_w[k, cc*h*w + hh*w + ww]  (PyTorch NCHW flatten)."""
    fw = np.asarray(fc1_w, np.float32)                      # (120, c*h*w)
    a = np.zeros((h, w * c, fw.shape[0]), np.float32)
    for hh in range(h):
        for ww in range(w):
            for cc in range(c):
                a[hh, ww * c + cc, :] = fw[:, cc * h * w + hh * w + ww]
    return a


def pack_params(params, batch_block=8):
    """Build the VMEM-resident operand tuple consumed by the fused kernel."""
    bf = jnp.bfloat16
    B = batch_block
    r1 = B * 32 - 4                       # conv1 output rows per grid step
    r2 = B * 14 - 4                       # conv2 output rows per grid step

    # conv1: pad input channels 3 -> 4 so the input slab is lane-dense (128 lanes).
    w1 = np.asarray(params["conv1_w"], np.float32)
    w1p = np.concatenate([w1, np.zeros((6, 1, 5, 5), np.float32)], axis=1)

    packed = (
        jnp.asarray(_banded_weights(w1p, 32), bf),                          # w1  (5,128,168)
        jnp.asarray(np.tile(np.asarray(params["conv1_b"], np.float32), 28)[None, :]),  # cb1 (1,168)
        jnp.asarray(_pool_row_select(B, 32, 14, r1, h_major=False), bf),    # s1  (2,B*14,r1)
        jnp.asarray(_col_pool(28, 6), bf),                                  # q1  (2,168,84)
        jnp.asarray(_banded_weights(params["conv2_w"], 14), bf),            # w2  (5,84,160)
        jnp.asarray(np.tile(np.asarray(params["conv2_b"], np.float32), 10)[None, :]),  # cb2 (1,160)
        jnp.asarray(_pool_row_select(B, 14, 5, r2, h_major=True), bf),      # s2  (2,5*B,r2)
        jnp.asarray(_col_pool(10, 16), bf),                                 # q2  (2,160,80)
        jnp.asarray(_fc1_rearranged(params["fc1_w"]), bf),                  # a1  (5,80,120)
        jnp.asarray(params["fc1_b"], jnp.float32)[None, :],                 # fb1 (1,120)
        jnp.asarray(np.asarray(params["fc2_w"], np.float32).T, bf),         # w2f (120,84)
        jnp.asarray(params["fc2_b"], jnp.float32)[None, :],                 # fb2 (1,84)
        jnp.asarray(np.asarray(params["fc3_w"], np.float32).T, bf),         # w3f (84,10)
        jnp.asarray(params["fc3_b"], jnp.float32)[None, :],                 # fb3 (1,10)
    )
    return packed


# ---------------------------------------------------------------------------
# Fused whole-network Pallas kernel (B images per grid step)
# ---------------------------------------------------------------------------
def convnet_kernel(x_ref, w1_ref, cb1_ref, s1_ref, q1_ref,
                   w2_ref, cb2_ref, s2_ref, q2_ref,
                   a1_ref, fb1_ref, w2f_ref, fb2_ref, w3f_ref, fb3_ref,
                   o_ref, act1_ref, act2_ref, *, batch_block):
    f32 = jnp.float32
    bf16 = jnp.bfloat16
    B = batch_block
    r1 = B * 32 - 4
    r2 = B * 14 - 4

    def mm(a, b):                       # bf16 MXU matmul, f32 accumulate
        return jnp.dot(a, b, preferred_element_type=f32)

    # ---- conv1 5x5 (3->6) + bias + ReLU: (B*32,128) -> (r1,168) -------------
    # Row shifts are static sublane slices of the input ref (no selection
    # matmuls).  Rows at per-image offsets 28..31 are cross-image garbage; the
    # pool-1 selection matrices never read them.
    y = cb1_ref[...]                                       # (1,168) f32, broadcasts
    for di in range(5):
        y = y + mm(x_ref[pl.ds(di, r1), :], w1_ref[di])    # (r1,128)@(128,168)
    y = jnp.maximum(y, 0.0).astype(bf16)                   # cast once

    # ---- 2x2 max-pool #1: block-diagonal even/odd row selection + even/odd
    #      column-group selection; compacts to (B*14, 84) = (rows, 14 cols * 6 ch)
    z1 = jnp.maximum(mm(s1_ref[0], y), mm(s1_ref[1], y)).astype(bf16)     # (B*14,168)
    yc = jnp.maximum(mm(z1, q1_ref[0]), mm(z1, q1_ref[1])).astype(bf16)   # (B*14,84)
    act1_ref[...] = yc                                     # scratch; sliced by conv2

    # ---- conv2 5x5 (6->16) + bias + ReLU: (B*14,84) -> (r2,160) -------------
    z = cb2_ref[...]                                       # (1,160)
    for di in range(5):
        z = z + mm(act1_ref[pl.ds(di, r2), :], w2_ref[di])  # (r2,84)@(84,160)
    z = jnp.maximum(z, 0.0).astype(bf16)

    # ---- 2x2 max-pool #2 -> (5*B, 80); rows emitted h-major (row = h*B + b) so
    #      fc1 can use contiguous, sublane-aligned slices instead of row picks.
    z2 = jnp.maximum(mm(s2_ref[0], z), mm(s2_ref[1], z)).astype(bf16)     # (5B,160)
    zc = jnp.maximum(mm(z2, q2_ref[0]), mm(z2, q2_ref[1])).astype(bf16)   # (5B,80)
    act2_ref[...] = zc

    # ---- fc1 (400 -> 120); PyTorch NCHW flatten folded into a1 --------------
    h1 = fb1_ref[...]                                      # (1,120)
    for hh in range(5):
        h1 = h1 + mm(act2_ref[pl.ds(hh * B, B), :], a1_ref[hh])  # (B,80)@(80,120)
    h1 = jnp.maximum(h1, 0.0).astype(bf16)

    # ---- fc2 (120 -> 84) + ReLU, fc3 (84 -> 10) ------------------------------
    h2 = jnp.maximum(mm(h1, w2f_ref[...]) + fb2_ref[...], 0.0).astype(bf16)
    o_ref[...] = mm(h2, w3f_ref[...]) + fb3_ref[...]       # (B, 10) f32 logits


def _zero_map(nd, i):
    return (0,) * nd


def convnet_forward(packed, x_nchw, batch_block=8):
    """Forward pass matching the PyTorch ConvNet.  x_nchw: (N, 3, 32, 32)."""
    n = x_nchw.shape[0]
    B = batch_block
    g = pl.cdiv(n, B)
    n_pad = g * B

    # NCHW -> NHWC, pad channels 3->4 (lane-dense 128) and batch to a multiple of B,
    # then flatten to a 2-D (rows, 128) slab: image b occupies rows b*32 .. b*32+31
    # with lane layout w*4 + c.  All of this is cheap XLA glue on a tiny array.
    x = jnp.transpose(x_nchw, (0, 2, 3, 1))
    x = jnp.pad(x, ((0, n_pad - n), (0, 0), (0, 0), (0, 1)))
    x = x.reshape(n_pad * 32, 128).astype(jnp.bfloat16)

    weight_specs = [pl.BlockSpec(a.shape, functools.partial(_zero_map, a.ndim))
                    for a in packed]
    out = pl.pallas_call(
        functools.partial(convnet_kernel, batch_block=B),
        out_shape=jax.ShapeDtypeStruct((n_pad, 10), jnp.float32),
        grid=(g,),
        in_specs=[pl.BlockSpec((B * 32, 128), lambda i: (i, 0))] + weight_specs,
        out_specs=pl.BlockSpec((B, 10), lambda i: (i, 0)),
        scratch_shapes=[pltpu.VMEM((B * 14, 84), jnp.bfloat16),
                        pltpu.VMEM((5 * B, 80), jnp.bfloat16)],
        compiler_params=pltpu.CompilerParams(
            dimension_semantics=("parallel",)),   # batch blocks shard across TCs
    )(x, *packed)
    return out[:n]


# ---------------------------------------------------------------------------
# Parameter init (deterministic, synthetic) and pure-JAX reference
# ---------------------------------------------------------------------------
def init_params(key):
    ks = jax.random.split(key, 10)
    s = 0.1
    return {
        "conv1_w": jax.random.normal(ks[0], (6, 3, 5, 5), jnp.float32) * s,
        "conv1_b": jax.random.normal(ks[1], (6,), jnp.float32) * s,
        "conv2_w": jax.random.normal(ks[2], (16, 6, 5, 5), jnp.float32) * s,
        "conv2_b": jax.random.normal(ks[3], (16,), jnp.float32) * s,
        "fc1_w": jax.random.normal(ks[4], (120, 16 * 5 * 5), jnp.float32) * s,
        "fc1_b": jax.random.normal(ks[5], (120,), jnp.float32) * s,
        "fc2_w": jax.random.normal(ks[6], (84, 120), jnp.float32) * s,
        "fc2_b": jax.random.normal(ks[7], (84,), jnp.float32) * s,
        "fc3_w": jax.random.normal(ks[8], (10, 84), jnp.float32) * s,
        "fc3_b": jax.random.normal(ks[9], (10,), jnp.float32) * s,
    }


def _pool_nchw(x):
    n, c, h, w = x.shape
    return x.reshape(n, c, h // 2, 2, w // 2, 2).max(axis=(3, 5))


def convnet_reference(params, x_nchw):
    """Pure XLA reference (f32, HIGHEST precision) for the self-check."""
    hp = jax.lax.Precision.HIGHEST

    def conv(x, w, b):
        y = jax.lax.conv_general_dilated(
            x, w, window_strides=(1, 1), padding="VALID",
            dimension_numbers=("NCHW", "OIHW", "NCHW"), precision=hp)
        return y + b[None, :, None, None]

    x = _pool_nchw(jax.nn.relu(conv(x_nchw, params["conv1_w"], params["conv1_b"])))
    x = _pool_nchw(jax.nn.relu(conv(x, params["conv2_w"], params["conv2_b"])))
    x = x.reshape(x.shape[0], -1)                       # NCHW flatten == torch view
    x = jax.nn.relu(jnp.dot(x, params["fc1_w"].T, precision=hp) + params["fc1_b"])
    x = jax.nn.relu(jnp.dot(x, params["fc2_w"].T, precision=hp) + params["fc2_b"])
    return jnp.dot(x, params["fc3_w"].T, precision=hp) + params["fc3_b"]


if __name__ == "__main__":
    key = jax.random.PRNGKey(0)
    pkey, xkey = jax.random.split(key)
    params = init_params(pkey)

    B = 8                              # images per grid step (~224-252 M rows/matmul)
    packed = pack_params(params, batch_block=B)

    # fc1 expects 16*5*5 features => spatial input must be 3x32x32 (CIFAR-like).
    # N=16 with B=8 keeps >= 2 grid steps so both v7x TensorCores stay busy.
    x = jax.random.normal(xkey, (16, 3, 32, 32), jnp.float32)

    fwd = jax.jit(functools.partial(convnet_forward, batch_block=B))
    out = jax.block_until_ready(fwd(packed, x))
    assert out.shape == (16, 10) and out.dtype == jnp.float32

    ref = jax.block_until_ready(convnet_reference(params, x))
    np.testing.assert_allclose(np.asarray(out), np.asarray(ref), rtol=1e-1, atol=1e-1)
    print("KERNEL_OK")
</pallas_src>

<mosaic_0001>
module attributes {stable_mosaic.version = 11 : i64} {
  func.func @convnet_kernel(%arg0: i32, %arg1: memref<256x128xbf16, #tpu.memory_space<vmem>>, %arg2: memref<5x128x168xbf16, #tpu.memory_space<vmem>>, %arg3: memref<1x168xf32, #tpu.memory_space<vmem>>, %arg4: memref<2x112x252xbf16, #tpu.memory_space<vmem>>, %arg5: memref<2x168x84xbf16, #tpu.memory_space<vmem>>, %arg6: memref<5x84x160xbf16, #tpu.memory_space<vmem>>, %arg7: memref<1x160xf32, #tpu.memory_space<vmem>>, %arg8: memref<2x40x108xbf16, #tpu.memory_space<vmem>>, %arg9: memref<2x160x80xbf16, #tpu.memory_space<vmem>>, %arg10: memref<5x80x120xbf16, #tpu.memory_space<vmem>>, %arg11: memref<1x120xf32, #tpu.memory_space<vmem>>, %arg12: memref<120x84xbf16, #tpu.memory_space<vmem>>, %arg13: memref<1x84xf32, #tpu.memory_space<vmem>>, %arg14: memref<84x10xbf16, #tpu.memory_space<vmem>>, %arg15: memref<1x10xf32, #tpu.memory_space<vmem>>, %arg16: memref<8x10xf32, #tpu.memory_space<vmem>>, %arg17: memref<112x84xbf16, #tpu.memory_space<vmem>>, %arg18: memref<40x80xbf16, #tpu.memory_space<vmem>>) attributes {dimension_semantics = [#tpu.dimension_semantics<parallel>], iteration_bounds = array<i64: 2>, scalar_prefetch = 0 : i64, scratch_operands = 2 : i64, tpu.core_type = #tpu.core_type<tc>, window_params = [{transform_indices = @transform_0, window_bounds = array<i64: 256, 128>}, {pipeline_mode = #tpu.pipeline_mode<synchronous>, transform_indices = @transform_1, window_bounds = array<i64: 5, 128, 168>}, {pipeline_mode = #tpu.pipeline_mode<synchronous>, transform_indices = @transform_2, window_bounds = array<i64: 1, 168>}, {pipeline_mode = #tpu.pipeline_mode<synchronous>, transform_indices = @transform_3, window_bounds = array<i64: 2, 112, 252>}, {pipeline_mode = #tpu.pipeline_mode<synchronous>, transform_indices = @transform_4, window_bounds = array<i64: 2, 168, 84>}, {pipeline_mode = #tpu.pipeline_mode<synchronous>, transform_indices = @transform_5, window_bounds = array<i64: 5, 84, 160>}, {pipeline_mode = #tpu.pipeline_mode<synchronous>, transform_indices = @transform_6, window_bounds = array<i64: 1, 160>}, {pipeline_mode = #tpu.pipeline_mode<synchronous>, transform_indices = @transform_7, window_bounds = array<i64: 2, 40, 108>}, {pipeline_mode = #tpu.pipeline_mode<synchronous>, transform_indices = @transform_8, window_bounds = array<i64: 2, 160, 80>}, {pipeline_mode = #tpu.pipeline_mode<synchronous>, transform_indices = @transform_9, window_bounds = array<i64: 5, 80, 120>}, {pipeline_mode = #tpu.pipeline_mode<synchronous>, transform_indices = @transform_10, window_bounds = array<i64: 1, 120>}, {pipeline_mode = #tpu.pipeline_mode<synchronous>, transform_indices = @transform_11, window_bounds = array<i64: 120, 84>}, {pipeline_mode = #tpu.pipeline_mode<synchronous>, transform_indices = @transform_12, window_bounds = array<i64: 1, 84>}, {pipeline_mode = #tpu.pipeline_mode<synchronous>, transform_indices = @transform_13, window_bounds = array<i64: 84, 10>}, {pipeline_mode = #tpu.pipeline_mode<synchronous>, transform_indices = @transform_14, window_bounds = array<i64: 1, 10>}, {transform_indices = @transform_15, window_bounds = array<i64: 8, 10>}]} {
    %c0 = arith.constant 0 : index
    %c0_0 = arith.constant 0 : index
    %0 = vector.load %arg3[%c0, %c0_0] : memref<1x168xf32, #tpu.memory_space<vmem>>, vector<1x168xf32>
    %c0_1 = arith.constant 0 : index
    %c0_2 = arith.constant 0 : index
    %1 = vector.load %arg1[%c0_1, %c0_2] : memref<256x128xbf16, #tpu.memory_space<vmem>>, vector<252x128xbf16>
    %c0_3 = arith.constant 0 : index
    %c0_4 = arith.constant 0 : index
    %c0_5 = arith.constant 0 : index
    %2 = vector.load %arg2[%c0_3, %c0_4, %c0_5] : memref<5x128x168xbf16, #tpu.memory_space<vmem>>, vector<1x128x168xbf16>
    %3 = vector.shape_cast %2 : vector<1x128x168xbf16> to vector<128x168xbf16>
    %cst = arith.constant dense<0.000000e+00> : vector<252x168xf32>
    %4 = tpu.matmul %1, %3, %cst {dimension_numbers = #tpu.dot_dimension_numbers<[1], [0], [0], [1], [0, 0, 1, 1], [], []>} : vector<252x128xbf16>, vector<128x168xbf16>, vector<252x168xf32> -> vector<252x168xf32>
    %5 = vector.broadcast %0 : vector<1x168xf32> to vector<252x168xf32>
    %6 = arith.addf %5, %4 : vector<252x168xf32>
    %c1 = arith.constant 1 : index
    %c0_6 = arith.constant 0 : index
    %7 = vector.load %arg1[%c1, %c0_6] : memref<256x128xbf16, #tpu.memory_space<vmem>>, vector<252x128xbf16>
    %c1_7 = arith.constant 1 : index
    %c0_8 = arith.constant 0 : index
    %c0_9 = arith.constant 0 : index
    %8 = vector.load %arg2[%c1_7, %c0_8, %c0_9] : memref<5x128x168xbf16, #tpu.memory_space<vmem>>, vector<1x128x168xbf16>
    %9 = vector.shape_cast %8 : vector<1x128x168xbf16> to vector<128x168xbf16>
    %cst_10 = arith.constant dense<0.000000e+00> : vector<252x168xf32>
    %10 = tpu.matmul %7, %9, %cst_10 {dimension_numbers = #tpu.dot_dimension_numbers<[1], [0], [0], [1], [0, 0, 1, 1], [], []>} : vector<252x128xbf16>, vector<128x168xbf16>, vector<252x168xf32> -> vector<252x168xf32>
    %11 = arith.addf %6, %10 : vector<252x168xf32>
    %c2 = arith.constant 2 : index
    %c0_11 = arith.constant 0 : index
    %12 = vector.load %arg1[%c2, %c0_11] : memref<256x128xbf16, #tpu.memory_space<vmem>>, vector<252x128xbf16>
    %c2_12 = arith.constant 2 : index
    %c0_13 = arith.constant 0 : index
    %c0_14 = arith.constant 0 : index
    %13 = vector.load %arg2[%c2_12, %c0_13, %c0_14] : memref<5x128x168xbf16, #tpu.memory_space<vmem>>, vector<1x128x168xbf16>
    %14 = vector.shape_cast %13 : vector<1x128x168xbf16> to vector<128x168xbf16>
    %cst_15 = arith.constant dense<0.000000e+00> : vector<252x168xf32>
    %15 = tpu.matmul %12, %14, %cst_15 {dimension_numbers = #tpu.dot_dimension_numbers<[1], [0], [0], [1], [0, 0, 1, 1], [], []>} : vector<252x128xbf16>, vector<128x168xbf16>, vector<252x168xf32> -> vector<252x168xf32>
    %16 = arith.addf %11, %15 : vector<252x168xf32>
    %c3 = arith.constant 3 : index
    %c0_16 = arith.constant 0 : index
    %17 = vector.load %arg1[%c3, %c0_16] : memref<256x128xbf16, #tpu.memory_space<vmem>>, vector<252x128xbf16>
    %c3_17 = arith.constant 3 : index
    %c0_18 = arith.constant 0 : index
    %c0_19 = arith.constant 0 : index
    %18 = vector.load %arg2[%c3_17, %c0_18, %c0_19] : memref<5x128x168xbf16, #tpu.memory_space<vmem>>, vector<1x128x168xbf16>
    %19 = vector.shape_cast %18 : vector<1x128x168xbf16> to vector<128x168xbf16>
    %cst_20 = arith.constant dense<0.000000e+00> : vector<252x168xf32>
    %20 = tpu.matmul %17, %19, %cst_20 {dimension_numbers = #tpu.dot_dimension_numbers<[1], [0], [0], [1], [0, 0, 1, 1], [], []>} : vector<252x128xbf16>, vector<128x168xbf16>, vector<252x168xf32> -> vector<252x168xf32>
    %21 = arith.addf %16, %20 : vector<252x168xf32>
    %c4 = arith.constant 4 : index
    %c0_21 = arith.constant 0 : index
    %22 = vector.load %arg1[%c4, %c0_21] : memref<256x128xbf16, #tpu.memory_space<vmem>>, vector<252x128xbf16>
    %c4_22 = arith.constant 4 : index
    %c0_23 = arith.constant 0 : index
    %c0_24 = arith.constant 0 : index
    %23 = vector.load %arg2[%c4_22, %c0_23, %c0_24] : memref<5x128x168xbf16, #tpu.memory_space<vmem>>, vector<1x128x168xbf16>
    %24 = vector.shape_cast %23 : vector<1x128x168xbf16> to vector<128x168xbf16>
    %cst_25 = arith.constant dense<0.000000e+00> : vector<252x168xf32>
    %25 = tpu.matmul %22, %24, %cst_25 {dimension_numbers = #tpu.dot_dimension_numbers<[1], [0], [0], [1], [0, 0, 1, 1], [], []>} : vector<252x128xbf16>, vector<128x168xbf16>, vector<252x168xf32> -> vector<252x168xf32>
    %26 = arith.addf %21, %25 : vector<252x168xf32>
    %cst_26 = arith.constant 0.000000e+00 : f32
    %27 = vector.broadcast %cst_26 : f32 to vector<252x168xf32>
    %28 = arith.maximumf %26, %27 : vector<252x168xf32>
    %29 = arith.truncf %28 : vector<252x168xf32> to vector<252x168xbf16>
    %c0_27 = arith.constant 0 : index
    %c0_28 = arith.constant 0 : index
    %c0_29 = arith.constant 0 : index
    %30 = vector.load %arg4[%c0_27, %c0_28, %c0_29] : memref<2x112x252xbf16, #tpu.memory_space<vmem>>, vector<1x112x252xbf16>
    %31 = vector.shape_cast %30 : vector<1x112x252xbf16> to vector<112x252xbf16>
    %cst_30 = arith.constant dense<0.000000e+00> : vector<112x168xf32>
    %32 = tpu.matmul %31, %29, %cst_30 {dimension_numbers = #tpu.dot_dimension_numbers<[1], [0], [0], [1], [0, 0, 1, 1], [], []>} : vector<112x252xbf16>, vector<252x168xbf16>, vector<112x168xf32> -> vector<112x168xf32>
    %c1_31 = arith.constant 1 : index
    %c0_32 = arith.constant 0 : index
    %c0_33 = arith.constant 0 : index
    %33 = vector.load %arg4[%c1_31, %c0_32, %c0_33] : memref<2x112x252xbf16, #tpu.memory_space<vmem>>, vector<1x112x252xbf16>
    %34 = vector.shape_cast %33 : vector<1x112x252xbf16> to vector<112x252xbf16>
    %cst_34 = arith.constant dense<0.000000e+00> : vector<112x168xf32>
    %35 = tpu.matmul %34, %29, %cst_34 {dimension_numbers = #tpu.dot_dimension_numbers<[1], [0], [0], [1], [0, 0, 1, 1], [], []>} : vector<112x252xbf16>, vector<252x168xbf16>, vector<112x168xf32> -> vector<112x168xf32>
    %36 = arith.maximumf %32, %35 : vector<112x168xf32>
    %37 = arith.truncf %36 : vector<112x168xf32> to vector<112x168xbf16>
    %c0_35 = arith.constant 0 : index
    %c0_36 = arith.constant 0 : index
    %c0_37 = arith.constant 0 : index
    %38 = vector.load %arg5[%c0_35, %c0_36, %c0_37] : memref<2x168x84xbf16, #tpu.memory_space<vmem>>, vector<1x168x84xbf16>
    %39 = vector.shape_cast %38 : vector<1x168x84xbf16> to vector<168x84xbf16>
    %cst_38 = arith.constant dense<0.000000e+00> : vector<112x84xf32>
    %40 = tpu.matmul %37, %39, %cst_38 {dimension_numbers = #tpu.dot_dimension_numbers<[1], [0], [0], [1], [0, 0, 1, 1], [], []>} : vector<112x168xbf16>, vector<168x84xbf16>, vector<112x84xf32> -> vector<112x84xf32>
    %c1_39 = arith.constant 1 : index
    %c0_40 = arith.constant 0 : index
    %c0_41 = arith.constant 0 : index
    %41 = vector.load %arg5[%c1_39, %c0_40, %c0_41] : memref<2x168x84xbf16, #tpu.memory_space<vmem>>, vector<1x168x84xbf16>
    %42 = vector.shape_cast %41 : vector<1x168x84xbf16> to vector<168x84xbf16>
    %cst_42 = arith.constant dense<0.000000e+00> : vector<112x84xf32>
    %43 = tpu.matmul %37, %42, %cst_42 {dimension_numbers = #tpu.dot_dimension_numbers<[1], [0], [0], [1], [0, 0, 1, 1], [], []>} : vector<112x168xbf16>, vector<168x84xbf16>, vector<112x84xf32> -> vector<112x84xf32>
    %44 = arith.maximumf %40, %43 : vector<112x84xf32>
    %45 = arith.truncf %44 : vector<112x84xf32> to vector<112x84xbf16>
    %c0_43 = arith.constant 0 : index
    %c0_44 = arith.constant 0 : index
    %46 = vector.load %arg17[%c0_43, %c0_44] : memref<112x84xbf16, #tpu.memory_space<vmem>>, vector<112x84xbf16>
    tpu.vector_store %arg17[%c0_43, %c0_44], %45 {strides = array<i32>} : memref<112x84xbf16, #tpu.memory_space<vmem>>, vector<112x84xbf16>,
    %c0_45 = arith.constant 0 : index
    %c0_46 = arith.constant 0 : index
    %47 = vector.load %arg7[%c0_45, %c0_46] : memref<1x160xf32, #tpu.memory_space<vmem>>, vector<1x160xf32>
    %c0_47 = arith.constant 0 : index
    %c0_48 = arith.constant 0 : index
    %48 = vector.load %arg17[%c0_47, %c0_48] : memref<112x84xbf16, #tpu.memory_space<vmem>>, vector<108x84xbf16>
    %c0_49 = arith.constant 0 : index
    %c0_50 = arith.constant 0 : index
    %c0_51 = arith.constant 0 : index
    %49 = vector.load %arg6[%c0_49, %c0_50, %c0_51] : memref<5x84x160xbf16, #tpu.memory_space<vmem>>, vector<1x84x160xbf16>
    %50 = vector.shape_cast %49 : vector<1x84x160xbf16> to vector<84x160xbf16>
    %cst_52 = arith.constant dense<0.000000e+00> : vector<108x160xf32>
    %51 = tpu.matmul %48, %50, %cst_52 {dimension_numbers = #tpu.dot_dimension_numbers<[1], [0], [0], [1], [0, 0, 1, 1], [], []>} : vector<108x84xbf16>, vector<84x160xbf16>, vector<108x160xf32> -> vector<108x160xf32>
    %52 = vector.broadcast %47 : vector<1x160xf32> to vector<108x160xf32>
    %53 = arith.addf %52, %51 : vector<108x160xf32>
    %c1_53 = arith.constant 1 : index
    %c0_54 = arith.constant 0 : index
    %54 = vector.load %arg17[%c1_53, %c0_54] : memref<112x84xbf16, #tpu.memory_space<vmem>>, vector<108x84xbf16>
    %c1_55 = arith.constant 1 : index
    %c0_56 = arith.constant 0 : index
    %c0_57 = arith.constant 0 : index
    %55 = vector.load %arg6[%c1_55, %c0_56, %c0_57] : memref<5x84x160xbf16, #tpu.memory_space<vmem>>, vector<1x84x160xbf16>
    %56 = vector.shape_cast %55 : vector<1x84x160xbf16> to vector<84x160xbf16>
    %cst_58 = arith.constant dense<0.000000e+00> : vector<108x160xf32>
    %57 = tpu.matmul %54, %56, %cst_58 {dimension_numbers = #tpu.dot_dimension_numbers<[1], [0], [0], [1], [0, 0, 1, 1], [], []>} : vector<108x84xbf16>, vector<84x160xbf16>, vector<108x160xf32> -> vector<108x160xf32>
    %58 = arith.addf %53, %57 : vector<108x160xf32>
    %c2_59 = arith.constant 2 : index
    %c0_60 = arith.constant 0 : index
    %59 = vector.load %arg17[%c2_59, %c0_60] : memref<112x84xbf16, #tpu.memory_space<vmem>>, vector<108x84xbf16>
    %c2_61 = arith.constant 2 : index
    %c0_62 = arith.constant 0 : index
    %c0_63 = arith.constant 0 : index
    %60 = vector.load %arg6[%c2_61, %c0_62, %c0_63] : memref<5x84x160xbf16, #tpu.memory_space<vmem>>, vector<1x84x160xbf16>
    %61 = vector.shape_cast %60 : vector<1x84x160xbf16> to vector<84x160xbf16>
    %cst_64 = arith.constant dense<0.000000e+00> : vector<108x160xf32>
    %62 = tpu.matmul %59, %61, %cst_64 {dimension_numbers = #tpu.dot_dimension_numbers<[1], [0], [0], [1], [0, 0, 1, 1], [], []>} : vector<108x84xbf16>, vector<84x160xbf16>, vector<108x160xf32> -> vector<108x160xf32>
    %63 = arith.addf %58, %62 : vector<108x160xf32>
    %c3_65 = arith.constant 3 : index
    %c0_66 = arith.constant 0 : index
    %64 = vector.load %arg17[%c3_65, %c0_66] : memref<112x84xbf16, #tpu.memory_space<vmem>>, vector<108x84xbf16>
    %c3_67 = arith.constant 3 : index
    %c0_68 = arith.constant 0 : index
    %c0_69 = arith.constant 0 : index
    %65 = vector.load %arg6[%c3_67, %c0_68, %c0_69] : memref<5x84x160xbf16, #tpu.memory_space<vmem>>, vector<1x84x160xbf16>
    %66 = vector.shape_cast %65 : vector<1x84x160xbf16> to vector<84x160xbf16>
    %cst_70 = arith.constant dense<0.000000e+00> : vector<108x160xf32>
    %67 = tpu.matmul %64, %66, %cst_70 {dimension_numbers = #tpu.dot_dimension_numbers<[1], [0], [0], [1], [0, 0, 1, 1], [], []>} : vector<108x84xbf16>, vector<84x160xbf16>, vector<108x160xf32> -> vector<108x160xf32>
    %68 = arith.addf %63, %67 : vector<108x160xf32>
    %c4_71 = arith.constant 4 : index
    %c0_72 = arith.constant 0 : index
    %69 = vector.load %arg17[%c4_71, %c0_72] : memref<112x84xbf16, #tpu.memory_space<vmem>>, vector<108x84xbf16>
    %c4_73 = arith.constant 4 : index
    %c0_74 = arith.constant 0 : index
    %c0_75 = arith.constant 0 : index
    %70 = vector.load %arg6[%c4_73, %c0_74, %c0_75] : memref<5x84x160xbf16, #tpu.memory_space<vmem>>, vector<1x84x160xbf16>
    %71 = vector.shape_cast %70 : vector<1x84x160xbf16> to vector<84x160xbf16>
    %cst_76 = arith.constant dense<0.000000e+00> : vector<108x160xf32>
    %72 = tpu.matmul %69, %71, %cst_76 {dimension_numbers = #tpu.dot_dimension_numbers<[1], [0], [0], [1], [0, 0, 1, 1], [], []>} : vector<108x84xbf16>, vector<84x160xbf16>, vector<108x160xf32> -> vector<108x160xf32>
    %73 = arith.addf %68, %72 : vector<108x160xf32>
    %cst_77 = arith.constant 0.000000e+00 : f32
    %74 = vector.broadcast %cst_77 : f32 to vector<108x160xf32>
    %75 = arith.maximumf %73, %74 : vector<108x160xf32>
    %76 = arith.truncf %75 : vector<108x160xf32> to vector<108x160xbf16>
    %c0_78 = arith.constant 0 : index
    %c0_79 = arith.constant 0 : index
    %c0_80 = arith.constant 0 : index
    %77 = vector.load %arg8[%c0_78, %c0_79, %c0_80] : memref<2x40x108xbf16, #tpu.memory_space<vmem>>, vector<1x40x108xbf16>
    %78 = vector.shape_cast %77 : vector<1x40x108xbf16> to vector<40x108xbf16>
    %cst_81 = arith.constant dense<0.000000e+00> : vector<40x160xf32>
    %79 = tpu.matmul %78, %76, %cst_81 {dimension_numbers = #tpu.dot_dimension_numbers<[1], [0], [0], [1], [0, 0, 1, 1], [], []>} : vector<40x108xbf16>, vector<108x160xbf16>, vector<40x160xf32> -> vector<40x160xf32>
    %c1_82 = arith.constant 1 : index
    %c0_83 = arith.constant 0 : index
    %c0_84 = arith.constant 0 : index
    %80 = vector.load %arg8[%c1_82, %c0_83, %c0_84] : memref<2x40x108xbf16, #tpu.memory_space<vmem>>, vector<1x40x108xbf16>
    %81 = vector.shape_cast %80 : vector<1x40x108xbf16> to vector<40x108xbf16>
    %cst_85 = arith.constant dense<0.000000e+00> : vector<40x160xf32>
    %82 = tpu.matmul %81, %76, %cst_85 {dimension_numbers = #tpu.dot_dimension_numbers<[1], [0], [0], [1], [0, 0, 1, 1], [], []>} : vector<40x108xbf16>, vector<108x160xbf16>, vector<40x160xf32> -> vector<40x160xf32>
    %83 = arith.maximumf %79, %82 : vector<40x160xf32>
    %84 = arith.truncf %83 : vector<40x160xf32> to vector<40x160xbf16>
    %c0_86 = arith.constant 0 : index
    %c0_87 = arith.constant 0 : index
    %c0_88 = arith.constant 0 : index
    %85 = vector.load %arg9[%c0_86, %c0_87, %c0_88] : memref<2x160x80xbf16, #tpu.memory_space<vmem>>, vector<1x160x80xbf16>
    %86 = vector.shape_cast %85 : vector<1x160x80xbf16> to vector<160x80xbf16>
    %cst_89 = arith.constant dense<0.000000e+00> : vector<40x80xf32>
    %87 = tpu.matmul %84, %86, %cst_89 {dimension_numbers = #tpu.dot_dimension_numbers<[1], [0], [0], [1], [0, 0, 1, 1], [], []>} : vector<40x160xbf16>, vector<160x80xbf16>, vector<40x80xf32> -> vector<40x80xf32>
    %c1_90 = arith.constant 1 : index
    %c0_91 = arith.constant 0 : index
    %c0_92 = arith.constant 0 : index
    %88 = vector.load %arg9[%c1_90, %c0_91, %c0_92] : memref<2x160x80xbf16, #tpu.memory_space<vmem>>, vector<1x160x80xbf16>
    %89 = vector.shape_cast %88 : vector<1x160x80xbf16> to vector<160x80xbf16>
    %cst_93 = arith.constant dense<0.000000e+00> : vector<40x80xf32>
    %90 = tpu.matmul %84, %89, %cst_93 {dimension_numbers = #tpu.dot_dimension_numbers<[1], [0], [0], [1], [0, 0, 1, 1], [], []>} : vector<40x160xbf16>, vector<160x80xbf16>, vector<40x80xf32> -> vector<40x80xf32>
    %91 = arith.maximumf %87, %90 : vector<40x80xf32>
    %92 = arith.truncf %91 : vector<40x80xf32> to vector<40x80xbf16>
    %c0_94 = arith.constant 0 : index
    %c0_95 = arith.constant 0 : index
    %93 = vector.load %arg18[%c0_94, %c0_95] : memref<40x80xbf16, #tpu.memory_space<vmem>>, vector<40x80xbf16>
    tpu.vector_store %arg18[%c0_94, %c0_95], %92 {strides = array<i32>} : memref<40x80xbf16, #tpu.memory_space<vmem>>, vector<40x80xbf16>,
    %c0_96 = arith.constant 0 : index
    %c0_97 = arith.constant 0 : index
    %94 = vector.load %arg11[%c0_96, %c0_97] : memref<1x120xf32, #tpu.memory_space<vmem>>, vector<1x120xf32>
    %c0_98 = arith.constant 0 : index
    %c0_99 = arith.constant 0 : index
    %95 = vector.load %arg18[%c0_98, %c0_99] : memref<40x80xbf16, #tpu.memory_space<vmem>>, vector<8x80xbf16>
    %c0_100 = arith.constant 0 : index
    %c0_101 = arith.constant 0 : index
    %c0_102 = arith.constant 0 : index
    %96 = vector.load %arg10[%c0_100, %c0_101, %c0_102] : memref<5x80x120xbf16, #tpu.memory_space<vmem>>, vector<1x80x120xbf16>
    %97 = vector.shape_cast %96 : vector<1x80x120xbf16> to vector<80x120xbf16>
    %cst_103 = arith.constant dense<0.000000e+00> : vector<8x120xf32>
    %98 = tpu.matmul %95, %97, %cst_103 {dimension_numbers = #tpu.dot_dimension_numbers<[1], [0], [0], [1], [0, 0, 1, 1], [], []>} : vector<8x80xbf16>, vector<80x120xbf16>, vector<8x120xf32> -> vector<8x120xf32>
    %99 = vector.broadcast %94 : vector<1x120xf32> to vector<8x120xf32>
    %100 = arith.addf %99, %98 : vector<8x120xf32>
    %c8 = arith.constant 8 : index
    %c0_104 = arith.constant 0 : index
    %101 = vector.load %arg18[%c8, %c0_104] : memref<40x80xbf16, #tpu.memory_space<vmem>>, vector<8x80xbf16>
    %c1_105 = arith.constant 1 : index
    %c0_106 = arith.constant 0 : index
    %c0_107 = arith.constant 0 : index
    %102 = vector.load %arg10[%c1_105, %c0_106, %c0_107] : memref<5x80x120xbf16, #tpu.memory_space<vmem>>, vector<1x80x120xbf16>
    %103 = vector.shape_cast %102 : vector<1x80x120xbf16> to vector<80x120xbf16>
    %cst_108 = arith.constant dense<0.000000e+00> : vector<8x120xf32>
    %104 = tpu.matmul %101, %103, %cst_108 {dimension_numbers = #tpu.dot_dimension_numbers<[1], [0], [0], [1], [0, 0, 1, 1], [], []>} : vector<8x80xbf16>, vector<80x120xbf16>, vector<8x120xf32> -> vector<8x120xf32>
    %105 = arith.addf %100, %104 : vector<8x120xf32>
    %c16 = arith.constant 16 : index
    %c0_109 = arith.constant 0 : index
    %106 = vector.load %arg18[%c16, %c0_109] : memref<40x80xbf16, #tpu.memory_space<vmem>>, vector<8x80xbf16>
    %c2_110 = arith.constant 2 : index
    %c0_111 = arith.constant 0 : index
    %c0_112 = arith.constant 0 : index
    %107 = vector.load %arg10[%c2_110, %c0_111, %c0_112] : memref<5x80x120xbf16, #tpu.memory_space<vmem>>, vector<1x80x120xbf16>
    %108 = vector.shape_cast %107 : vector<1x80x120xbf16> to vector<80x120xbf16>
    %cst_113 = arith.constant dense<0.000000e+00> : vector<8x120xf32>
    %109 = tpu.matmul %106, %108, %cst_113 {dimension_numbers = #tpu.dot_dimension_numbers<[1], [0], [0], [1], [0, 0, 1, 1], [], []>} : vector<8x80xbf16>, vector<80x120xbf16>, vector<8x120xf32> -> vector<8x120xf32>
    %110 = arith.addf %105, %109 : vector<8x120xf32>
    %c24 = arith.constant 24 : index
    %c0_114 = arith.constant 0 : index
    %111 = vector.load %arg18[%c24, %c0_114] : memref<40x80xbf16, #tpu.memory_space<vmem>>, vector<8x80xbf16>
    %c3_115 = arith.constant 3 : index
    %c0_116 = arith.constant 0 : index
    %c0_117 = arith.constant 0 : index
    %112 = vector.load %arg10[%c3_115, %c0_116, %c0_117] : memref<5x80x120xbf16, #tpu.memory_space<vmem>>, vector<1x80x120xbf16>
    %113 = vector.shape_cast %112 : vector<1x80x120xbf16> to vector<80x120xbf16>
    %cst_118 = arith.constant dense<0.000000e+00> : vector<8x120xf32>
    %114 = tpu.matmul %111, %113, %cst_118 {dimension_numbers = #tpu.dot_dimension_numbers<[1], [0], [0], [1], [0, 0, 1, 1], [], []>} : vector<8x80xbf16>, vector<80x120xbf16>, vector<8x120xf32> -> vector<8x120xf32>
    %115 = arith.addf %110, %114 : vector<8x120xf32>
    %c32 = arith.constant 32 : index
    %c0_119 = arith.constant 0 : index
    %116 = vector.load %arg18[%c32, %c0_119] : memref<40x80xbf16, #tpu.memory_space<vmem>>, vector<8x80xbf16>
    %c4_120 = arith.constant 4 : index
    %c0_121 = arith.constant 0 : index
    %c0_122 = arith.constant 0 : index
    %117 = vector.load %arg10[%c4_120, %c0_121, %c0_122] : memref<5x80x120xbf16, #tpu.memory_space<vmem>>, vector<1x80x120xbf16>
    %118 = vector.shape_cast %117 : vector<1x80x120xbf16> to vector<80x120xbf16>
    %cst_123 = arith.constant dense<0.000000e+00> : vector<8x120xf32>
    %119 = tpu.matmul %116, %118, %cst_123 {dimension_numbers = #tpu.dot_dimension_numbers<[1], [0], [0], [1], [0, 0, 1, 1], [], []>} : vector<8x80xbf16>, vector<80x120xbf16>, vector<8x120xf32> -> vector<8x120xf32>
    %120 = arith.addf %115, %119 : vector<8x120xf32>
    %cst_124 = arith.constant 0.000000e+00 : f32
    %121 = vector.broadcast %cst_124 : f32 to vector<8x120xf32>
    %122 = arith.maximumf %120, %121 : vector<8x120xf32>
    %123 = arith.truncf %122 : vector<8x120xf32> to vector<8x120xbf16>
    %c0_125 = arith.constant 0 : index
    %c0_126 = arith.constant 0 : index
    %124 = vector.load %arg12[%c0_125, %c0_126] : memref<120x84xbf16, #tpu.memory_space<vmem>>, vector<120x84xbf16>
    %cst_127 = arith.constant dense<0.000000e+00> : vector<8x84xf32>
    %125 = tpu.matmul %123, %124, %cst_127 {dimension_numbers = #tpu.dot_dimension_numbers<[1], [0], [0], [1], [0, 0, 1, 1], [], []>} : vector<8x120xbf16>, vector<120x84xbf16>, vector<8x84xf32> -> vector<8x84xf32>
    %c0_128 = arith.constant 0 : index
    %c0_129 = arith.constant 0 : index
    %126 = vector.load %arg13[%c0_128, %c0_129] : memref<1x84xf32, #tpu.memory_space<vmem>>, vector<1x84xf32>
    %127 = vector.broadcast %126 : vector<1x84xf32> to vector<8x84xf32>
    %128 = arith.addf %125, %127 : vector<8x84xf32>
    %cst_130 = arith.constant 0.000000e+00 : f32
    %129 = vector.broadcast %cst_130 : f32 to vector<8x84xf32>
    %130 = arith.maximumf %128, %129 : vector<8x84xf32>
    %131 = arith.truncf %130 : vector<8x84xf32> to vector<8x84xbf16>
    %c0_131 = arith.constant 0 : index
    %c0_132 = arith.constant 0 : index
    %132 = vector.load %arg14[%c0_131, %c0_132] : memref<84x10xbf16, #tpu.memory_space<vmem>>, vector<84x10xbf16>
    %cst_133 = arith.constant dense<0.000000e+00> : vector<8x10xf32>
    %133 = tpu.matmul %131, %132, %cst_133 {dimension_numbers = #tpu.dot_dimension_numbers<[1], [0], [0], [1], [0, 0, 1, 1], [], []>} : vector<8x84xbf16>, vector<84x10xbf16>, vector<8x10xf32> -> vector<8x10xf32>
    %c0_134 = arith.constant 0 : index
    %c0_135 = arith.constant 0 : index
    %134 = vector.load %arg15[%c0_134, %c0_135] : memref<1x10xf32, #tpu.memory_space<vmem>>, vector<1x10xf32>
    %135 = vector.broadcast %134 : vector<1x10xf32> to vector<8x10xf32>
    %136 = arith.addf %133, %135 : vector<8x10xf32>
    %c0_136 = arith.constant 0 : index
    %c0_137 = arith.constant 0 : index
    %137 = vector.load %arg16[%c0_136, %c0_137] : memref<8x10xf32, #tpu.memory_space<vmem>>, vector<8x10xf32>
    tpu.vector_store %arg16[%c0_136, %c0_137], %136 {strides = array<i32>} : memref<8x10xf32, #tpu.memory_space<vmem>>, vector<8x10xf32>,
    return
  }
  func.func @transform_0(%arg0: i32) -> (i32, i32) {
    %c0_i32 = arith.constant 0 : i32
    %c0_i32_0 = arith.constant 0 : i32
    return %arg0, %c0_i32 : i32, i32
  }
  func.func @transform_1(%arg0: i32) -> (i32, i32, i32) {
    %c0_i32 = arith.constant 0 : i32
    %c0_i32_0 = arith.constant 0 : i32
    %c0_i32_1 = arith.constant 0 : i32
    %c0_i32_2 = arith.constant 0 : i32
    return %c0_i32, %c0_i32_0, %c0_i32_1 : i32, i32, i32
  }
  func.func @transform_2(%arg0: i32) -> (i32, i32) {
    %c0_i32 = arith.constant 0 : i32
    %c0_i32_0 = arith.constant 0 : i32
    %c0_i32_1 = arith.constant 0 : i32
    return %c0_i32, %c0_i32_0 : i32, i32
  }
  func.func @transform_3(%arg0: i32) -> (i32, i32, i32) {
    %c0_i32 = arith.constant 0 : i32
    %c0_i32_0 = arith.constant 0 : i32
    %c0_i32_1 = arith.constant 0 : i32
    %c0_i32_2 = arith.constant 0 : i32
    return %c0_i32, %c0_i32_0, %c0_i32_1 : i32, i32, i32
  }
  func.func @transform_4(%arg0: i32) -> (i32, i32, i32) {
    %c0_i32 = arith.constant 0 : i32
    %c0_i32_0 = arith.constant 0 : i32
    %c0_i32_1 = arith.constant 0 : i32
    %c0_i32_2 = arith.constant 0 : i32
    return %c0_i32, %c0_i32_0, %c0_i32_1 : i32, i32, i32
  }
  func.func @transform_5(%arg0: i32) -> (i32, i32, i32) {
    %c0_i32 = arith.constant 0 : i32
    %c0_i32_0 = arith.constant 0 : i32
    %c0_i32_1 = arith.constant 0 : i32
    %c0_i32_2 = arith.constant 0 : i32
    return %c0_i32, %c0_i32_0, %c0_i32_1 : i32, i32, i32
  }
  func.func @transform_6(%arg0: i32) -> (i32, i32) {
    %c0_i32 = arith.constant 0 : i32
    %c0_i32_0 = arith.constant 0 : i32
    %c0_i32_1 = arith.constant 0 : i32
    return %c0_i32, %c0_i32_0 : i32, i32
  }
  func.func @transform_7(%arg0: i32) -> (i32, i32, i32) {
    %c0_i32 = arith.constant 0 : i32
    %c0_i32_0 = arith.constant 0 : i32
    %c0_i32_1 = arith.constant 0 : i32
    %c0_i32_2 = arith.constant 0 : i32
    return %c0_i32, %c0_i32_0, %c0_i32_1 : i32, i32, i32
  }
  func.func @transform_8(%arg0: i32) -> (i32, i32, i32) {
    %c0_i32 = arith.constant 0 : i32
    %c0_i32_0 = arith.constant 0 : i32
    %c0_i32_1 = arith.constant 0 : i32
    %c0_i32_2 = arith.constant 0 : i32
    return %c0_i32, %c0_i32_0, %c0_i32_1 : i32, i32, i32
  }
  func.func @transform_9(%arg0: i32) -> (i32, i32, i32) {
    %c0_i32 = arith.constant 0 : i32
    %c0_i32_0 = arith.constant 0 : i32
    %c0_i32_1 = arith.constant 0 : i32
    %c0_i32_2 = arith.constant 0 : i32
    return %c0_i32, %c0_i32_0, %c0_i32_1 : i32, i32, i32
  }
  func.func @transform_10(%arg0: i32) -> (i32, i32) {
    %c0_i32 = arith.constant 0 : i32
    %c0_i32_0 = arith.constant 0 : i32
    %c0_i32_1 = arith.constant 0 : i32
    return %c0_i32, %c0_i32_0 : i32, i32
  }
  func.func @transform_11(%arg0: i32) -> (i32, i32) {
    %c0_i32 = arith.constant 0 : i32
    %c0_i32_0 = arith.constant 0 : i32
    %c0_i32_1 = arith.constant 0 : i32
    return %c0_i32, %c0_i32_0 : i32, i32
  }
  func.func @transform_12(%arg0: i32) -> (i32, i32) {
    %c0_i32 = arith.constant 0 : i32
    %c0_i32_0 = arith.constant 0 : i32
    %c0_i32_1 = arith.constant 0 : i32
    return %c0_i32, %c0_i32_0 : i32, i32
  }
  func.func @transform_13(%arg0: i32) -> (i32, i32) {
    %c0_i32 = arith.constant 0 : i32
    %c0_i32_0 = arith.constant 0 : i32
    %c0_i32_1 = arith.constant 0 : i32
    return %c0_i32, %c0_i32_0 : i32, i32
  }
  func.func @transform_14(%arg0: i32) -> (i32, i32) {
    %c0_i32 = arith.constant 0 : i32
    %c0_i32_0 = arith.constant 0 : i32
    %c0_i32_1 = arith.constant 0 : i32
    return %c0_i32, %c0_i32_0 : i32, i32
  }
  func.func @transform_15(%arg0: i32) -> (i32, i32) {
    %c0_i32 = arith.constant 0 : i32
    %c0_i32_0 = arith.constant 0 : i32
    return %arg0, %c0_i32 : i32, i32
  }
}

</mosaic_0001>

<bundles_post_ra>
// kernel: convnet_forward.1
= control target key start
LH: loop header
LB: loop body
LE: loop exit
PB: predicated region body
PF: predicated region fallthrough
CT: control target
= control target key end

     0   :  { %s11087_s0 = inlined_call_operand.vmem [shape: bf16[512,128], index: 0, kind: input, shape index: {}]   ;;  %s11088_s1 = inlined_call_operand.vmem [shape: bf16[5,128,168], index: 1, kind: input, shape index: {}]   ;;  %s11089_s2 = inlined_call_operand.vmem [shape: f32[1,168], index: 2, kind: input, shape index: {}]   ;;  %s11090_s3 = inlined_call_operand.vmem [shape: bf16[2,112,252], index: 3, kind: input, shape index: {}]   ;;  %s11091_s4 = inlined_call_operand.vmem [shape: bf16[2,168,84], index: 4, kind: input, shape index: {}]   ;;  %s11092_s5 = inlined_call_operand.vmem [shape: bf16[5,84,160], index: 5, kind: input, shape index: {}]   ;;  %s11093_s6 = inlined_call_operand.vmem [shape: f32[1,160], index: 6, kind: input, shape index: {}]   ;;  %s11094_s7 = inlined_call_operand.vmem [shape: bf16[2,40,108], index: 7, kind: input, shape index: {}]   ;;  %s11095_s8 = inlined_call_operand.vmem [shape: bf16[2,160,80], index: 8, kind: input, shape index: {}]   ;;  %s11096_s9 = inlined_call_operand.vmem [shape: bf16[5,80,120], index: 9, kind: input, shape index: {}]   ;;  %s11097_s10 = inlined_call_operand.vmem [shape: f32[1,120], index: 10, kind: input, shape index: {}]   ;;  %s11098_s11 = inlined_call_operand.vmem [shape: bf16[120,84], index: 11, kind: input, shape index: {}]   ;;  %s11099_s12 = inlined_call_operand.vmem [shape: f32[1,84], index: 12, kind: input, shape index: {}]   ;;  %s11100_s13 = inlined_call_operand.vmem [shape: bf16[84,10], index: 13, kind: input, shape index: {}]   ;;  %s11101_s14 = inlined_call_operand.vmem [shape: f32[1,10], index: 14, kind: input, shape index: {}]   ;;  %s11102_s15 = inlined_call_operand.hbm [shape: f32[16,10], index: 15, kind: output, shape index: {}]  }
   0x1   :  { %11141 = sst [smem:[#allocation62_spill]] %s11087_s0 }
   0x2   :  { %20 = vsyncpa [#allocation5], 0 }
   0x3   :  { %22 = vsyncpa [#allocation5 + $0x1], 0  ;;  %s7900_s18 = smov 0   ;;  %s7902_s19 = smov 0  }
   0x4   :  { %s7904_s20 = smov 0   ;;  %s7906_s21 = smov 0  }
   0x5 LB: > { %11142 = sst [smem:[#allocation7_spill]] %s7806_s18  ;;  %s7921_s22 = sadd.s32 4294967295, %s7818_s21   ;;  %s7818_s21 = sphi %s7906_s21, %s11347_s21   ;;  %s7814_s20 = sphi %s7904_s20, %s11349_s20   ;;  %s7810_s19 = sphi %s7902_s19, %s11351_s19   ;;  %s7806_s18 = sphi %s7900_s18, %s11350_s18  }
   0x6   : > { %11143 = sst [smem:[#allocation8_spill]] %s7814_s20  ;;  %s6038_s23 = sadd.s32 4294967294, %s7818_s21  }
   0x7   : > { %11144 = sst [smem:[#allocation9_spill]] %s7818_s21  ;;  %s7925_s24 = sadd.s32 1, %s7818_s21  }
   0x8   : > { %11145 = sst [smem:[#allocation10_spill]] %s7925_s24  ;;  %s355_s25 = sadd.s32 1, %s7814_s20 }
   0x9   : > { %s352_s26 = ssub.s32 %s7818_s21, %s7925_s24  ;;  %p365_p0 = scmp.ne.s32.totalorder %s7814_s20, %s7810_s19 }
   0xa   : > { %p353_p1 = scmp.eq.s32.totalorder %s352_s26, 0  ;;  %p366_p2 = scmp.eq.s32.totalorder %s7921_s22, 1 }
   0xb   : > { %p371_p3 = scmp.ne.s32.totalorder %s7810_s19, %s7806_s18  ;;  %p372_p4 = scmp.eq.s32.totalorder %s6038_s23, 1 }
   0xc   : > { %s7936_s27 = scalar_select %p353_p1, %s7814_s20, %s355_s25  }
   0xd   : > { %p7938_p5 = por %p366_p2, %p365_p0  ;;  %p7942_p6 = por %p372_p4, %p371_p3 }
   0xe   : > { %11146 = sst [smem:[#allocation11_spill]] %s7936_s27  ;;  %p6041_p7 = scmp.ge.s32.totalorder %s7818_s21, 1 }
   0xf   : > { %s11148_s29 = scalar_select %p7942_p6, 1, 0 }
  0x10   : > { %p441_p8 = scmp.lt.s32.totalorder %s7818_s21, 3 }
  0x11   : > { %11149 = sst [smem:[#allocation12_spill]] %s11148_s29 }
  0x12   : > { %p442_p9 = pnand %p6041_p7, %p441_p8 }
  0x14   : > { %445 = sbr.rel (%p442_p9) target bundleno = 2814 (0xafe), region = 80 }
  0x19   : > { %v6159_v0 = vld [vmem:[%s11088_s1 + $0x70] sm:$0xf]  ;;  %v7455_v1 = vld [vmem:[%s11088_s1 + $0x74] sm:$0xf0]  ;;  %v7454_v2 = vld [vmem:[%s11088_s1 + $0x74] sm:$0xf] }
  0x1a   : > { %v6160_v3 = vor.u32 %v7455_v1, %v6159_v0  ;;  %v6161_v4 = vld [vmem:[%s11088_s1 + $0x78] sm:$0xf0]  ;;  %v6239_v5 = vld [vmem:[%s11088_s1 + $0xf0] sm:$0xf]  ;;  %v7471_v6 = vld [vmem:[%s11088_s1 + $0xf4] sm:$0xf0] }
  0x1b   : > { %v6164_v7 = vor.u32 %v7454_v2, %v6161_v4  ;;  %v6240_v8 = vor.u32 %v7471_v6, %v6239_v5  ;;  %v7470_v9 = vld [vmem:[%s11088_s1 + $0xf4] sm:$0xf]  ;;  %v6241_v10 = vld [vmem:[%s11088_s1 + $0xf8] sm:$0xf0]  ;;  %v6151_v11 = vld [vmem:[%s11088_s1 + $0x60] sm:$0xf] }
  0x1c   : > { %721 = vmatpush.bf16.msra.mxu0 %v6160_v3  ;;  %v6244_v12 = vor.u32 %v7470_v9, %v6241_v10  ;;  %v7453_v13 = vld [vmem:[%s11088_s1 + $0x64] sm:$0xf0]  ;;  %v7452_v14 = vld [vmem:[%s11088_s1 + $0x64] sm:$0xf]  ;;  %v6153_v15 = vld [vmem:[%s11088_s1 + $0x68] sm:$0xf0] }
  0x1d   : > { %810 = vmatpush.bf16.msra.mxu1 %v6164_v7  ;;  %1213 = vmatpush.bf16.msra.mxu2 %v6240_v8  ;;  %v6152_v16 = vor.u32 %v7453_v13, %v6151_v11  ;;  %v6156_v17 = vor.u32 %v7452_v14, %v6153_v15  ;;  %v6231_v18 = vld [vmem:[%s11088_s1 + $0xe0] sm:$0xf]  ;;  %v7469_v19 = vld [vmem:[%s11088_s1 + $0xe4] sm:$0xf0]  ;;  %v7468_v20 = vld [vmem:[%s11088_s1 + $0xe4] sm:$0xf] }
  0x1e   : > { %1302 = vmatpush.bf16.msra.mxu3 %v6244_v12  ;;  %v6232_v21 = vor.u32 %v7469_v19, %v6231_v18  ;;  %v6233_v22 = vld [vmem:[%s11088_s1 + $0xe8] sm:$0xf0]  ;;  %v6143_v23 = vld [vmem:[%s11088_s1 + $0x50] sm:$0xf]  ;;  %v7451_v24 = vld [vmem:[%s11088_s1 + $0x54] sm:$0xf0] }
  0x1f   : > { %v6236_v25 = vor.u32 %v7468_v20, %v6233_v22  ;;  %v7450_v26 = vld [vmem:[%s11088_s1 + $0x54] sm:$0xf]  ;;  %v6145_v27 = vld [vmem:[%s11088_s1 + $0x58] sm:$0xf0]  ;;  %v6223_v28 = vld [vmem:[%s11088_s1 + $0xd0] sm:$0xf]  ;;  %v6144_v29 = vor.u32 %v7451_v24, %v6143_v23 }
  0x20   : > { %722 = vmatpush.bf16.msra.mxu0 %v6152_v16  ;;  %v7467_v30 = vld [vmem:[%s11088_s1 + $0xd4] sm:$0xf0]  ;;  %v7466_v31 = vld [vmem:[%s11088_s1 + $0xd4] sm:$0xf]  ;;  %v6225_v32 = vld [vmem:[%s11088_s1 + $0xd8] sm:$0xf0]  ;;  %v6148_v33 = vor.u32 %v7450_v26, %v6145_v27 }
  0x21   : > { %811 = vmatpush.bf16.msra.mxu1 %v6156_v17  ;;  %1214 = vmatpush.bf16.msra.mxu2 %v6232_v21  ;;  %v6224_v34 = vor.u32 %v7467_v30, %v6223_v28  ;;  %v6135_v35 = vld [vmem:[%s11088_s1 + $0x40] sm:$0xf]  ;;  %v7449_v36 = vld [vmem:[%s11088_s1 + $0x44] sm:$0xf0]  ;;  %v7448_v37 = vld [vmem:[%s11088_s1 + $0x44] sm:$0xf]  ;;  %v6228_v38 = vor.u32 %v7466_v31, %v6225_v32 }
  0x22   : > { %1303 = vmatpush.bf16.msra.mxu3 %v6236_v25  ;;  %v6137_v39 = vld [vmem:[%s11088_s1 + $0x48] sm:$0xf0]  ;;  %v6215_v40 = vld [vmem:[%s11088_s1 + $0xc0] sm:$0xf]  ;;  %v7465_v41 = vld [vmem:[%s11088_s1 + $0xc4] sm:$0xf0]  ;;  %v6136_v44 = vor.u32 %v7449_v36, %v6135_v35 }
  0x23   : > { %v7464_v42 = vld [vmem:[%s11088_s1 + $0xc4] sm:$0xf]  ;;  %v6217_v43 = vld [vmem:[%s11088_s1 + $0xc8] sm:$0xf0]  ;;  %v6140_v45 = vor.u32 %v7448_v37, %v6137_v39  ;;  %v6216_v46 = vor.u32 %v7465_v41, %v6215_v40  ;;  %v6127_v47 = vld [vmem:[%s11088_s1 + $0x30] sm:$0xf] }
  0x24   : > { %723 = vmatpush.bf16.msra.mxu0 %v6144_v29  ;;  %v7447_v48 = vld [vmem:[%s11088_s1 + $0x34] sm:$0xf0]  ;;  %v7446_v49 = vld [vmem:[%s11088_s1 + $0x34] sm:$0xf]  ;;  %v6220_v50 = vor.u32 %v7464_v42, %v6217_v43  ;;  %v6129_v51 = vld [vmem:[%s11088_s1 + $0x38] sm:$0xf0] }
  0x25   : > { %812 = vmatpush.bf16.msra.mxu1 %v6148_v33  ;;  %1215 = vmatpush.bf16.msra.mxu2 %v6224_v34  ;;  %v6207_v52 = vld [vmem:[%s11088_s1 + $0xb0] sm:$0xf]  ;;  %v7463_v53 = vld [vmem:[%s11088_s1 + $0xb4] sm:$0xf0]  ;;  %v7462_v54 = vld [vmem:[%s11088_s1 + $0xb4] sm:$0xf]  ;;  %v6128_v56 = vor.u32 %v7447_v48, %v6127_v47  ;;  %v6132_v57 = vor.u32 %v7446_v49, %v6129_v51 }
  0x26   : > { %1304 = vmatpush.bf16.msra.mxu3 %v6228_v38  ;;  %v6209_v55 = vld [vmem:[%s11088_s1 + $0xb8] sm:$0xf0]  ;;  %v6208_v58 = vor.u32 %v7463_v53, %v6207_v52  ;;  %v6119_v59 = vld [vmem:[%s11088_s1 + $0x20] sm:$0xf]  ;;  %v7445_v60 = vld [vmem:[%s11088_s1 + $0x24] sm:$0xf0] }
  0x27   : > { %v7444_v61 = vld [vmem:[%s11088_s1 + $0x24] sm:$0xf]  ;;  %v6212_v62 = vor.u32 %v7462_v54, %v6209_v55  ;;  %v6121_v63 = vld [vmem:[%s11088_s1 + $0x28] sm:$0xf0]  ;;  %v6199_v0 = vld [vmem:[%s11088_s1 + $0xa0] sm:$0xf]  ;;  %v6120_v4 = vor.u32 %v7445_v60, %v6119_v59 }
  0x28   : > { %724 = vmatpush.bf16.msra.mxu0 %v6136_v44  ;;  %v7461_v1 = vld [vmem:[%s11088_s1 + $0xa4] sm:$0xf0]  ;;  %v7460_v2 = vld [vmem:[%s11088_s1 + $0xa4] sm:$0xf]  ;;  %v6201_v3 = vld [vmem:[%s11088_s1 + $0xa8] sm:$0xf0]  ;;  %v6124_v8 = vor.u32 %v7444_v61, %v6121_v63 }
  0x29   : > { %813 = vmatpush.bf16.msra.mxu1 %v6140_v45  ;;  %1216 = vmatpush.bf16.msra.mxu2 %v6216_v46  ;;  %v6111_v5 = vld [vmem:[%s11088_s1 + $0x10] sm:$0xf]  ;;  %v7443_v6 = vld [vmem:[%s11088_s1 + $0x14] sm:$0xf0]  ;;  %v7442_v7 = vld [vmem:[%s11088_s1 + $0x14] sm:$0xf]  ;;  %v6200_v9 = vor.u32 %v7461_v1, %v6199_v0  ;;  %v6204_v13 = vor.u32 %v7460_v2, %v6201_v3 }
  0x2a   : > { %1305 = vmatpush.bf16.msra.mxu3 %v6220_v50  ;;  %v6113_v10 = vld [vmem:[%s11088_s1 + $0x18] sm:$0xf0]  ;;  %v6191_v11 = vld [vmem:[%s11088_s1 + $0x90] sm:$0xf]  ;;  %v7459_v12 = vld [vmem:[%s11088_s1 + $0x94] sm:$0xf0]  ;;  %v6112_v16 = vor.u32 %v7443_v6, %v6111_v5 }
  0x2b   : > { %v7458_v14 = vld [vmem:[%s11088_s1 + $0x94] sm:$0xf]  ;;  %v6193_v15 = vld [vmem:[%s11088_s1 + $0x98] sm:$0xf0]  ;;  %s6043_s17 = sshll.u32 %s7921_s22, 5  ;;  %v6116_v18 = vor.u32 %v7442_v7, %v6113_v10  ;;  %v6192_v19 = vor.u32 %v7459_v12, %v6191_v11  ;;  %s11150_s0 = sld [smem:[#allocation62_spill]] }
  0x2c   : > { %725 = vmatpush.bf16.msra.mxu0 %v6128_v56  ;;  %p490_p10 = scmp.lt.s32.totalorder %s6043_s17, 63  ;;  %v6103_v17 = vld [vmem:[%s11088_s1] sm:$0xf]  ;;  %v7441_v20 = vld [vmem:[%s11088_s1 + $0x4] sm:$0xf0]  ;;  %v6196_v22 = vor.u32 %v7458_v14, %v6193_v15  ;;  %vm1476_vm1 = vcmask 1046528  }
  0x2d   : > { %814 = vmatpush.bf16.msra.mxu1 %v6132_v57  ;;  %1217 = vmatpush.bf16.msra.mxu2 %v6208_v58  ;;  %v7440_v21 = vld [vmem:[%s11088_s1 + $0x4] sm:$0xf]  ;;  %v6105_v23 = vld [vmem:[%s11088_s1 + $0x8] sm:$0xf0]  ;;  %v6183_v24 = vld [vmem:[%s11088_s1 + $0x80] sm:$0xf]  ;;  %v6104_v28 = vor.u32 %v7441_v20, %v6103_v17 }
  0x2e   : > { %1306 = vmatpush.bf16.msra.mxu3 %v6212_v62  ;;  %s11353_s17 = smov (!%p490_p10, %s6043_s17), 63  ;;  %v7457_v25 = vld [vmem:[%s11088_s1 + $0x84] sm:$0xf0]  ;;  %v7456_v26 = vld [vmem:[%s11088_s1 + $0x84] sm:$0xf]  ;;  %v6108_v29 = vor.u32 %v7440_v21, %v6105_v23  ;;  %vm2300_vm3 = vcmask 1045504  }
  0x2f   : > { %v6185_v27 = vld [vmem:[%s11088_s1 + $0x88] sm:$0xf0]  ;;  %s6044_s21 = sshll.u32 %s11353_s17, 2  ;;  %v6184_v30 = vor.u32 %v7457_v25, %v6183_v24  ;;  %vm989_vm0 = vsmask.f32 7424  ;;  %vm2843_vm4 = vcmask 1014784  }
  0x30   : > { %726 = vmatpush.bf16.msra.mxu0 %v6120_v4  ;;  %v6188_v33 = vor.u32 %v7456_v26, %v6185_v27  ;;  %v496_v24 = vld [vmem:[%s11089_s2] sm:$0x3]  ;;  %vm1867_vm2 = vsmask.f32 6400  ;;  %vm3471_vm5 = vcmask 1043456   ;;  %vm3449_vm6 = vcmask 326656  }
  0x31   : > { %815 = vmatpush.bf16.msra.mxu1 %v6124_v8  ;;  %1218 = vmatpush.bf16.msra.mxu2 %v6200_v9  ;;  %s8144_s30 = scalar_lea.vmem %s11150_s0, %s6044_s21  ;;  %v8256_v27 = vperm.slane %v496_v24, 1  ;;  %vm3920_vm7 = vcmask 1041408   ;;  %vm3767_vm8 = vcmask 683008   ;;  %vm3898_vm9 = vcmask 687104   ;;  %s486_s20 = sand.u32 1, %s7810_s19  }
  0x32   : > { %1307 = vmatpush.bf16.msra.mxu3 %v6204_v13  ;;  %v8147_v31 = vld [vmem:[%s8144_s30] sm:$0xff]   ;;  %v8150_v32 = vld [vmem:[%s8144_s30 + $0x8] sm:$0xff]  ;;  %v8161_v41 = vld [vmem:[%s8144_s30 + $0x10] sm:$0xff]  ;;  %vm5076_vm10 = vcmask 883712   ;;  %vm5308_vm11 = vcmask 261120   ;;  %vm5501_vm12 = vcmask 650240  }
  0x33   : > { %11151 = vst [vmem:[#allocation13_spill] sm:$0xff] %v8147_v31  ;;  %v991_v34 = vshrl.u32 %v8147_v31, 16  ;;  %v993_v35 = vshll.u32 %v8147_v31, 16  ;;  %v998_v36 = vshll.u32 %v8150_v32, 16  ;;  %v1002_v42 = vshrl.u32 %v8150_v32, 16  ;;  %v8173_v47 = vld [vmem:[%s8144_s30 + $0x18] sm:$0xff] }
  0x34   : > { %727 = vmatpush.bf16.msra.mxu0 %v6112_v16  ;;  %v11132_v43 = vshll.u32 %v8161_v41, 16  ;;  %v11134_v48 = vshrl.u32 %v8161_v41, 16  ;;  %v11130_v49 = vshll.u32 %v8173_v47, 16  ;;  %v8185_v53 = vld [vmem:[%s8144_s30 + $0x20] sm:$0xff]  ;;  %v11131_v54 = vshrl.u32 %v8173_v47, 16  ;;  %v8197_v59 = vld [vmem:[%s8144_s30 + $0x28] sm:$0xff] }
  0x35   : > { %816 = vmatpush.bf16.msra.mxu1 %v6116_v18  ;;  %1219 = vmatpush.bf16.msra.mxu2 %v6192_v19  ;;  %v995_v37 = vrot.slane %v993_v35, 1  ;;  %v1000_v38 = vrot.slane %v998_v36, 1  ;;  %v11128_v55 = vshll.u32 %v8185_v53, 16  ;;  %v11129_v60 = vshrl.u32 %v8185_v53, 16  ;;  %v8209_v1 = vld [vmem:[%s8144_s30 + $0x30] sm:$0xff]  ;;  %v8221_v7 = vld [vmem:[%s8144_s30 + $0x38] sm:$0xff] }
  0x36   : > { %1308 = vmatpush.bf16.msra.mxu3 %v6196_v22  ;;  %v1008_v45 = vrot.slane %v11132_v43, 1  ;;  %v1016_v51 = vrot.slane %v11130_v49, 1  ;;  %v11124_v61 = vshll.u32 %v8197_v59, 16  ;;  %v11125_v2 = vshrl.u32 %v8197_v59, 16  ;;  %v8233_v13 = vld [vmem:[%s8144_s30 + $0x40] sm:$0xff]  ;;  %v8245_v19 = vld [vmem:[%s8144_s30 + $0x48] sm:$0xff] }
  0x37   : > { %v996_v39 = vor.u32 %v995_v37, %v991_v34  ;;  %v1004_v44 = vor.u32 %v1002_v42, %v1000_v38  ;;  %v1024_v57 = vrot.slane %v11128_v55, 1  ;;  %v11122_v3 = vshll.u32 %v8209_v1, 16  ;;  %s7423_s27 = sshll.u32 %s7921_s22, 3  ;;  %s5964_s22 = scalar_lea.sflag [#allocation5], %s486_s20 }
  0x38   : > { %728 = vmatpush.bf16.msra.mxu0 %v6104_v28  ;;  %v1012_v50 = vor.u32 %v11134_v48, %v1008_v45  ;;  %v1020_v56 = vor.u32 %v11131_v54, %v1016_v51  ;;  %v1032_v63 = vrot.slane %v11124_v61, 1  ;;  %v11123_v8 = vshrl.u32 %v8209_v1, 16  ;;  %v6393_v61 = vld [vmem:[%s11088_s1 + $0x1e8] sm:$0xf0]  ;;  %s5974_s18 = scalar_lea.hbm %s11102_s15, %s7423_s27 }
  0x39   : > { %817 = vmatpush.bf16.msra.mxu1 %v6108_v29  ;;  %1220 = vmatpush.bf16.msra.mxu2 %v6184_v30  ;;  %v1001_v40 = vsel %vm989_vm0, %v996_v39, %v1000_v38  ;;  %v1009_v46 = vsel %vm989_vm0, %v1004_v44, %v1008_v45  ;;  %v1028_v62 = vor.u32 %v11129_v60, %v1024_v57  ;;  %v1040_v5 = vrot.slane %v11122_v3, 1  ;;  %v6361_v54 = vld [vmem:[%s11088_s1 + $0x1a8] sm:$0xf0]  ;;  %s5978_s23 = sshll.u32 %s5974_s18, 4  ;;  %s5979_s23 = int_to_ptr.hbm [resolvable:$true] %s5978_s23 }
  0x3a   : > { %1309 = vmatpush.bf16.msra.mxu3 %v6188_v33  ;;  %v1017_v52 = vsel %vm989_vm0, %v1012_v50, %v1016_v51  ;;  %v1025_v58 = vsel %vm989_vm0, %v1020_v56, %v1024_v57  ;;  %v1036_v4 = vor.u32 %v11125_v2, %v1032_v63  ;;  %v11120_v9 = vshll.u32 %v8221_v7, 16  ;;  %v8265_v33 = vld [vmem:[%s8144_s30 + $0x50] sm:$0xff]  ;;  %s7770_s25 = sshra.s32 %s5979_s23, 4  ;;  %s7771_s25 = int_to_ptr.hbm [resolvable:$true] %s7770_s25 }
  0x3b   : > { %729 = vmatmul.bf16.vlgmr.msra.gmra.mxu0 %v8147_v31  ;;  %v1033_v0 = vsel %vm989_vm0, %v1028_v62, %v1032_v63  ;;  %v1044_v10 = vor.u32 %v11123_v8, %v1040_v5  ;;  %v11121_v14 = vshrl.u32 %v8221_v7, 16  ;;  %v11118_v15 = vshll.u32 %v8233_v13, 16  ;;  %v7500_v8 = vld [vmem:[%s11088_s1 + $0x1e4] sm:$0xf]  ;;  %s7772_s0 = scalar_lea.hbm %s7771_s25, 8  ;;  %p7777_p0 = scmp.lt.s32.totalorder %s7771_s25, %s11102_s15 }
  0x3c   : > { %818 = vmatmul.bf16.vlgmr.msra.gmra.mxu1 %v8147_v31  ;;  %1221 = vmatmul.bf16.vlgmr.msra.gmra.mxu2 %v1001_v40  ;;  %v1041_v6 = vsel %vm989_vm0, %v1036_v4, %v1040_v5  ;;  %v1048_v11 = vrot.slane %v11120_v9, 1  ;;  %v11119_v20 = vshrl.u32 %v8233_v13, 16  ;;  %v11116_v21 = vshll.u32 %v8245_v19, 16  ;;  %p7773_p11 = scmp.ne.s32.totalorder %s7771_s25, %s7772_s0 }
  0x3d   : > { %1310 = vmatmul.bf16.vlgmr.msra.gmra.mxu3 %v1001_v40  ;;  %v1056_v17 = vrot.slane %v11118_v15, 1  ;;  %v8259_v29 = vperm.slane %v496_v24, 0  ;;  %v11117_v45 = vshrl.u32 %v8245_v19, 16  ;;  %v11113_v24 = vshrl.u32 %v8265_v33, 16 }
  0x3e   : > { %v1049_v12 = vsel %vm989_vm0, %v1044_v10, %v1048_v11  ;;  %v1052_v16 = vor.u32 %v11121_v14, %v1048_v11  ;;  %v1064_v23 = vrot.slane %v11116_v21, 1  ;;  %v8289_v10 = vld [vmem:[%s8144_s30 + $0x58] sm:$0xff]  ;;  %v6396_v2 = vor.u32 %v7500_v8, %v6393_v61  ;;  %v6383_v61 = vld [vmem:[%s11088_s1 + $0x1d0] sm:$0xf]  ;;  %p7774_p12 = pnand %p7773_p11, %p7938_p5 }
  0x3f   : > { %v1060_v22 = vor.u32 %v11119_v20, %v1056_v17  ;;  %v7499_v8 = vld [vmem:[%s11088_s1 + $0x1d4] sm:$0xf0]  ;;  %vm5549_vm13 = vcmask 654336   ;;  %vm5872_vm14 = vcmask 982016   ;;  %vm5961_vm15 = vcmask 80896  }
  0x40   : > { %v1057_v18 = vsel %vm989_vm0, %v1052_v16, %v1056_v17  ;;  %v1068_v51 = vor.u32 %v11117_v45, %v1064_v23  ;;  %p7775_p13 = pneg %p7774_p12 }
  0x41   : > { %v1065_v28 = vsel %vm989_vm0, %v1060_v22, %v1064_v23 }
  0x4b   : > { %734 = vmatmul.bf16.gmra.mxu0 %v8150_v32 }
  0x4c   : > { %823 = vmatmul.bf16.gmra.mxu1 %v8150_v32  ;;  %1226 = vmatmul.bf16.gmra.mxu2 %v1009_v46 }
  0x4d   : > { %1315 = vmatmul.bf16.gmra.mxu3 %v1009_v46  ;;  %v11112_v46 = vshll.u32 %v8265_v33, 16 }
  0x5b   : > { %739 = vmatmul.bf16.gmra.mxu0 %v8161_v41 }
  0x5c   : > { %828 = vmatmul.bf16.gmra.mxu1 %v8161_v41  ;;  %1231 = vmatmul.bf16.gmra.mxu2 %v1017_v52 }
  0x5d   : > { %1320 = vmatmul.bf16.gmra.mxu3 %v1017_v52  ;;  %v1072_v52 = vrot.slane %v11112_v46, 1 }
  0x5f   : > { %v1073_v5 = vsel %vm989_vm0, %v1068_v51, %v1072_v52 }
  0x6b   : > { %744 = vmatmul.bf16.gmra.mxu0 %v8173_v47 }
  0x6c   : > { %833 = vmatmul.bf16.gmra.mxu1 %v8173_v47  ;;  %1236 = vmatmul.bf16.gmra.mxu2 %v1025_v58 }
  0x6d   : > { %1325 = vmatmul.bf16.gmra.mxu3 %v1025_v58 }
  0x7b   : > { %749 = vmatmul.bf16.gmra.mxu0 %v8185_v53 }
  0x7c   : > { %838 = vmatmul.bf16.gmra.mxu1 %v8185_v53  ;;  %1241 = vmatmul.bf16.gmra.mxu2 %v1033_v0 }
  0x7d   : > { %1330 = vmatmul.bf16.gmra.mxu3 %v1033_v0 }
  0x8b   : > { %754 = vmatmul.bf16.gmra.mxu0 %v8197_v59 }
  0x8c   : > { %843 = vmatmul.bf16.gmra.mxu1 %v8197_v59  ;;  %1246 = vmatmul.bf16.gmra.mxu2 %v1041_v6 }
  0x8d   : > { %1335 = vmatmul.bf16.gmra.mxu3 %v1041_v6 }
  0x9b   : > { %759 = vmatmul.bf16.gmra.mxu0 %v8209_v1 }
  0x9c   : > { %848 = vmatmul.bf16.gmra.mxu1 %v8209_v1  ;;  %1251 = vmatmul.bf16.gmra.mxu2 %v1049_v12 }
  0x9d   : > { %1340 = vmatmul.bf16.gmra.mxu3 %v1049_v12 }
  0xab   : > { %764 = vmatmul.bf16.gmra.mxu0 %v8221_v7 }
  0xac   : > { %853 = vmatmul.bf16.gmra.mxu1 %v8221_v7  ;;  %1256 = vmatmul.bf16.gmra.mxu2 %v1057_v18 }
  0xad   : > { %1345 = vmatmul.bf16.gmra.mxu3 %v1057_v18 }
  0xb8   : > { %v730_v25 = vpop.f32.mrf.mxu0 }
  0xb9   : > { %v819_v26 = vpop.f32.mrf.mxu1  ;;  %v904_v34 = vadd.f32 %v8259_v29, %v730_v25  ;;  %v11110_v25 = vshll.u32 %v8289_v10, 16 }
  0xba   : > { %v905_v30 = vadd.f32 %v8256_v27, %v819_v26 }
  0xbb   : > { %769 = vmatmul.bf16.gmra.mxu0 %v8233_v13 }
  0xbc   : > { %858 = vmatmul.bf16.gmra.mxu1 %v8233_v13  ;;  %1261 = vmatmul.bf16.gmra.mxu2 %v1065_v28 }
  0xbd   : > { %1350 = vmatmul.bf16.gmra.mxu3 %v1065_v28  ;;  %v1076_v28 = vor.u32 %v11113_v24, %v1072_v52  ;;  %v8361_v24 = vld [vmem:[%s8144_s30 + $0x70] sm:$0xff] }
  0xbe   : > { %v11126_v15 = vshll.u32 %v8361_v24, 16 }
  0xbf   : > { %v1222_v35 = vpop.f32.mrf.mxu2 }
  0xc0   : > { %v1311_v37 = vpop.f32.mrf.mxu3  ;;  %v8268_v38 = vadd.f32 %v1222_v35, %v904_v34  ;;  %v732_v40 = vpop.f32.mrf.mxu0 }
  0xc1   : > { %v8270_v39 = vadd.f32 %v1311_v37, %v905_v30  ;;  %v821_v44 = vpop.f32.mrf.mxu1  ;;  %v906_v56 = vadd.f32 %v8259_v29, %v732_v40  ;;  %v1080_v30 = vrot.slane %v11110_v25, 1 }
  0xc2   : > { %v907_v50 = vadd.f32 %v8256_v27, %v821_v44 }
  0xc7   : > { %v1224_v57 = vpop.f32.mrf.mxu2 }
  0xc8   : > { %v1313_v58 = vpop.f32.mrf.mxu3  ;;  %v8280_v62 = vadd.f32 %v1224_v57, %v906_v56  ;;  %v735_v0 = vpop.f32.mrf.mxu0  ;;  %v1081_v56 = vsel %vm989_vm0, %v1076_v28, %v1080_v30  ;;  %v8313_v57 = vld [vmem:[%s8144_s30 + $0x60] sm:$0xff] }
  0xc9   : > { %v8282_v63 = vadd.f32 %v1313_v58, %v907_v50  ;;  %v824_v4 = vpop.f32.mrf.mxu1  ;;  %v908_v11 = vadd.f32 %v8259_v29, %v735_v0 }
  0xca   : > { %v909_v6 = vadd.f32 %v8256_v27, %v824_v4 }
  0xcb   : > { %774 = vmatmul.bf16.gmra.mxu0 %v8245_v19 }
  0xcc   : > { %863 = vmatmul.bf16.gmra.mxu1 %v8245_v19  ;;  %1266 = vmatmul.bf16.gmra.mxu2 %v1073_v5 }
  0xcd   : > { %1355 = vmatmul.bf16.gmra.mxu3 %v1073_v5 }
  0xcf   : > { %v1227_v12 = vpop.f32.mrf.mxu2 }
  0xd0   : > { %v1316_v16 = vpop.f32.mrf.mxu3  ;;  %v8292_v17 = vadd.f32 %v1227_v12, %v908_v11  ;;  %v737_v22 = vpop.f32.mrf.mxu0 }
  0xd1   : > { %v8294_v18 = vadd.f32 %v1316_v16, %v909_v6  ;;  %v826_v23 = vpop.f32.mrf.mxu1  ;;  %v910_v34 = vadd.f32 %v8259_v29, %v737_v22  ;;  %v11111_v16 = vshrl.u32 %v8289_v10, 16  ;;  %v11109_v22 = vshll.u32 %v8313_v57, 16 }
  0xd2   : > { %v911_v26 = vadd.f32 %v8256_v27, %v826_v23 }
  0xd3   : > { %v1088_v28 = vrot.slane %v11109_v22, 1 }
  0xd7   : > { %v1229_v35 = vpop.f32.mrf.mxu2 }
  0xd8   : > { %v1318_v37 = vpop.f32.mrf.mxu3  ;;  %v8304_v40 = vadd.f32 %v1229_v35, %v910_v34  ;;  %v740_v50 = vpop.f32.mrf.mxu0 }
  0xd9   : > { %v8306_v44 = vadd.f32 %v1318_v37, %v911_v26  ;;  %v829_v51 = vpop.f32.mrf.mxu1  ;;  %v912_v58 = vadd.f32 %v8259_v29, %v740_v50  ;;  %v1084_v26 = vor.u32 %v11111_v16, %v1080_v30 }
  0xda   : > { %v913_v52 = vadd.f32 %v8256_v27, %v829_v51 }
  0xdb   : > { %779 = vmatmul.bf16.gmra.mxu0 %v8265_v33 }
  0xdc   : > { %868 = vmatmul.bf16.gmra.mxu1 %v8265_v33  ;;  %1271 = vmatmul.bf16.gmra.mxu2 %v1081_v56 }
  0xdd   : > { %1360 = vmatmul.bf16.gmra.mxu3 %v1081_v56 }
  0xdf   : > { %v1232_v0 = vpop.f32.mrf.mxu2 }
  0xe0   : > { %v1321_v4 = vpop.f32.mrf.mxu3  ;;  %v8316_v5 = vadd.f32 %v1232_v0, %v912_v58  ;;  %v742_v11 = vpop.f32.mrf.mxu0  ;;  %v1089_v58 = vsel %vm989_vm0, %v1084_v26, %v1088_v28  ;;  %v8337_v0 = vld [vmem:[%s8144_s30 + $0x68] sm:$0xff] }
  0xe1   : > { %v8318_v6 = vadd.f32 %v1321_v4, %v913_v52  ;;  %v831_v12 = vpop.f32.mrf.mxu1  ;;  %v914_v34 = vadd.f32 %v8259_v29, %v742_v11  ;;  %v11114_v22 = vshll.u32 %v8337_v0, 16  ;;  %v11127_v45 = vshrl.u32 %v8337_v0, 16 }
  0xe2   : > { %v915_v23 = vadd.f32 %v8256_v27, %v831_v12 }
  0xe7   : > { %v1234_v35 = vpop.f32.mrf.mxu2 }
  0xe8   : > { %v1323_v37 = vpop.f32.mrf.mxu3  ;;  %v8328_v50 = vadd.f32 %v1234_v35, %v914_v34  ;;  %v745_v56 = vpop.f32.mrf.mxu0 }
  0xe9   : > { %v8330_v51 = vadd.f32 %v1323_v37, %v915_v23  ;;  %v834_v52 = vpop.f32.mrf.mxu1  ;;  %v916_v4 = vadd.f32 %v8259_v29, %v745_v56  ;;  %v11115_v37 = vshrl.u32 %v8313_v57, 16  ;;  %v8351_v56 = vrot.slane %v11114_v22, 1 }
  0xea   : > { %v917_v30 = vadd.f32 %v8256_v27, %v834_v52 }
  0xeb   : > { %784 = vmatmul.bf16.gmra.mxu0 %v8289_v10 }
  0xec   : > { %873 = vmatmul.bf16.gmra.mxu1 %v8289_v10  ;;  %1276 = vmatmul.bf16.gmra.mxu2 %v1089_v58 }
  0xed   : > { %1365 = vmatmul.bf16.gmra.mxu3 %v1089_v58  ;;  %v1092_v58 = vor.u32 %v11115_v37, %v1088_v28  ;;  %v6319_v28 = vld [vmem:[%s11088_s1 + $0x170] sm:$0xf] }
  0xef   : > { %v1237_v11 = vpop.f32.mrf.mxu2 }
  0xf0   : > { %v1326_v12 = vpop.f32.mrf.mxu3  ;;  %v8340_v23 = vadd.f32 %v1237_v11, %v916_v4  ;;  %v747_v26 = vpop.f32.mrf.mxu0 }
  0xf1   : > { %v8342_v34 = vadd.f32 %v1326_v12, %v917_v30  ;;  %v836_v35 = vpop.f32.mrf.mxu1  ;;  %v918_v4 = vadd.f32 %v8259_v29, %v747_v26  ;;  %v7487_v26 = vld [vmem:[%s11088_s1 + $0x174] sm:$0xf0] }
  0xf2   : > { %v919_v52 = vadd.f32 %v8256_v27, %v836_v35  ;;  %v1097_v35 = vsel %vm989_vm0, %v1092_v58, %v8351_v56  ;;  %v6321_v58 = vld [vmem:[%s11088_s1 + $0x178] sm:$0xf0] }
  0xf7   : > { %v1239_v30 = vpop.f32.mrf.mxu2 }
  0xf8   : > { %v1328_v11 = vpop.f32.mrf.mxu3  ;;  %v8354_v12 = vadd.f32 %v1239_v30, %v918_v4  ;;  %v750_v16 = vpop.f32.mrf.mxu0  ;;  %v6320_v4 = vor.u32 %v7487_v26, %v6319_v28  ;;  %v6399_v30 = vld [vmem:[%s11088_s1 + $0x1f0] sm:$0xf]  ;;  %v7502_v28 = vld [vmem:[%s11088_s1 + $0x1f4] sm:$0xf]  ;;  %v6401_v26 = vld [vmem:[%s11088_s1 + $0x1f8] sm:$0xf0] }
  0xf9   : > { %v8356_v25 = vadd.f32 %v1328_v11, %v919_v52  ;;  %v839_v46 = vpop.f32.mrf.mxu1  ;;  %v7486_v52 = vld [vmem:[%s11088_s1 + $0x174] sm:$0xf]  ;;  %v7503_v11 = vld [vmem:[%s11088_s1 + $0x1f4] sm:$0xf0]  ;;  %v6404_v20 = vor.u32 %v7502_v28, %v6401_v26 }
  0xfa   : > { %v921_v22 = vadd.f32 %v8256_v27, %v839_v46  ;;  %v6324_v37 = vor.u32 %v7486_v52, %v6321_v58  ;;  %v6400_v21 = vor.u32 %v7503_v11, %v6399_v30  ;;  %1604 = vmatpush.bf16.msrb.mxu0 %v6320_v4  ;;  %v920_v46 = vadd.f32 %v8259_v29, %v750_v16  ;;  %v7485_v52 = vld [vmem:[%s11088_s1 + $0x164] sm:$0xf0]  ;;  %v7484_v58 = vld [vmem:[%s11088_s1 + $0x164] sm:$0xf] }
  0xfb   : > { %789 = vmatmul.bf16.gmra.mxu0 %v8313_v57  ;;  %2126 = vmatpush.bf16.msrb.mxu3 %v6404_v20  ;;  %v7501_v11 = vld [vmem:[%s11088_s1 + $0x1e4] sm:$0xf0]  ;;  %v527_v20 = vld [vmem:[%s8144_s30 + $0x78] sm:$0xf] }
  0xfc   : > { %878 = vmatmul.bf16.gmra.mxu1 %v8313_v57  ;;  %1281 = vmatmul.bf16.gmra.mxu2 %v1097_v35 }
  0xfd   : > { %1370 = vmatmul.bf16.gmra.mxu3 %v1097_v35  ;;  %1693 = vmatpush.bf16.msrb.mxu1 %v6324_v37  ;;  %v6311_v35 = vld [vmem:[%s11088_s1 + $0x160] sm:$0xf] }
  0xfe   : > { %2037 = vmatpush.bf16.msrb.mxu2 %v6400_v21  ;;  %v6312_v16 = vor.u32 %v7485_v52, %v6311_v35  ;;  %v6313_v21 = vld [vmem:[%s11088_s1 + $0x168] sm:$0xf0]  ;;  %v6391_v37 = vld [vmem:[%s11088_s1 + $0x1e0] sm:$0xf]  ;;  %v968_v35 = vld [vmem:[%s8144_s30 + $0x7c] sm:$0x7] }
  0xff   : > { %v1242_v4 = vpop.f32.mrf.mxu2  ;;  %v6316_v52 = vor.u32 %v7484_v58, %v6313_v21  ;;  %v6392_v3 = vor.u32 %v7501_v11, %v6391_v37  ;;  %v7482_v58 = vld [vmem:[%s11088_s1 + $0x154] sm:$0xf]  ;;  %2127 = vmatpush.bf16.msrb.mxu3 %v6396_v2  ;;  %v6384_v21 = vor.u32 %v7499_v8, %v6383_v61  ;;  %v6385_v37 = vld [vmem:[%s11088_s1 + $0x1d8] sm:$0xf0]  ;;  %v8453_v2 = vrot.slane %v11126_v15, 1 }
 0x100   : > { %v1331_v30 = vpop.f32.mrf.mxu3  ;;  %v8411_v28 = vadd.f32 %v1242_v4, %v920_v46  ;;  %v752_v9 = vpop.f32.mrf.mxu0  ;;  %1605 = vmatpush.bf16.msrb.mxu0 %v6312_v16  ;;  %v7483_v46 = vld [vmem:[%s11088_s1 + $0x154] sm:$0xf0]  ;;  %v7480_v61 = vld [vmem:[%s11088_s1 + $0x144] sm:$0xf] }
 0x101   : > { %v8413_v26 = vadd.f32 %v1331_v30, %v921_v22  ;;  %v841_v14 = vpop.f32.mrf.mxu1  ;;  %v6303_v22 = vld [vmem:[%s11088_s1 + $0x150] sm:$0xf]  ;;  %1694 = vmatpush.bf16.msrb.mxu1 %v6316_v52  ;;  %v6305_v30 = vld [vmem:[%s11088_s1 + $0x158] sm:$0xf0] }
 0x102   : > { %2038 = vmatpush.bf16.msrb.mxu2 %v6392_v3  ;;  %v6304_v4 = vor.u32 %v7483_v46, %v6303_v22  ;;  %v6308_v16 = vor.u32 %v7482_v58, %v6305_v30  ;;  %v7498_v3 = vld [vmem:[%s11088_s1 + $0x1d4] sm:$0xf]  ;;  %v923_v11 = vadd.f32 %v8256_v27, %v841_v14  ;;  %v1100_v22 = vor.u32 %v11127_v45, %v8351_v56  ;;  %v6295_v14 = vld [vmem:[%s11088_s1 + $0x140] sm:$0xf]  ;;  %v7481_v56 = vld [vmem:[%s11088_s1 + $0x144] sm:$0xf0] }
 0x103   : > { %v6388_v52 = vor.u32 %v7498_v3, %v6385_v37  ;;  %v8455_v46 = vunpack.c.l.b16 %v527_v20  ;;  %v987_v58 = vunpack.c.l.b16 %v968_v35  ;;  %v922_v30 = vadd.f32 %v8259_v29, %v752_v9  ;;  %v6297_v9 = vld [vmem:[%s11088_s1 + $0x148] sm:$0xf0] }
 0x104   : > { %1606 = vmatpush.bf16.msrb.mxu0 %v6304_v4  ;;  %v6296_v35 = vor.u32 %v7481_v56, %v6295_v14  ;;  %v6375_v4 = vld [vmem:[%s11088_s1 + $0x1c0] sm:$0xf]  ;;  %v7496_v56 = vld [vmem:[%s11088_s1 + $0x1c4] sm:$0xf]  ;;  %v6377_v45 = vld [vmem:[%s11088_s1 + $0x1c8] sm:$0xf0]  ;;  %v1105_v55 = vsel %vm989_vm0, %v1100_v22, %v8453_v2 }
 0x105   : > { %1695 = vmatpush.bf16.msrb.mxu1 %v6308_v16  ;;  %2128 = vmatpush.bf16.msrb.mxu3 %v6388_v52  ;;  %v7497_v16 = vld [vmem:[%s11088_s1 + $0x1c4] sm:$0xf0]  ;;  %v6300_v52 = vor.u32 %v7480_v61, %v6297_v9  ;;  %v6287_v61 = vld [vmem:[%s11088_s1 + $0x130] sm:$0xf] }
 0x106   : > { %2039 = vmatpush.bf16.msrb.mxu2 %v6384_v21  ;;  %v6376_v14 = vor.u32 %v7497_v16, %v6375_v4  ;;  %v7495_v4 = vld [vmem:[%s11088_s1 + $0x1b4] sm:$0xf0]  ;;  %v7494_v16 = vld [vmem:[%s11088_s1 + $0x1b4] sm:$0xf] }
 0x107   : > { %v1244_v20 = vpop.f32.mrf.mxu2 }
 0x108   : > { %v1333_v8 = vpop.f32.mrf.mxu3  ;;  %v8476_v21 = vadd.f32 %v1244_v20, %v922_v30  ;;  %v755_v37 = vpop.f32.mrf.mxu0  ;;  %v8489_v30 = vpack.c.b16 %v987_v58, %v8455_v46  ;;  %1607 = vmatpush.bf16.msrb.mxu0 %v6296_v35  ;;  %v7479_v20 = vld [vmem:[%s11088_s1 + $0x134] sm:$0xf0]  ;;  %v7478_v58 = vld [vmem:[%s11088_s1 + $0x134] sm:$0xf] }
 0x109   : > { %v8478_v3 = vadd.f32 %v1333_v8, %v923_v11  ;;  %v844_v15 = vpop.f32.mrf.mxu1  ;;  %v6380_v11 = vor.u32 %v7496_v56, %v6377_v45  ;;  %1696 = vmatpush.bf16.msrb.mxu1 %v6300_v52  ;;  %v6288_v22 = vor.u32 %v7479_v20, %v6287_v61  ;;  %v6289_v45 = vld [vmem:[%s11088_s1 + $0x138] sm:$0xf0]  ;;  %v6367_v8 = vld [vmem:[%s11088_s1 + $0x1b0] sm:$0xf]  ;;  %v924_v61 = vadd.f32 %v8259_v29, %v755_v37  ;;  %v6279_v20 = vld [vmem:[%s11088_s1 + $0x120] sm:$0xf] }
 0x10a   : > { %2040 = vmatpush.bf16.msrb.mxu2 %v6376_v14  ;;  %v925_v35 = vadd.f32 %v8256_v27, %v844_v15  ;;  %v6292_v9 = vor.u32 %v7478_v58, %v6289_v45  ;;  %v6369_v52 = vld [vmem:[%s11088_s1 + $0x1b8] sm:$0xf0]  ;;  %v11133_v14 = vshrl.u32 %v8361_v24, 16  ;;  %v1110_v56 = vshll.u32 %v8489_v30, 16  ;;  %v7477_v58 = vld [vmem:[%s11088_s1 + $0x124] sm:$0xf0] }
 0x10b   : > { %794 = vmatmul.bf16.gmra.mxu0 %v8337_v0  ;;  %2129 = vmatpush.bf16.msrb.mxu3 %v6380_v11  ;;  %v6372_v15 = vor.u32 %v7494_v16, %v6369_v52  ;;  %v7476_v45 = vld [vmem:[%s11088_s1 + $0x124] sm:$0xf]  ;;  %v6281_v37 = vld [vmem:[%s11088_s1 + $0x128] sm:$0xf0] }
 0x10c   : > { %883 = vmatmul.bf16.gmra.mxu1 %v8337_v0  ;;  %1286 = vmatmul.bf16.gmra.mxu2 %v1105_v55 }
 0x10d   : > { %1375 = vmatmul.bf16.gmra.mxu3 %v1105_v55  ;;  %1608 = vmatpush.bf16.msrb.mxu0 %v6288_v22  ;;  %v6368_v55 = vor.u32 %v7495_v4, %v6367_v8  ;;  %v6280_v22 = vor.u32 %v7477_v58, %v6279_v20  ;;  %v6359_v8 = vld [vmem:[%s11088_s1 + $0x1a0] sm:$0xf]  ;;  %v7492_v58 = vld [vmem:[%s11088_s1 + $0x1a4] sm:$0xf] }
 0x10e   : > { %1697 = vmatpush.bf16.msrb.mxu1 %v6292_v9  ;;  %v7493_v9 = vld [vmem:[%s11088_s1 + $0x1a4] sm:$0xf0]  ;;  %v6364_v43 = vor.u32 %v7492_v58, %v6361_v54  ;;  %v6351_v54 = vld [vmem:[%s11088_s1 + $0x190] sm:$0xf] }
 0x10f   : > { %v1247_v60 = vpop.f32.mrf.mxu2  ;;  %2041 = vmatpush.bf16.msrb.mxu2 %v6368_v55  ;;  %v6284_v55 = vor.u32 %v7476_v45, %v6281_v37  ;;  %v6360_v20 = vor.u32 %v7493_v9, %v6359_v8  ;;  %2130 = vmatpush.bf16.msrb.mxu3 %v6372_v15  ;;  %v6273_v15 = vld [vmem:[%s11088_s1 + $0x118] sm:$0xf0]  ;;  %v7490_v8 = vld [vmem:[%s11088_s1 + $0x194] sm:$0xf] }
 0x110   : > { %v1336_v11 = vpop.f32.mrf.mxu3  ;;  %v8539_v4 = vadd.f32 %v1247_v60, %v924_v61  ;;  %v757_v52 = vpop.f32.mrf.mxu0  ;;  %v6271_v60 = vld [vmem:[%s11088_s1 + $0x110] sm:$0xf]  ;;  %v7474_v61 = vld [vmem:[%s11088_s1 + $0x114] sm:$0xf]  ;;  %v6353_v9 = vld [vmem:[%s11088_s1 + $0x198] sm:$0xf0] }
 0x111   : > { %v8541_v16 = vadd.f32 %v1336_v11, %v925_v35  ;;  %v846_v49 = vpop.f32.mrf.mxu1  ;;  %1609 = vmatpush.bf16.msrb.mxu0 %v6280_v22  ;;  %v7475_v35 = vld [vmem:[%s11088_s1 + $0x114] sm:$0xf0]  ;;  %v6276_v22 = vor.u32 %v7474_v61, %v6273_v15  ;;  %v6356_v61 = vor.u32 %v7490_v8, %v6353_v9  ;;  %v926_v15 = vadd.f32 %v8259_v29, %v757_v52  ;;  %v6265_v52 = vld [vmem:[%s11088_s1 + $0x108] sm:$0xf0] }
 0x112   : > { %1698 = vmatpush.bf16.msrb.mxu1 %v6284_v55  ;;  %v6272_v45 = vor.u32 %v7475_v35, %v6271_v60  ;;  %v7491_v11 = vld [vmem:[%s11088_s1 + $0x194] sm:$0xf0]  ;;  %v1877_v55 = vrot.slane %v998_v36, 2  ;;  %v927_v58 = vadd.f32 %v8256_v27, %v846_v49  ;;  %v1876_v60 = vrot.slane %v1002_v42, 1  ;;  %v6263_v36 = vld [vmem:[%s11088_s1 + $0x100] sm:$0xf] }
 0x113   : > { %2042 = vmatpush.bf16.msrb.mxu2 %v6360_v20  ;;  %v6352_v37 = vor.u32 %v7491_v11, %v6351_v54  ;;  %v1108_v20 = vor.u32 %v11133_v14, %v8453_v2  ;;  %v1112_v35 = vrot.slane %v1110_v56, 1  ;;  %2131 = vmatpush.bf16.msrb.mxu3 %v6364_v43  ;;  %v7473_v49 = vld [vmem:[%s11088_s1 + $0x104] sm:$0xf0]  ;;  %v7472_v42 = vld [vmem:[%s11088_s1 + $0x104] sm:$0xf] }
 0x114   : > { %v6264_v43 = vor.u32 %v7473_v49, %v6263_v36  ;;  %v7489_v54 = vld [vmem:[%s11088_s1 + $0x184] sm:$0xf0]  ;;  %v7488_v49 = vld [vmem:[%s11088_s1 + $0x184] sm:$0xf]  ;;  %v6345_v14 = vld [vmem:[%s11088_s1 + $0x188] sm:$0xf0] }
 0x115   : > { %1610 = vmatpush.bf16.msrb.mxu0 %v6272_v45  ;;  %v6343_v45 = vld [vmem:[%s11088_s1 + $0x180] sm:$0xf]  ;;  %v1113_v48 = vsel %vm989_vm0, %v1108_v20, %v1112_v35 }
 0x116   : > { %1699 = vmatpush.bf16.msrb.mxu1 %v6276_v22  ;;  %v6344_v36 = vor.u32 %v7489_v54, %v6343_v45 }
 0x117   : > { %v1249_v2 = vpop.f32.mrf.mxu2  ;;  %2043 = vmatpush.bf16.msrb.mxu2 %v6352_v37  ;;  %v6268_v37 = vor.u32 %v7472_v42, %v6265_v52  ;;  %2132 = vmatpush.bf16.msrb.mxu3 %v6356_v61 }
 0x118   : > { %v1338_v56 = vpop.f32.mrf.mxu3  ;;  %v8600_v11 = vadd.f32 %v1249_v2, %v926_v15  ;;  %v760_v8 = vpop.f32.mrf.mxu0  ;;  %v6348_v15 = vor.u32 %v7488_v49, %v6345_v14 }
 0x119   : > { %v8602_v22 = vadd.f32 %v1338_v56, %v927_v58  ;;  %v849_v9 = vpop.f32.mrf.mxu1  ;;  %1611 = vmatpush.bf16.msrb.mxu0 %v6264_v43  ;;  %v8613_v58 = vor.u32 %v1877_v55, %v1876_v60  ;;  %v928_v20 = vadd.f32 %v8259_v29, %v760_v8  ;;  %v528_v56 = vld [vmem:[%s8144_s30 + $0x7c] sm:$0x3]  ;;  %v1114_v60 = vshrl.u32 %v8489_v30, 16 }
 0x11a   : > { %1700 = vmatpush.bf16.msrb.mxu1 %v6268_v37  ;;  %v929_v42 = vadd.f32 %v8256_v27, %v849_v9  ;;  %v608_v54 = vunpack.c.l.b16 %v528_v56  ;;  %v1455_v37 = vld [vmem:[%s8144_s30] sm:$0xe] }
 0x11b   : > { %799 = vmatmul.bf16.gmra.mxu0 %v8361_v24  ;;  %2044 = vmatpush.bf16.msrb.mxu2 %v6344_v36  ;;  %v1474_v9 = vunpack.c.l.b16 %v1455_v37  ;;  %v1116_v56 = vor.u32 %v1114_v60, %v1112_v35 }
 0x11c   : > { %888 = vmatmul.bf16.gmra.mxu1 %v8361_v24  ;;  %1291 = vmatmul.bf16.gmra.mxu2 %v1113_v48  ;;  %v624_v36 = vpack.c.b16 %v608_v54, %v8455_v46 }
 0x11d   : > { %1380 = vmatmul.bf16.gmra.mxu3 %v1113_v48  ;;  %v11136_v48 = vunpack.c.h.b16 %v8147_v31 }
 0x11e   : > { %2133 = vmatpush.bf16.msrb.mxu3 %v6348_v15 }
 0x11f   : > { %v1252_v2 = vpop.f32.mrf.mxu2 }
 0x120   : > { %v1341_v61 = vpop.f32.mrf.mxu3  ;;  %v8618_v14 = vadd.f32 %v1252_v2, %v928_v20  ;;  %v762_v52 = vpop.f32.mrf.mxu0 }
 0x121   : > { %v8620_v43 = vadd.f32 %v1341_v61, %v929_v42  ;;  %v851_v45 = vpop.f32.mrf.mxu1  ;;  %v930_v8 = vadd.f32 %v8259_v29, %v762_v52 }
 0x122   : > { %v931_v55 = vadd.f32 %v8256_v27, %v851_v45  ;;  %v1475_v45 = vpack.c.b16 %v11136_v48, %v1474_v9 }
 0x123   : > { %11152 = vst [vmem:[#allocation14_spill] sm:$0xff] %v8620_v43 }
 0x124   : > { %v1869_v52 = vshrl.u32 %v1475_v45, 16  ;;  %v1872_v54 = vshll.u32 %v1475_v45, 16  ;;  %v1477_v48 = vrot.slane %v1475_v45, 1 }
 0x126   : > { %v1871_v31 = vrot.slane %v1869_v52, 1  ;;  %v1874_v9 = vrot.slane %v1872_v54, 2 }
 0x127   : > { %v1254_v49 = vpop.f32.mrf.mxu2 }
 0x128   : > { %v1343_v15 = vpop.f32.mrf.mxu3  ;;  %v8628_v20 = vadd.f32 %v1254_v49, %v930_v8  ;;  %v765_v2 = vpop.f32.mrf.mxu0 }
 0x129   : > { %v8630_v42 = vadd.f32 %v1343_v15, %v931_v55  ;;  %v854_v61 = vpop.f32.mrf.mxu1  ;;  %v932_v43 = vadd.f32 %v8259_v29, %v765_v2 }
 0x12a   : > { %11153 = vst [vmem:[#allocation15_spill] sm:$0xff] %v8628_v20  ;;  %v933_v37 = vadd.f32 %v8256_v27, %v854_v61 }
 0x12b   : > { %11154 = vst [vmem:[#allocation16_spill] sm:$0xff] %v8630_v42  ;;  %804 = vmatmul.bf16.gmra.mxu0 %v624_v36 }
 0x12c   : > { %893 = vmatmul.bf16.gmra.mxu1 %v624_v36  ;;  %1296 = vmatmul.bf16.gmra.mxu2 %v1116_v56  ;;  %v1478_v36 = vrot.slane %v8150_v32, 1 }
 0x12d   : > { %1385 = vmatmul.bf16.gmra.mxu3 %v1116_v56  ;;  %v1875_v56 = vor.u32 %v1874_v9, %v1871_v31  ;;  %v11157_v9 = vshrl.u32 %v8161_v41, 16 }
 0x12f   : > { %v1257_v8 = vpop.f32.mrf.mxu2  ;;  %v1879_v32 = vsel %vm1867_vm2, %v1875_v56, %v8613_v58  ;;  %v11158_v56 = vshll.u32 %v8161_v41, 16 }
 0x130   : > { %v1346_v49 = vpop.f32.mrf.mxu3  ;;  %v8636_v55 = vadd.f32 %v1257_v8, %v932_v43  ;;  %v767_v35 = vpop.f32.mrf.mxu0  ;;  %v1479_v43 = vsel %vm1476_vm1, %v1477_v48, %v1478_v36 }
 0x131   : > { %v8638_v15 = vadd.f32 %v1346_v49, %v933_v37  ;;  %v856_v60 = vpop.f32.mrf.mxu1  ;;  %v934_v42 = vadd.f32 %v8259_v29, %v767_v35 }
 0x132   : > { %v935_v61 = vadd.f32 %v8256_v27, %v856_v60 }
 0x137   : > { %v1259_v2 = vpop.f32.mrf.mxu2 }
 0x138   : > { %v1348_v20 = vpop.f32.mrf.mxu3  ;;  %v8644_v37 = vadd.f32 %v1259_v2, %v934_v42  ;;  %v770_v52 = vpop.f32.mrf.mxu0  ;;  %v1881_v2 = vrot.slane %v11158_v56, 2 }
 0x139   : > { %v8646_v8 = vadd.f32 %v1348_v20, %v935_v61  ;;  %v859_v54 = vpop.f32.mrf.mxu1  ;;  %v936_v45 = vadd.f32 %v8259_v29, %v770_v52  ;;  %v1880_v61 = vrot.slane %v11157_v9, 1 }
 0x13a   : > { %v937_v31 = vadd.f32 %v8256_v27, %v859_v54 }
 0x13b   : > { %11155 = vst [vmem:[#allocation17_spill] sm:$0xff] %v8646_v8  ;;  %1612 = vmatmul.bf16.vlgmr.msrb.gmra.mxu0 %v1479_v43 }
 0x13c   : > { %1701 = vmatmul.bf16.vlgmr.msrb.gmra.mxu1 %v1479_v43  ;;  %2045 = vmatmul.bf16.vlgmr.msrb.gmra.mxu2 %v1879_v32  ;;  %v1480_v43 = vrot.slane %v8161_v41, 1 }
 0x13d   : > { %2134 = vmatmul.bf16.vlgmr.msrb.gmra.mxu3 %v1879_v32  ;;  %v1882_v32 = vor.u32 %v1881_v2, %v1880_v61 }
 0x13f   : > { %v1262_v49 = vpop.f32.mrf.mxu2  ;;  %v1883_v56 = vsel %vm1867_vm2, %v8613_v58, %v1882_v32  ;;  %v11164_v58 = vshll.u32 %v8173_v47, 16 }
 0x140   : > { %v1351_v35 = vpop.f32.mrf.mxu3  ;;  %v8652_v48 = vadd.f32 %v1262_v49, %v936_v45  ;;  %v772_v20 = vpop.f32.mrf.mxu0 }
 0x141   : > { %v8654_v42 = vadd.f32 %v1351_v35, %v937_v31  ;;  %v861_v60 = vpop.f32.mrf.mxu1  ;;  %v938_v52 = vadd.f32 %v8259_v29, %v772_v20  ;;  %v1481_v31 = vsel %vm1476_vm1, %v1478_v36, %v1480_v43 }
 0x142   : > { %v939_v54 = vadd.f32 %v8256_v27, %v861_v60 }
 0x143   : > { %11156 = vst [vmem:[#allocation18_spill] sm:$0xff] %v8654_v42 }
 0x147   : > { %v1264_v8 = vpop.f32.mrf.mxu2 }
 0x148   : > { %v1353_v45 = vpop.f32.mrf.mxu3  ;;  %v8664_v49 = vadd.f32 %v1264_v8, %v938_v52  ;;  %v775_v42 = vpop.f32.mrf.mxu0  ;;  %v11163_v52 = vshrl.u32 %v8173_v47, 16 }
 0x149   : > { %v8666_v35 = vadd.f32 %v1353_v45, %v939_v54  ;;  %v864_v9 = vpop.f32.mrf.mxu1  ;;  %v940_v20 = vadd.f32 %v8259_v29, %v775_v42 }
 0x14a   : > { %11159 = vst [vmem:[#allocation19_spill] sm:$0xff] %v8664_v49  ;;  %v941_v41 = vadd.f32 %v8256_v27, %v864_v9  ;;  %v1884_v45 = vrot.slane %v11163_v52, 1  ;;  %v1482_v9 = vrot.slane %v8173_v47, 1 }
 0x14b   : > { %11160 = vst [vmem:[#allocation20_spill] sm:$0xff] %v8666_v35  ;;  %1617 = vmatmul.bf16.gmra.mxu0 %v1481_v31 }
 0x14c   : > { %1706 = vmatmul.bf16.gmra.mxu1 %v1481_v31  ;;  %2050 = vmatmul.bf16.gmra.mxu2 %v1883_v56  ;;  %v1885_v31 = vrot.slane %v11164_v58, 2 }
 0x14d   : > { %2139 = vmatmul.bf16.gmra.mxu3 %v1883_v56 }
 0x14e   : > { %v1886_v35 = vor.u32 %v1885_v31, %v1884_v45 }
 0x14f   : > { %v1267_v60 = vpop.f32.mrf.mxu2 }
 0x150   : > { %v1356_v61 = vpop.f32.mrf.mxu3  ;;  %v8672_v36 = vadd.f32 %v1267_v60, %v940_v20  ;;  %v777_v2 = vpop.f32.mrf.mxu0 }
 0x151   : > { %v8674_v8 = vadd.f32 %v1356_v61, %v941_v41  ;;  %v866_v54 = vpop.f32.mrf.mxu1  ;;  %v942_v42 = vadd.f32 %v8259_v29, %v777_v2  ;;  %v1483_v41 = vsel %vm1476_vm1, %v1480_v43, %v1482_v9 }
 0x152   : > { %11161 = vst [vmem:[#allocation21_spill] sm:$0xff] %v8672_v36  ;;  %v943_v56 = vadd.f32 %v8256_v27, %v866_v54  ;;  %v1887_v36 = vsel %vm1867_vm2, %v1882_v32, %v1886_v35  ;;  %v11169_v32 = vshll.u32 %v8185_v53, 16 }
 0x153   : > { %11162 = vst [vmem:[#allocation22_spill] sm:$0xff] %v8674_v8 }
 0x157   : > { %v1269_v49 = vpop.f32.mrf.mxu2 }
 0x158   : > { %v1358_v20 = vpop.f32.mrf.mxu3  ;;  %v8684_v60 = vadd.f32 %v1269_v49, %v942_v42  ;;  %v780_v8 = vpop.f32.mrf.mxu0 }
 0x159   : > { %v8686_v61 = vadd.f32 %v1358_v20, %v943_v56  ;;  %v869_v52 = vpop.f32.mrf.mxu1  ;;  %v944_v2 = vadd.f32 %v8259_v29, %v780_v8  ;;  %v11168_v56 = vshrl.u32 %v8185_v53, 16  ;;  %v1889_v20 = vrot.slane %v11169_v32, 2 }
 0x15a   : > { %v945_v47 = vadd.f32 %v8256_v27, %v869_v52 }
 0x15b   : > { %11165 = vst [vmem:[#allocation23_spill] sm:$0xff] %v8686_v61  ;;  %1622 = vmatmul.bf16.gmra.mxu0 %v1483_v41  ;;  %v1888_v42 = vrot.slane %v11168_v56, 1 }
 0x15c   : > { %1711 = vmatmul.bf16.gmra.mxu1 %v1483_v41  ;;  %2055 = vmatmul.bf16.gmra.mxu2 %v1887_v36  ;;  %v1484_v41 = vrot.slane %v8185_v53, 1 }
 0x15d   : > { %2144 = vmatmul.bf16.gmra.mxu3 %v1887_v36  ;;  %v1890_v52 = vor.u32 %v1889_v20, %v1888_v42 }
 0x15f   : > { %v1272_v54 = vpop.f32.mrf.mxu2 }
 0x160   : > { %v1361_v45 = vpop.f32.mrf.mxu3  ;;  %v8691_v58 = vadd.f32 %v1272_v54, %v944_v2  ;;  %v782_v49 = vpop.f32.mrf.mxu0 }
 0x161   : > { %v8693_v43 = vadd.f32 %v1361_v45, %v945_v47  ;;  %v871_v31 = vpop.f32.mrf.mxu1  ;;  %v946_v8 = vadd.f32 %v8259_v29, %v782_v49  ;;  %v1485_v47 = vsel %vm1476_vm1, %v1482_v9, %v1484_v41 }
 0x162   : > { %11166 = vst [vmem:[#allocation24_spill] sm:$0xff] %v8691_v58  ;;  %v947_v36 = vadd.f32 %v8256_v27, %v871_v31  ;;  %v1891_v58 = vsel %vm1867_vm2, %v1886_v35, %v1890_v52  ;;  %v11174_v35 = vshll.u32 %v8197_v59, 16 }
 0x163   : > { %11167 = vst [vmem:[#allocation25_spill] sm:$0xff] %v8693_v43 }
 0x167   : > { %v1274_v61 = vpop.f32.mrf.mxu2 }
 0x168   : > { %v1363_v2 = vpop.f32.mrf.mxu3  ;;  %v8703_v54 = vadd.f32 %v1274_v61, %v946_v8  ;;  %v785_v43 = vpop.f32.mrf.mxu0 }
 0x169   : > { %v8705_v45 = vadd.f32 %v1363_v2, %v947_v36  ;;  %v874_v56 = vpop.f32.mrf.mxu1  ;;  %v948_v49 = vadd.f32 %v8259_v29, %v785_v43  ;;  %v11173_v36 = vshrl.u32 %v8197_v59, 16  ;;  %v1893_v2 = vrot.slane %v11174_v35, 2 }
 0x16a   : > { %v949_v53 = vadd.f32 %v8256_v27, %v874_v56 }
 0x16b   : > { %11170 = vst [vmem:[#allocation26_spill] sm:$0xff] %v8705_v45  ;;  %1627 = vmatmul.bf16.gmra.mxu0 %v1485_v47  ;;  %v1892_v8 = vrot.slane %v11173_v36, 1 }
 0x16c   : > { %1716 = vmatmul.bf16.gmra.mxu1 %v1485_v47  ;;  %2060 = vmatmul.bf16.gmra.mxu2 %v1891_v58  ;;  %v1486_v47 = vrot.slane %v8197_v59, 1 }
 0x16d   : > { %2149 = vmatmul.bf16.gmra.mxu3 %v1891_v58  ;;  %v1894_v56 = vor.u32 %v1893_v2, %v1892_v8 }
 0x16f   : > { %v1277_v31 = vpop.f32.mrf.mxu2 }
 0x170   : > { %v1366_v42 = vpop.f32.mrf.mxu3  ;;  %v8710_v32 = vadd.f32 %v1277_v31, %v948_v49  ;;  %v787_v61 = vpop.f32.mrf.mxu0 }
 0x171   : > { %v8712_v9 = vadd.f32 %v1366_v42, %v949_v53  ;;  %v876_v20 = vpop.f32.mrf.mxu1  ;;  %v950_v43 = vadd.f32 %v8259_v29, %v787_v61  ;;  %v1487_v53 = vsel %vm1476_vm1, %v1484_v41, %v1486_v47 }
 0x172   : > { %11171 = vst [vmem:[#allocation27_spill] sm:$0xff] %v8710_v32  ;;  %v951_v58 = vadd.f32 %v8256_v27, %v876_v20  ;;  %v1895_v32 = vsel %vm1867_vm2, %v1890_v52, %v1894_v56  ;;  %v11178_v52 = vshll.u32 %v8209_v1, 16 }
 0x173   : > { %11172 = vst [vmem:[#allocation28_spill] sm:$0xff] %v8712_v9 }
 0x177   : > { %v1279_v45 = vpop.f32.mrf.mxu2 }
 0x178   : > { %v1368_v49 = vpop.f32.mrf.mxu3  ;;  %v8722_v31 = vadd.f32 %v1279_v45, %v950_v43  ;;  %v790_v9 = vpop.f32.mrf.mxu0 }
 0x179   : > { %v8724_v42 = vadd.f32 %v1368_v49, %v951_v58  ;;  %v879_v36 = vpop.f32.mrf.mxu1  ;;  %v952_v61 = vadd.f32 %v8259_v29, %v790_v9  ;;  %v11177_v58 = vshrl.u32 %v8209_v1, 16  ;;  %v1897_v49 = vrot.slane %v11178_v52, 2 }
 0x17a   : > { %v953_v59 = vadd.f32 %v8256_v27, %v879_v36 }
 0x17b   : > { %11175 = vst [vmem:[#allocation29_spill] sm:$0xff] %v8724_v42  ;;  %1632 = vmatmul.bf16.gmra.mxu0 %v1487_v53  ;;  %v1896_v43 = vrot.slane %v11177_v58, 1 }
 0x17c   : > { %1721 = vmatmul.bf16.gmra.mxu1 %v1487_v53  ;;  %2065 = vmatmul.bf16.gmra.mxu2 %v1895_v32  ;;  %v1488_v53 = vrot.slane %v8209_v1, 1 }
 0x17d   : > { %2154 = vmatmul.bf16.gmra.mxu3 %v1895_v32  ;;  %v1898_v36 = vor.u32 %v1897_v49, %v1896_v43 }
 0x17f   : > { %v1282_v20 = vpop.f32.mrf.mxu2  ;;  %v1899_v52 = vsel %vm1867_vm2, %v1894_v56, %v1898_v36  ;;  %v11183_v56 = vshll.u32 %v8221_v7, 16 }
 0x180   : > { %v1371_v8 = vpop.f32.mrf.mxu3  ;;  %v8729_v35 = vadd.f32 %v1282_v20, %v952_v61  ;;  %v792_v45 = vpop.f32.mrf.mxu0 }
 0x181   : > { %v8731_v41 = vadd.f32 %v1371_v8, %v953_v59  ;;  %v881_v2 = vpop.f32.mrf.mxu1  ;;  %v954_v9 = vadd.f32 %v8259_v29, %v792_v45  ;;  %v1489_v59 = vsel %vm1476_vm1, %v1486_v47, %v1488_v53 }
 0x182   : > { %v955_v32 = vadd.f32 %v8256_v27, %v881_v2 }
 0x183   : > { %11176 = vst [vmem:[#allocation30_spill] sm:$0xff] %v8731_v41 }
 0x187   : > { %v1284_v42 = vpop.f32.mrf.mxu2 }
 0x188   : > { %v1373_v61 = vpop.f32.mrf.mxu3  ;;  %v8741_v20 = vadd.f32 %v1284_v42, %v954_v9  ;;  %v795_v41 = vpop.f32.mrf.mxu0  ;;  %v11182_v9 = vshrl.u32 %v8221_v7, 16 }
 0x189   : > { %v8743_v8 = vadd.f32 %v1373_v61, %v955_v32  ;;  %v884_v58 = vpop.f32.mrf.mxu1  ;;  %v956_v45 = vadd.f32 %v8259_v29, %v795_v41 }
 0x18a   : > { %v957_v1 = vadd.f32 %v8256_v27, %v884_v58  ;;  %v1900_v61 = vrot.slane %v11182_v9, 1 }
 0x18b   : > { %11179 = vst [vmem:[#allocation31_spill] sm:$0xff] %v8743_v8  ;;  %1637 = vmatmul.bf16.gmra.mxu0 %v1489_v59  ;;  %v8757_v8 = vld [vmem:[%s8144_s30 + $0x38] sm:$0xff] }
 0x18c   : > { %1726 = vmatmul.bf16.gmra.mxu1 %v1489_v59  ;;  %2070 = vmatmul.bf16.gmra.mxu2 %v1899_v52  ;;  %v1901_v59 = vrot.slane %v11183_v56, 2  ;;  %11184 = vst [vmem:[#allocation34_spill] sm:$0xff] %v8757_v8  ;;  %v1490_v58 = vrot.slane %v8757_v8, 1 }
 0x18d   : > { %2159 = vmatmul.bf16.gmra.mxu3 %v1899_v52 }
 0x18e   : > { %v1902_v52 = vor.u32 %v1901_v59, %v1900_v61 }
 0x18f   : > { %v1287_v2 = vpop.f32.mrf.mxu2 }
 0x190   : > { %v1376_v43 = vpop.f32.mrf.mxu3  ;;  %v8748_v47 = vadd.f32 %v1287_v2, %v956_v45  ;;  %v797_v49 = vpop.f32.mrf.mxu0  ;;  %v1903_v56 = vsel %vm1867_vm2, %v1898_v36, %v1902_v52  ;;  %v11189_v36 = vshll.u32 %v8233_v13, 16 }
 0x191   : > { %v8750_v42 = vadd.f32 %v1376_v43, %v957_v1  ;;  %v886_v32 = vpop.f32.mrf.mxu1  ;;  %v958_v45 = vadd.f32 %v8259_v29, %v797_v49  ;;  %v1491_v43 = vsel %vm1476_vm1, %v1488_v53, %v1490_v58 }
 0x192   : > { %11180 = vst [vmem:[#allocation32_spill] sm:$0xff] %v8748_v47  ;;  %v959_v41 = vadd.f32 %v8256_v27, %v886_v32 }
 0x193   : > { %11181 = vst [vmem:[#allocation33_spill] sm:$0xff] %v8750_v42 }
 0x197   : > { %v1289_v2 = vpop.f32.mrf.mxu2 }
 0x198   : > { %v1378_v1 = vpop.f32.mrf.mxu3  ;;  %v8763_v42 = vadd.f32 %v1289_v2, %v958_v45  ;;  %v800_v9 = vpop.f32.mrf.mxu0 }
 0x199   : > { %v8765_v47 = vadd.f32 %v1378_v1, %v959_v41  ;;  %v889_v7 = vpop.f32.mrf.mxu1  ;;  %v960_v49 = vadd.f32 %v8259_v29, %v800_v9  ;;  %v11188_v1 = vshrl.u32 %v8233_v13, 16 }
 0x19a   : > { %v961_v32 = vadd.f32 %v8256_v27, %v889_v7 }
 0x19b   : > { %11185 = vst [vmem:[#allocation35_spill] sm:$0xff] %v8765_v47  ;;  %1642 = vmatmul.bf16.gmra.mxu0 %v1491_v43  ;;  %v1904_v8 = vrot.slane %v11188_v1, 1  ;;  %v8779_v47 = vld [vmem:[%s8144_s30 + $0x40] sm:$0xff] }
 0x19c   : > { %1731 = vmatmul.bf16.gmra.mxu1 %v1491_v43  ;;  %2075 = vmatmul.bf16.gmra.mxu2 %v1903_v56  ;;  %v1905_v43 = vrot.slane %v11189_v36, 2  ;;  %11190 = vst [vmem:[#allocation38_spill] sm:$0xff] %v8779_v47  ;;  %v1492_v7 = vrot.slane %v8779_v47, 1 }
 0x19d   : > { %2164 = vmatmul.bf16.gmra.mxu3 %v1903_v56 }
 0x19e   : > { %v1906_v56 = vor.u32 %v1905_v43, %v1904_v8 }
 0x19f   : > { %v1292_v61 = vpop.f32.mrf.mxu2 }
 0x1a0   : > { %v1381_v59 = vpop.f32.mrf.mxu3  ;;  %v8770_v53 = vadd.f32 %v1292_v61, %v960_v49  ;;  %v802_v41 = vpop.f32.mrf.mxu0  ;;  %v1907_v36 = vsel %vm1867_vm2, %v1902_v52, %v1906_v56  ;;  %v11196_v52 = vshll.u32 %v8245_v19, 16 }
 0x1a1   : > { %v8772_v45 = vadd.f32 %v1381_v59, %v961_v32  ;;  %v891_v2 = vpop.f32.mrf.mxu1  ;;  %v962_v49 = vadd.f32 %v8259_v29, %v802_v41  ;;  %v1493_v59 = vsel %vm1476_vm1, %v1490_v58, %v1492_v7 }
 0x1a2   : > { %11186 = vst [vmem:[#allocation36_spill] sm:$0xff] %v8770_v53  ;;  %v963_v9 = vadd.f32 %v8256_v27, %v891_v2 }
 0x1a3   : > { %11187 = vst [vmem:[#allocation37_spill] sm:$0xff] %v8772_v45 }
 0x1a7   : > { %v1294_v61 = vpop.f32.mrf.mxu2 }
 0x1a8   : > { %v1383_v32 = vpop.f32.mrf.mxu3  ;;  %v8785_v45 = vadd.f32 %v1294_v61, %v962_v49  ;;  %v805_v1 = vpop.f32.mrf.mxu0 }
 0x1a9   : > { %v8787_v53 = vadd.f32 %v1383_v32, %v963_v9  ;;  %v894_v13 = vpop.f32.mrf.mxu1  ;;  %v964_v8 = vadd.f32 %v8259_v29, %v805_v1  ;;  %v11195_v32 = vshrl.u32 %v8245_v19, 16 }
 0x1aa   : > { %11191 = vst [vmem:[#allocation39_spill] sm:$0xff] %v8785_v45  ;;  %v965_v2 = vadd.f32 %v8256_v27, %v894_v13 }
 0x1ab   : > { %11192 = vst [vmem:[#allocation40_spill] sm:$0xff] %v8787_v53  ;;  %1647 = vmatmul.bf16.gmra.mxu0 %v1493_v59  ;;  %v1908_v47 = vrot.slane %v11195_v32, 1  ;;  %v8801_v53 = vld [vmem:[%s8144_s30 + $0x48] sm:$0xff] }
 0x1ac   : > { %1736 = vmatmul.bf16.gmra.mxu1 %v1493_v59  ;;  %2080 = vmatmul.bf16.gmra.mxu2 %v1907_v36  ;;  %v1909_v59 = vrot.slane %v11196_v52, 2  ;;  %v1494_v13 = vrot.slane %v8801_v53, 1 }
 0x1ad   : > { %2169 = vmatmul.bf16.gmra.mxu3 %v1907_v36 }
 0x1ae   : > { %v1910_v36 = vor.u32 %v1909_v59, %v1908_v47 }
 0x1af   : > { %v1297_v41 = vpop.f32.mrf.mxu2 }
 0x1b0   : > { %v1386_v43 = vpop.f32.mrf.mxu3  ;;  %v8792_v58 = vadd.f32 %v1297_v41, %v964_v8  ;;  %v807_v9 = vpop.f32.mrf.mxu0 }
 0x1b1   : > { %v8794_v49 = vadd.f32 %v1386_v43, %v965_v2  ;;  %v896_v61 = vpop.f32.mrf.mxu1  ;;  %v966_v8 = vadd.f32 %v8259_v29, %v807_v9  ;;  %v1495_v43 = vsel %vm1476_vm1, %v1492_v7, %v1494_v13 }
 0x1b2   : > { %11193 = vst [vmem:[#allocation41_spill] sm:$0xff] %v8792_v58  ;;  %v967_v1 = vadd.f32 %v8256_v27, %v896_v61  ;;  %v1911_v27 = vsel %vm1867_vm2, %v1906_v56, %v1910_v36  ;;  %v11198_v56 = vshll.u32 %v8265_v33, 16 }
 0x1b3   : > { %11194 = vst [vmem:[#allocation42_spill] sm:$0xff] %v8794_v49 }
 0x1b7   : > { %v1299_v41 = vpop.f32.mrf.mxu2 }
 0x1b8   : > { %v1388_v2 = vpop.f32.mrf.mxu3  ;;  %v8807_v49 = vadd.f32 %v1299_v41, %v966_v8  ;;  %v1613_v32 = vpop.f32.mrf.mxu0  ;;  %v1913_v41 = vrot.slane %v11198_v56, 2 }
 0x1b9   : > { %v8809_v58 = vadd.f32 %v1388_v2, %v967_v1  ;;  %v1702_v19 = vpop.f32.mrf.mxu1  ;;  %v1782_v52 = vadd.f32 %v1613_v32, %v8268_v38  ;;  %v8825_v2 = vld [vmem:[%s8144_s30 + $0x50] sm:$0xff] }
 0x1ba   : > { %v1783_v45 = vadd.f32 %v1702_v19, %v8270_v39  ;;  %v11197_v39 = vshrl.u32 %v8265_v33, 16 }
 0x1bb   : > { %1652 = vmatmul.bf16.gmra.mxu0 %v1495_v43 }
 0x1bc   : > { %1741 = vmatmul.bf16.gmra.mxu1 %v1495_v43  ;;  %2085 = vmatmul.bf16.gmra.mxu2 %v1911_v27  ;;  %v1912_v8 = vrot.slane %v11197_v39, 1  ;;  %v1496_v43 = vrot.slane %v8825_v2, 1 }
 0x1bd   : > { %2174 = vmatmul.bf16.gmra.mxu3 %v1911_v27 }
 0x1be   : > { %v1914_v32 = vor.u32 %v1913_v41, %v1912_v8 }
 0x1bf   : > { %v2046_v29 = vpop.f32.mrf.mxu2 }
 0x1c0   : > { %v2135_v47 = vpop.f32.mrf.mxu3  ;;  %v8814_v7 = vadd.f32 %v2046_v29, %v1782_v52  ;;  %v1615_v61 = vpop.f32.mrf.mxu0  ;;  %v1497_v52 = vsel %vm1476_vm1, %v1494_v13, %v1496_v43 }
 0x1c1   : > { %v8816_v9 = vadd.f32 %v2135_v47, %v1783_v45  ;;  %v1704_v59 = vpop.f32.mrf.mxu1  ;;  %v1784_v1 = vadd.f32 %v1615_v61, %v8280_v62  ;;  %v1915_v61 = vsel %vm1867_vm2, %v1910_v36, %v1914_v32  ;;  %v11200_v36 = vshll.u32 %v8289_v10, 16 }
 0x1c2   : > { %v1785_v38 = vadd.f32 %v1704_v59, %v8282_v63 }
 0x1c7   : > { %v2048_v19 = vpop.f32.mrf.mxu2 }
 0x1c8   : > { %v2137_v45 = vpop.f32.mrf.mxu3  ;;  %v8829_v27 = vadd.f32 %v2048_v19, %v1784_v1  ;;  %v1618_v63 = vpop.f32.mrf.mxu0  ;;  %v1917_v19 = vrot.slane %v11200_v36, 2 }
 0x1c9   : > { %v8831_v62 = vadd.f32 %v2137_v45, %v1785_v38  ;;  %v1707_v29 = vpop.f32.mrf.mxu1  ;;  %v1786_v47 = vadd.f32 %v1618_v63, %v8292_v17  ;;  %v8847_v45 = vld [vmem:[%s8144_s30 + $0x58] sm:$0xff] }
 0x1ca   : > { %v1787_v33 = vadd.f32 %v1707_v29, %v8294_v18  ;;  %v11199_v18 = vshrl.u32 %v8289_v10, 16 }
 0x1cb   : > { %1657 = vmatmul.bf16.gmra.mxu0 %v1497_v52 }
 0x1cc   : > { %1746 = vmatmul.bf16.gmra.mxu1 %v1497_v52  ;;  %2090 = vmatmul.bf16.gmra.mxu2 %v1915_v61  ;;  %v1916_v41 = vrot.slane %v11199_v18, 1  ;;  %v1498_v52 = vrot.slane %v8847_v45, 1 }
 0x1cd   : > { %2179 = vmatmul.bf16.gmra.mxu3 %v1915_v61 }
 0x1ce   : > { %v1918_v63 = vor.u32 %v1917_v19, %v1916_v41 }
 0x1cf   : > { %v2051_v59 = vpop.f32.mrf.mxu2 }
 0x1d0   : > { %v2140_v39 = vpop.f32.mrf.mxu3  ;;  %v8836_v13 = vadd.f32 %v2051_v59, %v1786_v47  ;;  %v1620_v38 = vpop.f32.mrf.mxu0 }
 0x1d1   : > { %v8838_v1 = vadd.f32 %v2140_v39, %v1787_v33  ;;  %v1709_v8 = vpop.f32.mrf.mxu1  ;;  %v1788_v56 = vadd.f32 %v1620_v38, %v8304_v40  ;;  %v1499_v33 = vsel %vm1476_vm1, %v1496_v43, %v1498_v52  ;;  %v1919_v38 = vsel %vm1867_vm2, %v1914_v32, %v1918_v63 }
 0x1d2   : > { %v1789_v17 = vadd.f32 %v1709_v8, %v8306_v44  ;;  %v11202_v32 = vshll.u32 %v8313_v57, 16 }
 0x1d7   : > { %v2053_v29 = vpop.f32.mrf.mxu2 }
 0x1d8   : > { %v2142_v47 = vpop.f32.mrf.mxu3  ;;  %v8851_v61 = vadd.f32 %v2053_v29, %v1788_v56  ;;  %v1623_v44 = vpop.f32.mrf.mxu0  ;;  %v1921_v29 = vrot.slane %v11202_v32, 2 }
 0x1d9   : > { %v8853_v40 = vadd.f32 %v2142_v47, %v1789_v17  ;;  %v1712_v59 = vpop.f32.mrf.mxu1  ;;  %v1790_v39 = vadd.f32 %v1623_v44, %v8316_v5  ;;  %v8869_v47 = vld [vmem:[%s8144_s30 + $0x60] sm:$0xff] }
 0x1da   : > { %v1791_v10 = vadd.f32 %v1712_v59, %v8318_v6  ;;  %v11201_v6 = vshrl.u32 %v8313_v57, 16 }
 0x1db   : > { %1662 = vmatmul.bf16.gmra.mxu0 %v1499_v33 }
 0x1dc   : > { %1751 = vmatmul.bf16.gmra.mxu1 %v1499_v33  ;;  %2095 = vmatmul.bf16.gmra.mxu2 %v1919_v38  ;;  %v1920_v19 = vrot.slane %v11201_v6, 1  ;;  %v1500_v33 = vrot.slane %v8869_v47, 1 }
 0x1dd   : > { %2184 = vmatmul.bf16.gmra.mxu3 %v1919_v38 }
 0x1de   : > { %v1922_v44 = vor.u32 %v1921_v29, %v1920_v19 }
 0x1df   : > { %v2056_v8 = vpop.f32.mrf.mxu2 }
 0x1e0   : > { %v2145_v18 = vpop.f32.mrf.mxu3  ;;  %v8858_v43 = vadd.f32 %v2056_v8, %v1790_v39  ;;  %v1625_v17 = vpop.f32.mrf.mxu0 }
 0x1e1   : > { %v8860_v56 = vadd.f32 %v2145_v18, %v1791_v10  ;;  %v1714_v41 = vpop.f32.mrf.mxu1  ;;  %v1792_v36 = vadd.f32 %v1625_v17, %v8328_v50  ;;  %v1501_v10 = vsel %vm1476_vm1, %v1498_v52, %v1500_v33  ;;  %v1923_v17 = vsel %vm1867_vm2, %v1918_v63, %v1922_v44 }
 0x1e2   : > { %v1793_v5 = vadd.f32 %v1714_v41, %v8330_v51  ;;  %v11204_v63 = vshll.u32 %v8337_v0, 16 }
 0x1e7   : > { %v2058_v59 = vpop.f32.mrf.mxu2 }
 0x1e8   : > { %v2147_v39 = vpop.f32.mrf.mxu3  ;;  %v8873_v38 = vadd.f32 %v2058_v59, %v1792_v36  ;;  %v1628_v51 = vpop.f32.mrf.mxu0  ;;  %v1925_v59 = vrot.slane %v11204_v63, 2 }
 0x1e9   : > { %v8875_v50 = vadd.f32 %v2147_v39, %v1793_v5  ;;  %v1717_v8 = vpop.f32.mrf.mxu1  ;;  %v1794_v18 = vadd.f32 %v1628_v51, %v8340_v23  ;;  %v8891_v39 = vld [vmem:[%s8144_s30 + $0x68] sm:$0xff] }
 0x1ea   : > { %v1795_v57 = vadd.f32 %v1717_v8, %v8342_v34  ;;  %v11203_v34 = vshrl.u32 %v8337_v0, 16  ;;  %11205 = vst [vmem:[#allocation43_spill] sm:$0xff] %v8891_v39 }
 0x1eb   : > { %1667 = vmatmul.bf16.gmra.mxu0 %v1501_v10 }
 0x1ec   : > { %1756 = vmatmul.bf16.gmra.mxu1 %v1501_v10  ;;  %2100 = vmatmul.bf16.gmra.mxu2 %v1923_v17  ;;  %v1924_v29 = vrot.slane %v11203_v34, 1  ;;  %v1502_v10 = vrot.slane %v8891_v39, 1  ;;  %v7517_v34 = vld [vmem:[%s11088_s1 + $0x264] sm:$0xf0] }
 0x1ed   : > { %2189 = vmatmul.bf16.gmra.mxu3 %v1923_v17 }
 0x1ee   : > { %v8894_v51 = vor.u32 %v1925_v59, %v1924_v29  ;;  %v7516_v29 = vld [vmem:[%s11088_s1 + $0x264] sm:$0xf] }
 0x1ef   : > { %v2061_v41 = vpop.f32.mrf.mxu2 }
 0x1f0   : > { %v2150_v6 = vpop.f32.mrf.mxu3  ;;  %v8880_v52 = vadd.f32 %v2061_v41, %v1794_v18  ;;  %v1630_v5 = vpop.f32.mrf.mxu0 }
 0x1f1   : > { %v8882_v36 = vadd.f32 %v2150_v6, %v1795_v57  ;;  %v1719_v19 = vpop.f32.mrf.mxu1  ;;  %v1796_v32 = vadd.f32 %v1630_v5, %v8354_v12  ;;  %v1503_v57 = vsel %vm1476_vm1, %v1500_v33, %v1502_v10  ;;  %v1927_v5 = vsel %vm1867_vm2, %v1922_v44, %v8894_v51  ;;  %v7519_v33 = vld [vmem:[%s11088_s1 + $0x274] sm:$0xf0] }
 0x1f2   : > { %v1797_v23 = vadd.f32 %v1719_v19, %v8356_v25  ;;  %v6479_v19 = vld [vmem:[%s11088_s1 + $0x270] sm:$0xf] }
 0x1f7   : > { %v2063_v8 = vpop.f32.mrf.mxu2 }
 0x1f8   : > { %v2152_v18 = vpop.f32.mrf.mxu3  ;;  %v8897_v17 = vadd.f32 %v2063_v8, %v1796_v32  ;;  %v1633_v25 = vpop.f32.mrf.mxu0  ;;  %v7518_v32 = vld [vmem:[%s11088_s1 + $0x274] sm:$0xf]  ;;  %v11206_v8 = vshrl.u32 %v8361_v24, 16 }
 0x1f9   : > { %v8899_v12 = vadd.f32 %v2152_v18, %v1797_v23  ;;  %v1722_v41 = vpop.f32.mrf.mxu1  ;;  %v1798_v6 = vadd.f32 %v1633_v25, %v8411_v28  ;;  %v6480_v28 = vor.u32 %v7519_v33, %v6479_v19  ;;  %v6471_v23 = vld [vmem:[%s11088_s1 + $0x260] sm:$0xf]  ;;  %v6473_v25 = vld [vmem:[%s11088_s1 + $0x268] sm:$0xf0] }
 0x1fa   : > { %v1799_v0 = vadd.f32 %v1722_v41, %v8413_v26  ;;  %v6481_v26 = vld [vmem:[%s11088_s1 + $0x278] sm:$0xf0]  ;;  %v1928_v18 = vrot.slane %v11206_v8, 1 }
 0x1fb   : > { %1672 = vmatmul.bf16.gmra.mxu0 %v1503_v57  ;;  %v6484_v44 = vor.u32 %v7518_v32, %v6481_v26  ;;  %v11207_v32 = vshll.u32 %v8361_v24, 16  ;;  %v1846_v26 = vld [vmem:[%s8144_s30 + $0x7c] sm:$0xf]  ;;  %v7514_v24 = vld [vmem:[%s11088_s1 + $0x254] sm:$0xf] }
 0x1fc   : > { %1761 = vmatmul.bf16.gmra.mxu1 %v1503_v57  ;;  %2105 = vmatmul.bf16.gmra.mxu2 %v1927_v5  ;;  %v6472_v57 = vor.u32 %v7517_v34, %v6471_v23 }
 0x1fd   : > { %2194 = vmatmul.bf16.gmra.mxu3 %v1927_v5  ;;  %2428 = vmatpush.bf16.msra.mxu0 %v6480_v28  ;;  %v1929_v28 = vrot.slane %v11207_v32, 2 }
 0x1fe   : > { %2517 = vmatpush.bf16.msra.mxu1 %v6484_v44  ;;  %v6476_v44 = vor.u32 %v7516_v29, %v6473_v25  ;;  %v7513_v25 = vld [vmem:[%s11088_s1 + $0x244] sm:$0xf0] }
 0x1ff   : > { %v2066_v63 = vpop.f32.mrf.mxu2  ;;  %v8960_v8 = vor.u32 %v1929_v28, %v1928_v18 }
 0x200   : > { %v2155_v59 = vpop.f32.mrf.mxu3  ;;  %v8931_v41 = vadd.f32 %v2066_v63, %v1798_v6  ;;  %v1635_v19 = vpop.f32.mrf.mxu0  ;;  %v6463_v6 = vld [vmem:[%s11088_s1 + $0x250] sm:$0xf] }
 0x201   : > { %v8933_v5 = vadd.f32 %v2155_v59, %v1799_v0  ;;  %v1724_v33 = vpop.f32.mrf.mxu1  ;;  %v8939_v39 = vadd.f32 %v1635_v19, %v8476_v21  ;;  %2429 = vmatpush.bf16.msra.mxu0 %v6472_v57  ;;  %v7515_v0 = vld [vmem:[%s11088_s1 + $0x254] sm:$0xf0]  ;;  %v6465_v21 = vld [vmem:[%s11088_s1 + $0x258] sm:$0xf0]  ;;  %v1865_v59 = vunpack.c.l.b16 %v1846_v26  ;;  %v6455_v57 = vld [vmem:[%s11088_s1 + $0x240] sm:$0xf] }
 0x202   : > { %v8942_v23 = vadd.f32 %v1724_v33, %v8478_v3  ;;  %2518 = vmatpush.bf16.msra.mxu1 %v6476_v44  ;;  %v6464_v34 = vor.u32 %v7515_v0, %v6463_v6  ;;  %v8957_v3 = vld [vmem:[%s8144_s30 + $0x70] sm:$0xff]  ;;  %v6468_v63 = vor.u32 %v7514_v24, %v6465_v21  ;;  %v7512_v19 = vld [vmem:[%s11088_s1 + $0x244] sm:$0xf]  ;;  %v6456_v28 = vor.u32 %v7513_v25, %v6455_v57  ;;  %v6457_v26 = vld [vmem:[%s11088_s1 + $0x248] sm:$0xf0] }
 0x203   : > { %v1504_v29 = vrot.slane %v8957_v3, 1  ;;  %v8982_v0 = vpack.c.b16 %v1865_v59, %v8455_v46  ;;  %v6460_v24 = vor.u32 %v7512_v19, %v6457_v26  ;;  %v7511_v46 = vld [vmem:[%s11088_s1 + $0x234] sm:$0xf0]  ;;  %v6439_v19 = vld [vmem:[%s11088_s1 + $0x220] sm:$0xf] }
 0x205   : > { %2430 = vmatpush.bf16.msra.mxu0 %v6464_v34  ;;  %v1505_v18 = vsel %vm1476_vm1, %v1502_v10, %v1504_v29  ;;  %11208 = vst [vmem:[#allocation44_spill] sm:$0xff] %v8982_v0  ;;  %v1931_v10 = vsel %vm1867_vm2, %v8894_v51, %v8960_v8  ;;  %v6449_v51 = vld [vmem:[%s11088_s1 + $0x238] sm:$0xf0]  ;;  %v1933_v59 = vshrl.u32 %v8982_v0, 16  ;;  %v1936_v57 = vshll.u32 %v8982_v0, 16 }
 0x206   : > { %2519 = vmatpush.bf16.msra.mxu1 %v6468_v63  ;;  %v6447_v63 = vld [vmem:[%s11088_s1 + $0x230] sm:$0xf] }
 0x207   : > { %v8971_v33 = vpop.f32.mrf.mxu2 }
 0x208   : > { %v8973_v32 = vpop.f32.mrf.mxu3  ;;  %v1638_v44 = vpop.f32.mrf.mxu0 }
 0x209   : > { %v1727_v6 = vpop.f32.mrf.mxu1  ;;  %v8985_v34 = vadd.f32 %v1638_v44, %v8539_v4  ;;  %2431 = vmatpush.bf16.msra.mxu0 %v6456_v28  ;;  %v7510_v4 = vld [vmem:[%s11088_s1 + $0x234] sm:$0xf]  ;;  %v7508_v28 = vld [vmem:[%s11088_s1 + $0x224] sm:$0xf] }
 0x20a   : > { %v8988_v21 = vadd.f32 %v1727_v6, %v8541_v16  ;;  %2520 = vmatpush.bf16.msra.mxu1 %v6460_v24  ;;  %v6448_v16 = vor.u32 %v7511_v46, %v6447_v63  ;;  %v6452_v25 = vor.u32 %v7510_v4, %v6449_v51  ;;  %v6441_v24 = vld [vmem:[%s11088_s1 + $0x228] sm:$0xf0]  ;;  %v1935_v46 = vrot.slane %v1933_v59, 1  ;;  %v7506_v59 = vld [vmem:[%s11088_s1 + $0x214] sm:$0xf] }
 0x20b   : > { %1677 = vmatmul.bf16.gmra.mxu0 %v1505_v18  ;;  %v1938_v4 = vrot.slane %v1936_v57, 2 }
 0x20c   : > { %1766 = vmatmul.bf16.gmra.mxu1 %v1505_v18  ;;  %2110 = vmatmul.bf16.gmra.mxu2 %v1931_v10  ;;  %v7509_v18 = vld [vmem:[%s11088_s1 + $0x224] sm:$0xf0] }
 0x20d   : > { %2199 = vmatmul.bf16.gmra.mxu3 %v1931_v10  ;;  %2432 = vmatpush.bf16.msra.mxu0 %v6448_v16  ;;  %v6440_v6 = vor.u32 %v7509_v18, %v6439_v19  ;;  %v6444_v16 = vor.u32 %v7508_v28, %v6441_v24  ;;  %v6431_v19 = vld [vmem:[%s11088_s1 + $0x210] sm:$0xf]  ;;  %v7507_v18 = vld [vmem:[%s11088_s1 + $0x214] sm:$0xf0]  ;;  %v6423_v24 = vld [vmem:[%s11088_s1 + $0x200] sm:$0xf] }
 0x20e   : > { %2521 = vmatpush.bf16.msra.mxu1 %v6452_v25  ;;  %v6432_v57 = vor.u32 %v7507_v18, %v6431_v19 }
 0x20f   : > { %v9016_v26 = vpop.f32.mrf.mxu2 }
 0x210   : > { %v9018_v44 = vpop.f32.mrf.mxu3  ;;  %v1640_v10 = vpop.f32.mrf.mxu0 }
 0x211   : > { %v1729_v63 = vpop.f32.mrf.mxu1  ;;  %v9024_v51 = vadd.f32 %v1640_v10, %v8600_v11  ;;  %2433 = vmatpush.bf16.msra.mxu0 %v6440_v6  ;;  %v6433_v11 = vld [vmem:[%s11088_s1 + $0x218] sm:$0xf0]  ;;  %v1939_v6 = vor.u32 %v1938_v4, %v1935_v46  ;;  %v7505_v10 = vld [vmem:[%s11088_s1 + $0x204] sm:$0xf0]  ;;  %v6425_v4 = vld [vmem:[%s11088_s1 + $0x208] sm:$0xf0] }
 0x212   : > { %v9027_v25 = vadd.f32 %v1729_v63, %v8602_v22  ;;  %2522 = vmatpush.bf16.msra.mxu1 %v6444_v16  ;;  %v1506_v22 = vrot.slane %v8489_v30, 1  ;;  %v6436_v28 = vor.u32 %v7506_v59, %v6433_v11  ;;  %v7504_v63 = vld [vmem:[%s11088_s1 + $0x204] sm:$0xf]  ;;  %v6424_v46 = vor.u32 %v7505_v10, %v6423_v24 }
 0x214   : > { %v1507_v30 = vsel %vm1476_vm1, %v1504_v29, %v1506_v22 }
 0x215   : > { %2434 = vmatpush.bf16.msra.mxu0 %v6432_v57  ;;  %v6428_v57 = vor.u32 %v7504_v63, %v6425_v4  ;;  %v11212_v63 = vld [vmem:[#allocation15_spill] sm:$0xff] }
 0x216   : > { %2523 = vmatpush.bf16.msra.mxu1 %v6436_v28  ;;  %v11210_v28 = vld [vmem:[#allocation14_spill] sm:$0xff] }
 0x217   : > { %v9051_v16 = vpop.f32.mrf.mxu2 }
 0x218   : > { %v9053_v19 = vpop.f32.mrf.mxu3  ;;  %v1643_v18 = vpop.f32.mrf.mxu0 }
 0x219   : > { %11209 = vst [vmem:[#allocation45_spill] sm:$0xff] %v9053_v19  ;;  %v1732_v59 = vpop.f32.mrf.mxu1  ;;  %v9062_v11 = vadd.f32 %v1643_v18, %v8618_v14  ;;  %v1940_v19 = vsel %vm1867_vm2, %v8960_v8, %v1939_v6  ;;  %2435 = vmatpush.bf16.msra.mxu0 %v6424_v46  ;;  %v11214_v18 = vld [vmem:[#allocation16_spill] sm:$0xff] }
 0x21a   : > { %v9065_v0 = vadd.f32 %v1732_v59, %v11210_v28  ;;  %2524 = vmatpush.bf16.msra.mxu1 %v6428_v57  ;;  %v2279_v28 = vld [vmem:[%s8144_s30] sm:$0xc] }
 0x21b   : > { %1682 = vmatmul.bf16.gmra.mxu0 %v1507_v30 }
 0x21c   : > { %1771 = vmatmul.bf16.gmra.mxu1 %v1507_v30  ;;  %2115 = vmatmul.bf16.gmra.mxu2 %v1940_v19 }
 0x21d   : > { %2204 = vmatmul.bf16.gmra.mxu3 %v1940_v19 }
 0x21f   : > { %v9069_v29 = vpop.f32.mrf.mxu2 }
 0x220   : > { %v9071_v24 = vpop.f32.mrf.mxu3  ;;  %v1645_v10 = vpop.f32.mrf.mxu0 }
 0x221   : > { %11211 = vst [vmem:[#allocation14_spill] sm:$0xff] %v9071_v24  ;;  %v1734_v14 = vpop.f32.mrf.mxu1  ;;  %v9074_v4 = vadd.f32 %v1645_v10, %v11212_v63  ;;  %v2298_v10 = vunpack.c.l.b16 %v2279_v28 }
 0x222   : > { %v9077_v59 = vadd.f32 %v1734_v14, %v11214_v18  ;;  %v11222_v18 = vld [vmem:[#allocation13_spill] sm:$0xff] }
 0x223   : > { %11213 = vst [vmem:[#allocation15_spill] sm:$0xff] %v9074_v4 }
 0x224   : > { %11215 = vst [vmem:[#allocation16_spill] sm:$0xff] %v9077_v59 }
 0x227   : > { %v9079_v8 = vpop.f32.mrf.mxu2 }
 0x228   : > { %11216 = vst [vmem:[#allocation46_spill] sm:$0xff] %v9079_v8  ;;  %v9081_v46 = vpop.f32.mrf.mxu3  ;;  %v1648_v57 = vpop.f32.mrf.mxu0 }
 0x229   : > { %11217 = vst [vmem:[#allocation47_spill] sm:$0xff] %v9081_v46  ;;  %v1737_v30 = vpop.f32.mrf.mxu1  ;;  %v9085_v19 = vadd.f32 %v1648_v57, %v8636_v55  ;;  %v11223_v46 = vunpack.c.h.b16 %v11222_v18  ;;  %v11225_v57 = vld [vmem:[#allocation17_spill] sm:$0xff] }
 0x22a   : > { %v9088_v24 = vadd.f32 %v1737_v30, %v8638_v15 }
 0x22b   : > { %11218 = vst [vmem:[#allocation48_spill] sm:$0xff] %v9085_v19  ;;  %1687 = vmatmul.bf16.gmra.mxu0 %v1506_v22  ;;  %v2299_v59 = vpack.c.b16 %v11223_v46, %v2298_v10  ;;  %v7751_v19 = vld [vmem:[%s8144_s30 + $0x10] sm:$0xff] }
 0x22c   : > { %11219 = vst [vmem:[#allocation49_spill] sm:$0xff] %v9088_v24  ;;  %1776 = vmatmul.bf16.gmra.mxu1 %v1506_v22  ;;  %2120 = vmatmul.bf16.gmra.mxu2 %v1939_v6  ;;  %v7750_v22 = vld [vmem:[%s8144_s30 + $0x8] sm:$0xff] }
 0x22d   : > { %2209 = vmatmul.bf16.gmra.mxu3 %v1939_v6  ;;  %v2301_v30 = vrot.slane %v2299_v59, 2  ;;  %v2302_v28 = vrot.slane %v7750_v22, 2 }
 0x22f   : > { %v9090_v14 = vpop.f32.mrf.mxu2  ;;  %v2303_v18 = vsel %vm2300_vm3, %v2301_v30, %v2302_v28  ;;  %v11233_v30 = vld [vmem:[#allocation20_spill] sm:$0xff] }
 0x230   : > { %11220 = vst [vmem:[#allocation50_spill] sm:$0xff] %v9090_v14  ;;  %v9092_v63 = vpop.f32.mrf.mxu3  ;;  %v1650_v8 = vpop.f32.mrf.mxu0 }
 0x231   : > { %11221 = vst [vmem:[#allocation51_spill] sm:$0xff] %v9092_v63  ;;  %v1739_v4 = vpop.f32.mrf.mxu1  ;;  %v9097_v55 = vadd.f32 %v1650_v8, %v8644_v37  ;;  %v11229_v37 = vld [vmem:[#allocation18_spill] sm:$0xff] }
 0x232   : > { %v9100_v15 = vadd.f32 %v1739_v4, %v11225_v57 }
 0x233   : > { %11224 = vst [vmem:[#allocation13_spill] sm:$0xff] %v9097_v55 }
 0x234   : > { %11226 = vst [vmem:[#allocation17_spill] sm:$0xff] %v9100_v15 }
 0x237   : > { %v9103_v6 = vpop.f32.mrf.mxu2 }
 0x238   : > { %11227 = vst [vmem:[#allocation52_spill] sm:$0xff] %v9103_v6  ;;  %v9105_v24 = vpop.f32.mrf.mxu3  ;;  %v1653_v46 = vpop.f32.mrf.mxu0 }
 0x239   : > { %11228 = vst [vmem:[#allocation53_spill] sm:$0xff] %v9105_v24  ;;  %v1742_v10 = vpop.f32.mrf.mxu1  ;;  %v1814_v63 = vadd.f32 %v1653_v46, %v8652_v48  ;;  %v11231_v24 = vld [vmem:[#allocation19_spill] sm:$0xff]  ;;  %v2304_v48 = vrot.slane %v7751_v19, 2 }
 0x23a   : > { %v1815_v8 = vadd.f32 %v1742_v10, %v11229_v37 }
 0x23b   : > { %2436 = vmatmul.bf16.vlgmr.msra.gmra.mxu0 %v2303_v18 }
 0x23c   : > { %2525 = vmatmul.bf16.vlgmr.msra.gmra.mxu1 %v2303_v18 }
 0x23f   : > { %v2086_v4 = vpop.f32.mrf.mxu2 }
 0x240   : > { %v2175_v59 = vpop.f32.mrf.mxu3  ;;  %v9110_v57 = vadd.f32 %v2086_v4, %v1814_v63  ;;  %v1655_v15 = vpop.f32.mrf.mxu0  ;;  %v2305_v63 = vsel %vm2300_vm3, %v2302_v28, %v2304_v48  ;;  %v11241_v28 = vld [vmem:[#allocation23_spill] sm:$0xff] }
 0x241   : > { %v9112_v22 = vadd.f32 %v2175_v59, %v1815_v8  ;;  %v1744_v6 = vpop.f32.mrf.mxu1  ;;  %v9115_v55 = vadd.f32 %v1655_v15, %v11231_v24  ;;  %v11237_v8 = vld [vmem:[#allocation21_spill] sm:$0xff]  ;;  %v11238_v59 = vld [vmem:[#allocation22_spill] sm:$0xff] }
 0x242   : > { %v9118_v14 = vadd.f32 %v1744_v6, %v11233_v30 }
 0x243   : > { %11230 = vst [vmem:[#allocation18_spill] sm:$0xff] %v9112_v22 }
 0x244   : > { %11232 = vst [vmem:[#allocation19_spill] sm:$0xff] %v9115_v55  ;;  %v7752_v55 = vld [vmem:[%s8144_s30 + $0x18] sm:$0xff] }
 0x245   : > { %11234 = vst [vmem:[#allocation20_spill] sm:$0xff] %v9118_v14 }
 0x247   : > { %v9121_v46 = vpop.f32.mrf.mxu2 }
 0x248   : > { %11235 = vst [vmem:[#allocation54_spill] sm:$0xff] %v9121_v46  ;;  %v9123_v10 = vpop.f32.mrf.mxu3  ;;  %v1658_v18 = vpop.f32.mrf.mxu0 }
 0x249   : > { %11236 = vst [vmem:[#allocation55_spill] sm:$0xff] %v9123_v10  ;;  %v1747_v37 = vpop.f32.mrf.mxu1  ;;  %v1818_v4 = vadd.f32 %v1658_v18, %v11237_v8  ;;  %v2306_v18 = vrot.slane %v7752_v55, 2 }
 0x24a   : > { %v1819_v22 = vadd.f32 %v1747_v37, %v11238_v59  ;;  %v11245_v59 = vld [vmem:[#allocation24_spill] sm:$0xff] }
 0x24b   : > { %2441 = vmatmul.bf16.gmra.mxu0 %v2305_v63 }
 0x24c   : > { %2530 = vmatmul.bf16.gmra.mxu1 %v2305_v63  ;;  %v2307_v63 = vsel %vm2300_vm3, %v2304_v48, %v2306_v18  ;;  %v11249_v48 = vld [vmem:[#allocation26_spill] sm:$0xff] }
 0x24f   : > { %v2091_v24 = vpop.f32.mrf.mxu2 }
 0x250   : > { %v2180_v15 = vpop.f32.mrf.mxu3  ;;  %v9128_v6 = vadd.f32 %v2091_v24, %v1818_v4  ;;  %v1660_v30 = vpop.f32.mrf.mxu0 }
 0x251   : > { %v9130_v19 = vadd.f32 %v2180_v15, %v1819_v22  ;;  %v1749_v14 = vpop.f32.mrf.mxu1  ;;  %v9133_v10 = vadd.f32 %v1660_v30, %v8684_v60  ;;  %v11246_v15 = vld [vmem:[#allocation25_spill] sm:$0xff] }
 0x252   : > { %v9136_v46 = vadd.f32 %v1749_v14, %v11241_v28 }
 0x253   : > { %11239 = vst [vmem:[#allocation21_spill] sm:$0xff] %v9130_v19 }
 0x254   : > { %11240 = vst [vmem:[#allocation22_spill] sm:$0xff] %v9133_v10  ;;  %v7753_v10 = vld [vmem:[%s8144_s30 + $0x20] sm:$0xff] }
 0x255   : > { %11242 = vst [vmem:[#allocation23_spill] sm:$0xff] %v9136_v46 }
 0x257   : > { %v9139_v8 = vpop.f32.mrf.mxu2 }
 0x258   : > { %11243 = vst [vmem:[#allocation56_spill] sm:$0xff] %v9139_v8  ;;  %v9141_v37 = vpop.f32.mrf.mxu3  ;;  %v1663_v4 = vpop.f32.mrf.mxu0 }
 0x259   : > { %11244 = vst [vmem:[#allocation57_spill] sm:$0xff] %v9141_v37  ;;  %v1752_v22 = vpop.f32.mrf.mxu1  ;;  %v1822_v24 = vadd.f32 %v1663_v4, %v11245_v59  ;;  %v2308_v4 = vrot.slane %v7753_v10, 2 }
 0x25a   : > { %v1823_v19 = vadd.f32 %v1752_v22, %v11246_v15  ;;  %v11253_v15 = vld [vmem:[#allocation27_spill] sm:$0xff] }
 0x25b   : > { %2446 = vmatmul.bf16.gmra.mxu0 %v2307_v63 }
 0x25c   : > { %2535 = vmatmul.bf16.gmra.mxu1 %v2307_v63  ;;  %v2309_v63 = vsel %vm2300_vm3, %v2306_v18, %v2308_v4  ;;  %v11257_v18 = vld [vmem:[#allocation29_spill] sm:$0xff] }
 0x25f   : > { %v2096_v60 = vpop.f32.mrf.mxu2 }
 0x260   : > { %v2185_v14 = vpop.f32.mrf.mxu3  ;;  %v9146_v30 = vadd.f32 %v2096_v60, %v1822_v24  ;;  %v1665_v28 = vpop.f32.mrf.mxu0 }
 0x261   : > { %v9148_v55 = vadd.f32 %v2185_v14, %v1823_v19  ;;  %v1754_v46 = vpop.f32.mrf.mxu1  ;;  %v9151_v37 = vadd.f32 %v1665_v28, %v8703_v54  ;;  %v11254_v14 = vld [vmem:[#allocation28_spill] sm:$0xff] }
 0x262   : > { %v9154_v8 = vadd.f32 %v1754_v46, %v11249_v48 }
 0x263   : > { %11247 = vst [vmem:[#allocation24_spill] sm:$0xff] %v9148_v55 }
 0x264   : > { %11248 = vst [vmem:[#allocation25_spill] sm:$0xff] %v9151_v37  ;;  %v7754_v37 = vld [vmem:[%s8144_s30 + $0x28] sm:$0xff] }
 0x265   : > { %11250 = vst [vmem:[#allocation26_spill] sm:$0xff] %v9154_v8 }
 0x267   : > { %v9157_v59 = vpop.f32.mrf.mxu2 }
 0x268   : > { %11251 = vst [vmem:[#allocation58_spill] sm:$0xff] %v9157_v59  ;;  %v9159_v22 = vpop.f32.mrf.mxu3  ;;  %v1668_v24 = vpop.f32.mrf.mxu0 }
 0x269   : > { %11252 = vst [vmem:[#allocation59_spill] sm:$0xff] %v9159_v22  ;;  %v1757_v19 = vpop.f32.mrf.mxu1  ;;  %v1826_v60 = vadd.f32 %v1668_v24, %v11253_v15  ;;  %v2310_v24 = vrot.slane %v7754_v37, 2 }
 0x26a   : > { %v1827_v55 = vadd.f32 %v1757_v19, %v11254_v14 }
 0x26b   : > { %2451 = vmatmul.bf16.gmra.mxu0 %v2309_v63 }
 0x26c   : > { %2540 = vmatmul.bf16.gmra.mxu1 %v2309_v63  ;;  %v2311_v63 = vsel %vm2300_vm3, %v2308_v4, %v2310_v24  ;;  %v11262_v4 = vld [vmem:[#allocation31_spill] sm:$0xff] }
 0x26f   : > { %v2101_v54 = vpop.f32.mrf.mxu2 }
 0x270   : > { %v2190_v46 = vpop.f32.mrf.mxu3  ;;  %v9164_v28 = vadd.f32 %v2101_v54, %v1826_v60  ;;  %v1670_v48 = vpop.f32.mrf.mxu0  ;;  %v11261_v54 = vld [vmem:[#allocation30_spill] sm:$0xff] }
 0x271   : > { %v9166_v10 = vadd.f32 %v2190_v46, %v1827_v55  ;;  %v1759_v8 = vpop.f32.mrf.mxu1  ;;  %v9169_v22 = vadd.f32 %v1670_v48, %v8722_v31 }
 0x272   : > { %v9172_v59 = vadd.f32 %v1759_v8, %v11257_v18 }
 0x273   : > { %11255 = vst [vmem:[#allocation27_spill] sm:$0xff] %v9166_v10 }
 0x274   : > { %11256 = vst [vmem:[#allocation28_spill] sm:$0xff] %v9169_v22  ;;  %v7755_v22 = vld [vmem:[%s8144_s30 + $0x30] sm:$0xff]  ;;  %s6042_s30 = sshll.u32 %s486_s20, 3 }
 0x275   : > { %11258 = vst [vmem:[#allocation29_spill] sm:$0xff] %v9172_v59  ;;  %s488_s17 = scalar_lea.vmem [#allocation4], %s6042_s30  ;;  %s7776_s30 = scalar_lea.hbm %s11102_s15, 16 }
 0x276   : > { %s5976_s16 = sshll.u32 %s488_s17, 4  ;;  %p7778_p1 = scmp.lt.s32.totalorder %s7776_s30, %s7772_s0  ;;  %s5977_s16 = int_to_ptr.vmem [resolvable:$true] %s5976_s16 }
 0x277   : > { %v9175_v15 = vpop.f32.mrf.mxu2 }
 0x278   : > { %11259 = vst [vmem:[#allocation60_spill] sm:$0xff] %v9175_v15  ;;  %v9177_v19 = vpop.f32.mrf.mxu3  ;;  %v1673_v60 = vpop.f32.mrf.mxu0  ;;  %p7779_p2 = por %p7778_p1, %p7777_p0 }
 0x279   : > { %11260 = vst [vmem:[#allocation61_spill] sm:$0xff] %v9177_v19  ;;  %v1762_v55 = vpop.f32.mrf.mxu1  ;;  %v1830_v14 = vadd.f32 %v1673_v60, %v8729_v35  ;;  %v2312_v35 = vrot.slane %v7755_v22, 2  ;;  %v11271_v22 = vld [vmem:[#allocation34_spill] sm:$0xff] }
 0x27a   : > { %v1831_v46 = vadd.f32 %v1762_v55, %v11261_v54  ;;  %v11264_v54 = vld [vmem:[#allocation32_spill] sm:$0xff]  ;;  %p7780_p3 = pnand %p7779_p2, %p7775_p13 }
 0x27b   : > { %2456 = vmatmul.bf16.gmra.mxu0 %v2311_v63  ;;  %v2313_v60 = vsel %vm2300_vm3, %v2310_v24, %v2312_v35  ;;  %v2314_v24 = vrot.slane %v11271_v22, 2  ;;  %v11277_v22 = vld [vmem:[#allocation38_spill] sm:$0xff] }
 0x27c   : > { %2545 = vmatmul.bf16.gmra.mxu1 %v2311_v63 }
 0x27f   : > { %v2106_v31 = vpop.f32.mrf.mxu2 }
 0x280   : > { %v2195_v8 = vpop.f32.mrf.mxu3  ;;  %v9182_v48 = vadd.f32 %v2106_v31, %v1830_v14  ;;  %v1675_v18 = vpop.f32.mrf.mxu0  ;;  %v11266_v14 = vld [vmem:[#allocation33_spill] sm:$0xff] }
 0x281   : > { %v9184_v37 = vadd.f32 %v2195_v8, %v1831_v46  ;;  %v1764_v59 = vpop.f32.mrf.mxu1  ;;  %v9187_v19 = vadd.f32 %v1675_v18, %v8741_v20 }
 0x282   : > { %v9190_v15 = vadd.f32 %v1764_v59, %v11262_v4  ;;  %v11269_v59 = vld [vmem:[#allocation35_spill] sm:$0xff]  ;;  %v2315_v4 = vsel %vm2300_vm3, %v2312_v35, %v2314_v24  ;;  %v2316_v35 = vrot.slane %v11277_v22, 2 }
 0x284   : > { %11263 = vst [vmem:[#allocation30_spill] sm:$0xff] %v9190_v15 }
 0x288   : > { %v1678_v55 = vpop.f32.mrf.mxu0 }
 0x289   : > { %v1767_v63 = vpop.f32.mrf.mxu1  ;;  %v9195_v10 = vadd.f32 %v1678_v55, %v11264_v54  ;;  %v11272_v54 = vld [vmem:[#allocation36_spill] sm:$0xff] }
 0x28a   : > { %v9198_v46 = vadd.f32 %v1767_v63, %v11266_v14  ;;  %v11274_v63 = vld [vmem:[#allocation37_spill] sm:$0xff] }
 0x28b   : > { %11265 = vst [vmem:[#allocation31_spill] sm:$0xff] %v9195_v10  ;;  %2461 = vmatmul.bf16.gmra.mxu0 %v2313_v60 }
 0x28c   : > { %11267 = vst [vmem:[#allocation32_spill] sm:$0xff] %v9198_v46  ;;  %2550 = vmatmul.bf16.gmra.mxu1 %v2313_v60 }
 0x290   : > { %v1680_v31 = vpop.f32.mrf.mxu0 }
 0x291   : > { %v1769_v20 = vpop.f32.mrf.mxu1  ;;  %v9201_v8 = vadd.f32 %v1680_v31, %v8763_v42  ;;  %v11275_v31 = vld [vmem:[#allocation39_spill] sm:$0xff] }
 0x292   : > { %v9204_v18 = vadd.f32 %v1769_v20, %v11269_v59  ;;  %v11276_v20 = vld [vmem:[#allocation40_spill] sm:$0xff] }
 0x293   : > { %11268 = vst [vmem:[#allocation33_spill] sm:$0xff] %v9201_v8 }
 0x294   : > { %11270 = vst [vmem:[#allocation35_spill] sm:$0xff] %v9204_v18  ;;  %v2317_v18 = vsel %vm2300_vm3, %v2314_v24, %v2316_v35  ;;  %v2318_v24 = vrot.slane %v8801_v53, 2 }
 0x298   : > { %v1683_v15 = vpop.f32.mrf.mxu0 }
 0x299   : > { %v1772_v55 = vpop.f32.mrf.mxu1  ;;  %v9209_v10 = vadd.f32 %v1683_v15, %v11272_v54  ;;  %v11278_v54 = vld [vmem:[#allocation41_spill] sm:$0xff] }
 0x29a   : > { %v9212_v14 = vadd.f32 %v1772_v55, %v11274_v63  ;;  %v11279_v55 = vld [vmem:[#allocation42_spill] sm:$0xff] }
 0x29b   : > { %11273 = vst [vmem:[#allocation34_spill] sm:$0xff] %v9209_v10  ;;  %2466 = vmatmul.bf16.gmra.mxu0 %v2315_v4 }
 0x29c   : > { %2555 = vmatmul.bf16.gmra.mxu1 %v2315_v4 }
 0x2a0   : > { %v1685_v60 = vpop.f32.mrf.mxu0 }
 0x2a1   : > { %v1774_v42 = vpop.f32.mrf.mxu1  ;;  %v9215_v8 = vadd.f32 %v1685_v60, %v11275_v31 }
 0x2a2   : > { %v9218_v59 = vadd.f32 %v1774_v42, %v11276_v20  ;;  %v2319_v20 = vsel %vm2300_vm3, %v2316_v35, %v2318_v24 }
 0x2a8   : > { %v1688_v46 = vpop.f32.mrf.mxu0 }
 0x2a9   : > { %v1777_v15 = vpop.f32.mrf.mxu1  ;;  %v9223_v10 = vadd.f32 %v1688_v46, %v11278_v54 }
 0x2aa   : > { %v9226_v63 = vadd.f32 %v1777_v15, %v11279_v55 }
 0x2ab   : > { %2471 = vmatmul.bf16.gmra.mxu0 %v2317_v18 }
 0x2ac   : > { %11280 = vst [vmem:[#allocation36_spill] sm:$0xff] %v9226_v63  ;;  %2560 = vmatmul.bf16.gmra.mxu1 %v2317_v18 }
 0x2b0   : > { %v1690_v4 = vpop.f32.mrf.mxu0 }
 0x2b1   : > { %v1779_v60 = vpop.f32.mrf.mxu1  ;;  %v9229_v31 = vadd.f32 %v1690_v4, %v8807_v49 }
 0x2b2   : > { %v9232_v42 = vadd.f32 %v1779_v60, %v8809_v58  ;;  %v2320_v58 = vrot.slane %v8825_v2, 2 }
 0x2b3   : > { %11281 = vst [vmem:[#allocation37_spill] sm:$0xff] %v9229_v31 }
 0x2b4   : > { %11282 = vst [vmem:[#allocation39_spill] sm:$0xff] %v9232_v42 }
 0x2b8   : > { %v2437_v22 = vpop.f32.mrf.mxu0 }
 0x2b9   : > { %v2526_v46 = vpop.f32.mrf.mxu1  ;;  %v2606_v54 = vadd.f32 %v2437_v22, %v8814_v7  ;;  %v2321_v7 = vsel %vm2300_vm3, %v2318_v24, %v2320_v58 }
 0x2ba   : > { %v2607_v15 = vadd.f32 %v2526_v46, %v8816_v9 }
 0x2bb   : > { %2476 = vmatmul.bf16.gmra.mxu0 %v2319_v20  ;;  %v2670_v60 = vmax.f32 %v2606_v54, 0.0 }
 0x2bc   : > { %2565 = vmatmul.bf16.gmra.mxu1 %v2319_v20  ;;  %v2671_v53 = vmax.f32 %v2607_v15, 0.0 }
 0x2c0   : > { %v2439_v18 = vpop.f32.mrf.mxu0 }
 0x2c1   : > { %v2528_v55 = vpop.f32.mrf.mxu1  ;;  %v2608_v49 = vadd.f32 %v2439_v18, %v8829_v27 }
 0x2c2   : > { %v2609_v4 = vadd.f32 %v2528_v55, %v8831_v62 }
 0x2c3   : > { %v2672_v42 = vmax.f32 %v2608_v49, 0.0 }
 0x2c4   : > { %v2673_v35 = vmax.f32 %v2609_v4, 0.0 }
 0x2c5   : > { %v9241_v31 = vpack.c.bf16 %v2672_v42, %v2670_v60  ;;  %v2322_v42 = vrot.slane %v8847_v45, 2 }
 0x2c6   : > { %v9243_v63 = vpack.c.bf16 %v2673_v35, %v2671_v53 }
 0x2c8   : > { %v2442_v9 = vpop.f32.mrf.mxu0 }
 0x2c9   : > { %v2531_v20 = vpop.f32.mrf.mxu1  ;;  %v2610_v22 = vadd.f32 %v2442_v9, %v8836_v13  ;;  %v2323_v13 = vsel %vm2300_vm3, %v2320_v58, %v2322_v42  ;;  %v2324_v9 = vrot.slane %v8869_v47, 2 }
 0x2ca   : > { %v2611_v27 = vadd.f32 %v2531_v20, %v8838_v1 }
 0x2cb   : > { %2481 = vmatmul.bf16.gmra.mxu0 %v2321_v7  ;;  %v2674_v15 = vmax.f32 %v2610_v22, 0.0 }
 0x2cc   : > { %2570 = vmatmul.bf16.gmra.mxu1 %v2321_v7  ;;  %v2675_v18 = vmax.f32 %v2611_v27, 0.0 }
 0x2d0   : > { %v2444_v62 = vpop.f32.mrf.mxu0 }
 0x2d1   : > { %v2533_v2 = vpop.f32.mrf.mxu1  ;;  %v2612_v46 = vadd.f32 %v2444_v62, %v8851_v61 }
 0x2d2   : > { %v2613_v54 = vadd.f32 %v2533_v2, %v8853_v40 }
 0x2d3   : > { %v2676_v55 = vmax.f32 %v2612_v46, 0.0 }
 0x2d4   : > { %v2677_v24 = vmax.f32 %v2613_v54, 0.0 }
 0x2d5   : > { %v9251_v49 = vpack.c.bf16 %v2676_v55, %v2674_v15  ;;  %v11283_v55 = vld [vmem:[#allocation43_spill] sm:$0xff] }
 0x2d6   : > { %v9253_v4 = vpack.c.bf16 %v2677_v24, %v2675_v18  ;;  %v2326_v24 = vrot.slane %v11283_v55, 2 }
 0x2d8   : > { %v2447_v1 = vpop.f32.mrf.mxu0 }
 0x2d9   : > { %v2536_v60 = vpop.f32.mrf.mxu1  ;;  %v2614_v53 = vadd.f32 %v2447_v1, %v8858_v43  ;;  %v2325_v43 = vsel %vm2300_vm3, %v2322_v42, %v2324_v9 }
 0x2da   : > { %v2615_v61 = vadd.f32 %v2536_v60, %v8860_v56 }
 0x2db   : > { %2486 = vmatmul.bf16.gmra.mxu0 %v2323_v13  ;;  %v2678_v20 = vmax.f32 %v2614_v53, 0.0 }
 0x2dc   : > { %2575 = vmatmul.bf16.gmra.mxu1 %v2323_v13  ;;  %v2679_v22 = vmax.f32 %v2615_v61, 0.0 }
 0x2e0   : > { %v2449_v40 = vpop.f32.mrf.mxu0 }
 0x2e1   : > { %v2538_v45 = vpop.f32.mrf.mxu1  ;;  %v2616_v35 = vadd.f32 %v2449_v40, %v8873_v38 }
 0x2e2   : > { %v2617_v7 = vadd.f32 %v2538_v45, %v8875_v50 }
 0x2e3   : > { %v2680_v27 = vmax.f32 %v2616_v35, 0.0  ;;  %v2234_v35 = vadd.f32 %v8973_v32, %v8942_v23  ;;  %v2235_v23 = vadd.f32 %v9016_v26, %v8985_v34  ;;  %v2237_v32 = vadd.f32 %v9051_v16, %v9024_v51 }
 0x2e4   : > { %v2681_v58 = vmax.f32 %v2617_v7, 0.0  ;;  %v2239_v16 = vadd.f32 %v9069_v29, %v9062_v11 }
 0x2e5   : > { %v9261_v62 = vpack.c.bf16 %v2680_v27, %v2678_v20 }
 0x2e6   : > { %v9263_v2 = vpack.c.bf16 %v2681_v58, %v2679_v22 }
 0x2e8   : > { %v2452_v56 = vpop.f32.mrf.mxu0 }
 0x2e9   : > { %v2541_v46 = vpop.f32.mrf.mxu1  ;;  %v2618_v54 = vadd.f32 %v2452_v56, %v8880_v52  ;;  %v2327_v52 = vsel %vm2300_vm3, %v2324_v9, %v2326_v24  ;;  %v2328_v9 = vrot.slane %v8957_v3, 2  ;;  %v2236_v3 = vadd.f32 %v9018_v44, %v8988_v21 }
 0x2ea   : > { %v2619_v38 = vadd.f32 %v2541_v46, %v8882_v36 }
 0x2eb   : > { %2491 = vmatmul.bf16.gmra.mxu0 %v2325_v43  ;;  %v2682_v13 = vmax.f32 %v2618_v54, 0.0  ;;  %v2329_v54 = vsel %vm2300_vm3, %v2326_v24, %v2328_v9 }
 0x2ec   : > { %2580 = vmatmul.bf16.gmra.mxu1 %v2325_v43  ;;  %v2683_v1 = vmax.f32 %v2619_v38, 0.0  ;;  %v11284_v38 = vld [vmem:[#allocation45_spill] sm:$0xff] }
 0x2f0   : > { %v2454_v50 = vpop.f32.mrf.mxu0 }
 0x2f1   : > { %v2543_v47 = vpop.f32.mrf.mxu1  ;;  %v2620_v15 = vadd.f32 %v2454_v50, %v8897_v17  ;;  %v2238_v50 = vadd.f32 %v11284_v38, %v9027_v25  ;;  %v11292_v38 = vld [vmem:[#allocation50_spill] sm:$0xff] }
 0x2f2   : > { %v2621_v18 = vadd.f32 %v2543_v47, %v8899_v12  ;;  %v2233_v12 = vadd.f32 %v8971_v33, %v8939_v39 }
 0x2f3   : > { %v2684_v60 = vmax.f32 %v2620_v15, 0.0 }
 0x2f4   : > { %v2685_v42 = vmax.f32 %v2621_v18, 0.0 }
 0x2f5   : > { %v9271_v53 = vpack.c.bf16 %v2684_v60, %v2682_v13 }
 0x2f6   : > { %v9273_v61 = vpack.c.bf16 %v2685_v42, %v2683_v1  ;;  %v11285_v1 = vld [vmem:[#allocation44_spill] sm:$0xff] }
 0x2f7   : > { %v2330_v60 = vrot.slane %v11285_v1, 2  ;;  %v11297_v1 = vld [vmem:[#allocation17_spill] sm:$0xff] }
 0x2f8   : > { %v2457_v36 = vpop.f32.mrf.mxu0 }
 0x2f9   : > { %v2546_v40 = vpop.f32.mrf.mxu1  ;;  %v2622_v45 = vadd.f32 %v2457_v36, %v8931_v41  ;;  %v2331_v44 = vsel %vm2300_vm3, %v2328_v9, %v2330_v60 }
 0x2fa   : > { %v2623_v17 = vadd.f32 %v2546_v40, %v8933_v5  ;;  %v11286_v40 = vld [vmem:[#allocation14_spill] sm:$0xff] }
 0x2fb   : > { %2496 = vmatmul.bf16.gmra.mxu0 %v2327_v52  ;;  %v2686_v58 = vmax.f32 %v2622_v45, 0.0  ;;  %v2240_v45 = vadd.f32 %v11286_v40, %v9065_v0 }
 0x2fc   : > { %2585 = vmatmul.bf16.gmra.mxu1 %v2327_v52  ;;  %v2687_v43 = vmax.f32 %v2623_v17, 0.0  ;;  %v11287_v17 = vld [vmem:[#allocation15_spill] sm:$0xff] }
 0x300   : > { %v2459_v7 = vpop.f32.mrf.mxu0 }
 0x301   : > { %v2548_v20 = vpop.f32.mrf.mxu1  ;;  %v2624_v22 = vadd.f32 %v2459_v7, %v2233_v12  ;;  %v11288_v12 = vld [vmem:[#allocation46_spill] sm:$0xff]  ;;  %v11289_v7 = vld [vmem:[#allocation16_spill] sm:$0xff] }
 0x302   : > { %v2625_v27 = vadd.f32 %v2548_v20, %v2234_v35  ;;  %v2241_v35 = vadd.f32 %v11288_v12, %v11287_v17  ;;  %v11290_v20 = vld [vmem:[#allocation47_spill] sm:$0xff] }
 0x303   : > { %v2688_v56 = vmax.f32 %v2624_v22, 0.0  ;;  %v2242_v22 = vadd.f32 %v11290_v20, %v11289_v7 }
 0x304   : > { %v2689_v41 = vmax.f32 %v2625_v27, 0.0 }
 0x305   : > { %v9283_v46 = vpack.c.bf16 %v2688_v56, %v2686_v58 }
 0x306   : > { %v9285_v5 = vpack.c.bf16 %v2689_v41, %v2687_v43 }
 0x308   : > { %v2462_v39 = vpop.f32.mrf.mxu0 }
 0x309   : > { %v2551_v33 = vpop.f32.mrf.mxu1  ;;  %v2626_v47 = vadd.f32 %v2462_v39, %v2235_v23 }
 0x30a   : > { %v2627_v15 = vadd.f32 %v2551_v33, %v2236_v3 }
 0x30b   : > { %2501 = vmatmul.bf16.gmra.mxu0 %v2329_v54  ;;  %v2690_v42 = vmax.f32 %v2626_v47, 0.0  ;;  %v11293_v47 = vld [vmem:[#allocation49_spill] sm:$0xff] }
 0x30c   : > { %2590 = vmatmul.bf16.gmra.mxu1 %v2329_v54  ;;  %v2691_v52 = vmax.f32 %v2627_v15, 0.0  ;;  %v11294_v15 = vld [vmem:[#allocation51_spill] sm:$0xff] }
 0x310   : > { %v2464_v18 = vpop.f32.mrf.mxu0 }
 0x311   : > { %v2553_v55 = vpop.f32.mrf.mxu1  ;;  %v2628_v24 = vadd.f32 %v2464_v18, %v2237_v32  ;;  %v11291_v32 = vld [vmem:[#allocation48_spill] sm:$0xff]  ;;  %v2244_v18 = vadd.f32 %v11294_v15, %v11293_v47 }
 0x312   : > { %v2629_v13 = vadd.f32 %v2553_v55, %v2238_v50  ;;  %v2243_v50 = vadd.f32 %v11292_v38, %v11291_v32  ;;  %v11295_v55 = vld [vmem:[#allocation13_spill] sm:$0xff] }
 0x313   : > { %v2692_v34 = vmax.f32 %v2628_v24, 0.0  ;;  %v11296_v24 = vld [vmem:[#allocation52_spill] sm:$0xff] }
 0x314   : > { %v2693_v26 = vmax.f32 %v2629_v13, 0.0  ;;  %v2245_v13 = vadd.f32 %v11296_v24, %v11295_v55 }
 0x315   : > { %v9297_v36 = vpack.c.bf16 %v2692_v34, %v2690_v42  ;;  %v11298_v42 = vld [vmem:[#allocation53_spill] sm:$0xff] }
 0x316   : > { %v9299_v21 = vpack.c.bf16 %v2693_v26, %v2691_v52  ;;  %v2246_v52 = vadd.f32 %v11298_v42, %v11297_v1  ;;  %v11305_v42 = vld [vmem:[#allocation22_spill] sm:$0xff] }
 0x318   : > { %v2467_v51 = vpop.f32.mrf.mxu0 }
 0x319   : > { %v2556_v25 = vpop.f32.mrf.mxu1  ;;  %v2630_v27 = vadd.f32 %v2467_v51, %v2239_v16 }
 0x31a   : > { %v2631_v58 = vadd.f32 %v2556_v25, %v2240_v45 }
 0x31b   : > { %2506 = vmatmul.bf16.gmra.mxu0 %v2331_v44  ;;  %v2694_v54 = vmax.f32 %v2630_v27, 0.0  ;;  %v11299_v27 = vld [vmem:[#allocation18_spill] sm:$0xff] }
 0x31c   : > { %2595 = vmatmul.bf16.gmra.mxu1 %v2331_v44  ;;  %v2695_v39 = vmax.f32 %v2631_v58, 0.0 }
 0x320   : > { %v2469_v43 = vpop.f32.mrf.mxu0 }
 0x321   : > { %v2558_v9 = vpop.f32.mrf.mxu1  ;;  %v2632_v56 = vadd.f32 %v2469_v43, %v2241_v35  ;;  %v11300_v43 = vld [vmem:[#allocation19_spill] sm:$0xff] }
 0x322   : > { %v2633_v41 = vadd.f32 %v2558_v9, %v2242_v22  ;;  %v11301_v9 = vld [vmem:[#allocation54_spill] sm:$0xff] }
 0x323   : > { %v2696_v33 = vmax.f32 %v2632_v56, 0.0  ;;  %v2249_v56 = vadd.f32 %v11301_v9, %v11300_v43 }
 0x324   : > { %v2697_v23 = vmax.f32 %v2633_v41, 0.0  ;;  %v11302_v41 = vld [vmem:[#allocation20_spill] sm:$0xff] }
 0x325   : > { %v9310_v11 = vpack.c.bf16 %v2696_v33, %v2694_v54  ;;  %v11303_v54 = vld [vmem:[#allocation55_spill] sm:$0xff] }
 0x326   : > { %v9312_v29 = vpack.c.bf16 %v2697_v23, %v2695_v39  ;;  %v2250_v39 = vadd.f32 %v11303_v54, %v11302_v41  ;;  %v11309_v54 = vld [vmem:[#allocation24_spill] sm:$0xff] }
 0x328   : > { %v2472_v0 = vpop.f32.mrf.mxu0 }
 0x329   : > { %v2561_v3 = vpop.f32.mrf.mxu1  ;;  %v2634_v34 = vadd.f32 %v2472_v0, %v2243_v50 }
 0x32a   : > { %v2635_v26 = vadd.f32 %v2561_v3, %v2244_v18 }
 0x32b   : > { %2511 = vmatmul.bf16.gmra.mxu0 %v2330_v60  ;;  %v2698_v40 = vmax.f32 %v2634_v34, 0.0 }
 0x32c   : > { %2600 = vmatmul.bf16.gmra.mxu1 %v2330_v60  ;;  %v2699_v60 = vmax.f32 %v2635_v26, 0.0  ;;  %v11307_v26 = vld [vmem:[#allocation23_spill] sm:$0xff] }
 0x330   : > { %v2474_v44 = vpop.f32.mrf.mxu0 }
 0x331   : > { %v2563_v51 = vpop.f32.mrf.mxu1  ;;  %v2636_v25 = vadd.f32 %v2474_v44, %v2245_v13  ;;  %v11304_v13 = vld [vmem:[#allocation21_spill] sm:$0xff] }
 0x332   : > { %v2637_v16 = vadd.f32 %v2563_v51, %v2246_v52  ;;  %v11306_v52 = vld [vmem:[#allocation56_spill] sm:$0xff]  ;;  %v11308_v44 = vld [vmem:[#allocation57_spill] sm:$0xff] }
 0x333   : > { %v2700_v45 = vmax.f32 %v2636_v25, 0.0  ;;  %v2253_v34 = vadd.f32 %v11306_v52, %v11305_v42  ;;  %v2254_v51 = vadd.f32 %v11308_v44, %v11307_v26  ;;  %v7521_v25 = vld [vmem:[%s11090_s3 + $0x4] sm:$0xf0]  ;;  %v11315_v26 = vld [vmem:[#allocation28_spill] sm:$0xff] }
 0x334   : > { %v2701_v17 = vmax.f32 %v2637_v16, 0.0  ;;  %v11316_v44 = vld [vmem:[#allocation60_spill] sm:$0xff] }
 0x335   : > { %v9322_v12 = vpack.c.bf16 %v2700_v45, %v2698_v40 }
 0x336   : > { %v2749_v35 = vpack.c.bf16 %v2701_v17, %v2699_v60 }
 0x337   : > { %2872 = vmatpush.bf16.msra.mxu2 %v9322_v12 }
 0x338   : > { %3235 = vmatpush.bf16.msrb.mxu0 %v2749_v35  ;;  %v2477_v7 = vpop.f32.mrf.mxu0 }
 0x339   : > { %v2566_v20 = vpop.f32.mrf.mxu1  ;;  %v2638_v22 = vadd.f32 %v2477_v7, %v9110_v57 }
 0x33a   : > { %v2639_v58 = vadd.f32 %v2566_v20, %v11299_v27 }
 0x33b   : > { %2873 = vmatpush.bf16.msra.mxu2 %v9310_v11  ;;  %v2702_v3 = vmax.f32 %v2638_v22, 0.0 }
 0x33c   : > { %3236 = vmatpush.bf16.msrb.mxu0 %v9312_v29  ;;  %v2703_v32 = vmax.f32 %v2639_v58, 0.0 }
 0x33f   : > { %2874 = vmatpush.bf16.msra.mxu2 %v9297_v36 }
 0x340   : > { %3237 = vmatpush.bf16.msrb.mxu0 %v9299_v21  ;;  %v2479_v33 = vpop.f32.mrf.mxu0 }
 0x341   : > { %v2568_v23 = vpop.f32.mrf.mxu1  ;;  %v2640_v0 = vadd.f32 %v2479_v33, %v2249_v56  ;;  %v11310_v33 = vld [vmem:[#allocation25_spill] sm:$0xff] }
 0x342   : > { %v2641_v57 = vadd.f32 %v2568_v23, %v2250_v39  ;;  %v11311_v23 = vld [vmem:[#allocation58_spill] sm:$0xff] }
 0x343   : > { %v2704_v38 = vmax.f32 %v2640_v0, 0.0  ;;  %2875 = vmatpush.bf16.msra.mxu2 %v9283_v46  ;;  %v2257_v0 = vadd.f32 %v11311_v23, %v11310_v33  ;;  %v11319_v23 = vld [vmem:[#allocation30_spill] sm:$0xff] }
 0x344   : > { %v2705_v50 = vmax.f32 %v2641_v57, 0.0  ;;  %3238 = vmatpush.bf16.msrb.mxu0 %v9285_v5  ;;  %v11313_v57 = vld [vmem:[#allocation59_spill] sm:$0xff] }
 0x345   : > { %v9337_v47 = vpack.c.bf16 %v2704_v38, %v2702_v3 }
 0x346   : > { %v9339_v15 = vpack.c.bf16 %v2705_v50, %v2703_v32 }
 0x347   : > { %2876 = vmatpush.bf16.msra.mxu2 %v9271_v53 }
 0x348   : > { %3239 = vmatpush.bf16.msrb.mxu0 %v9273_v61  ;;  %v2482_v18 = vpop.f32.mrf.mxu0 }
 0x349   : > { %v2571_v55 = vpop.f32.mrf.mxu1  ;;  %v2642_v24 = vadd.f32 %v2482_v18, %v9128_v6  ;;  %v6487_v6 = vld [vmem:[%s11090_s3] sm:$0xf] }
 0x34a   : > { %v2643_v1 = vadd.f32 %v2571_v55, %v11304_v13  ;;  %v9359_v17 = vor.u32 %v7521_v25, %v6487_v6  ;;  %v11317_v6 = vld [vmem:[#allocation29_spill] sm:$0xff] }
 0x34b   : > { %2877 = vmatpush.bf16.msra.mxu2 %v9261_v62  ;;  %v2706_v7 = vmax.f32 %v2642_v24, 0.0  ;;  %v11318_v25 = vld [vmem:[#allocation61_spill] sm:$0xff] }
 0x34c   : > { %3240 = vmatpush.bf16.msrb.mxu0 %v9263_v2  ;;  %v2707_v20 = vmax.f32 %v2643_v1, 0.0 }
 0x34f   : > { %2878 = vmatpush.bf16.msra.mxu2 %v9251_v49 }
 0x350   : > { %3241 = vmatpush.bf16.msrb.mxu0 %v9253_v4  ;;  %v2484_v16 = vpop.f32.mrf.mxu0 }
 0x351   : > { %v2573_v40 = vpop.f32.mrf.mxu1  ;;  %v2644_v60 = vadd.f32 %v2484_v16, %v2253_v34  ;;  %v11314_v34 = vld [vmem:[#allocation27_spill] sm:$0xff]  ;;  %v2108_v16 = vpop.f32.mrf.mxu2 }
 0x352   : > { %v2645_v45 = vadd.f32 %v2573_v40, %v2254_v51  ;;  %v2261_v51 = vadd.f32 %v11316_v44, %v11315_v26  ;;  %v2197_v40 = vpop.f32.mrf.mxu3 }
 0x353   : > { %v2708_v22 = vmax.f32 %v2644_v60, 0.0  ;;  %2879 = vmatpush.bf16.msra.mxu2 %v9241_v31 }
 0x354   : > { %v2709_v27 = vmax.f32 %v2645_v45, 0.0  ;;  %3242 = vmatpush.bf16.msrb.mxu0 %v9243_v63 }
 0x355   : > { %v9363_v58 = vpack.c.bf16 %v2708_v22, %v2706_v7 }
 0x356   : > { %v9365_v43 = vpack.c.bf16 %v2709_v27, %v2707_v20  ;;  %2880 = vmatmul.bf16.vlgmr.msra.gmra.mxu2 %v9359_v17 }
 0x357   : > { %2960 = vmatpush.bf16.msrb.mxu2 %v2749_v35  ;;  %v11312_v35 = vld [vmem:[#allocation26_spill] sm:$0xff] }
 0x358   : > { %v2487_v9 = vpop.f32.mrf.mxu0  ;;  %v2258_v3 = vadd.f32 %v11313_v57, %v11312_v35 }
 0x359   : > { %v2576_v56 = vpop.f32.mrf.mxu1  ;;  %v2646_v41 = vadd.f32 %v2487_v9, %v9146_v30 }
 0x35a   : > { %v2647_v39 = vadd.f32 %v2576_v56, %v11309_v54  ;;  %v2111_v54 = vpop.f32.mrf.mxu2 }
 0x35b   : > { %2961 = vmatpush.bf16.msrb.mxu2 %v9312_v29  ;;  %v2710_v55 = vmax.f32 %v2646_v41, 0.0 }
 0x35c   : > { %v2711_v29 = vmax.f32 %v2647_v39, 0.0  ;;  %v2200_v39 = vpop.f32.mrf.mxu3 }
 0x35f   : > { %2962 = vmatpush.bf16.msrb.mxu2 %v9299_v21 }
 0x360   : > { %v2489_v32 = vpop.f32.mrf.mxu0 }
 0x361   : > { %v2578_v38 = vpop.f32.mrf.mxu1  ;;  %v2648_v50 = vadd.f32 %v2489_v32, %v2257_v0 }
 0x362   : > { %v2649_v18 = vadd.f32 %v2578_v38, %v2258_v3  ;;  %v2113_v32 = vpop.f32.mrf.mxu2 }
 0x363   : > { %2963 = vmatpush.bf16.msrb.mxu2 %v9285_v5  ;;  %v2712_v24 = vmax.f32 %v2648_v50, 0.0 }
 0x364   : > { %v2713_v30 = vmax.f32 %v2649_v18, 0.0  ;;  %v2202_v38 = vpop.f32.mrf.mxu3 }
 0x365   : > { %v9378_v13 = vpack.c.bf16 %v2712_v24, %v2710_v55 }
 0x366   : > { %v9380_v21 = vpack.c.bf16 %v2713_v30, %v2711_v29  ;;  %v11320_v29 = vld [vmem:[#allocation31_spill] sm:$0xff]  ;;  %v11321_v30 = vld [vmem:[#allocation32_spill] sm:$0xff] }
 0x367   : > { %2964 = vmatpush.bf16.msrb.mxu2 %v9273_v61  ;;  %v2262_v61 = vadd.f32 %v11318_v25, %v11317_v6  ;;  %v2267_v24 = vadd.f32 %v2111_v54, %v11320_v29  ;;  %v11326_v29 = vld [vmem:[#allocation37_spill] sm:$0xff] }
 0x368   : > { %v2492_v1 = vpop.f32.mrf.mxu0 }
 0x369   : > { %v2581_v42 = vpop.f32.mrf.mxu1  ;;  %v2650_v52 = vadd.f32 %v2492_v1, %v9164_v28 }
 0x36a   : > { %v2651_v5 = vadd.f32 %v2581_v42, %v11314_v34  ;;  %v2116_v1 = vpop.f32.mrf.mxu2 }
 0x36b   : > { %2965 = vmatpush.bf16.msrb.mxu2 %v9263_v2  ;;  %v2714_v28 = vmax.f32 %v2650_v52, 0.0  ;;  %v11322_v52 = vld [vmem:[#allocation33_spill] sm:$0xff] }
 0x36c   : > { %v2715_v20 = vmax.f32 %v2651_v5, 0.0  ;;  %v2205_v42 = vpop.f32.mrf.mxu3  ;;  %v2269_v34 = vadd.f32 %v2113_v32, %v11322_v52  ;;  %v11323_v5 = vld [vmem:[#allocation35_spill] sm:$0xff] }
 0x36f   : > { %2966 = vmatpush.bf16.msrb.mxu2 %v9253_v4 }
 0x370   : > { %v2494_v60 = vpop.f32.mrf.mxu0 }
 0x371   : > { %v2583_v45 = vpop.f32.mrf.mxu1  ;;  %v2652_v7 = vadd.f32 %v2494_v60, %v2261_v51 }
 0x372   : > { %v2653_v2 = vadd.f32 %v2583_v45, %v2262_v61 }
 0x373   : > { %2967 = vmatpush.bf16.msrb.mxu2 %v9243_v63  ;;  %v2716_v22 = vmax.f32 %v2652_v7, 0.0 }
 0x374   : > { %v2717_v4 = vmax.f32 %v2653_v2, 0.0  ;;  %v2118_v2 = vpop.f32.mrf.mxu2 }
 0x375   : > { %v9393_v27 = vpack.c.bf16 %v2716_v22, %v2714_v28  ;;  %v11324_v22 = vld [vmem:[#allocation34_spill] sm:$0xff] }
 0x376   : > { %v9395_v9 = vpack.c.bf16 %v2717_v4, %v2715_v20  ;;  %v2271_v4 = vadd.f32 %v2116_v1, %v11324_v22  ;;  %v6489_v22 = vld [vmem:[%s11090_s3 + $0x8] sm:$0xf0] }
 0x377   : > { %3147 = vmatpush.bf16.msra.mxu2 %v9322_v12  ;;  %v2265_v12 = vadd.f32 %v2108_v16, %v9187_v19 }
 0x378   : > { %v2497_v56 = vpop.f32.mrf.mxu0 }
 0x379   : > { %v2586_v41 = vpop.f32.mrf.mxu1  ;;  %v2654_v63 = vadd.f32 %v2497_v56, %v9182_v48  ;;  %v2272_v56 = vadd.f32 %v2205_v42, %v9212_v14 }
 0x37a   : > { %v2655_v33 = vadd.f32 %v2586_v41, %v9184_v37  ;;  %v2273_v41 = vadd.f32 %v2118_v2, %v9215_v8  ;;  %v6503_v2 = vld [vmem:[%s11090_s3 + $0x20] sm:$0xf] }
 0x37b   : > { %3148 = vmatpush.bf16.msra.mxu2 %v9310_v11  ;;  %v2266_v11 = vadd.f32 %v2197_v40, %v11319_v23  ;;  %v2718_v50 = vmax.f32 %v2654_v63, 0.0 }
 0x37c   : > { %v2719_v48 = vmax.f32 %v2655_v33, 0.0 }
 0x37f   : > { %3149 = vmatpush.bf16.msra.mxu2 %v9297_v36 }
 0x380   : > { %v2499_v0 = vpop.f32.mrf.mxu0 }
 0x381   : > { %v2588_v35 = vpop.f32.mrf.mxu1  ;;  %v2656_v57 = vadd.f32 %v2499_v0, %v2265_v12  ;;  %v2121_v0 = vpop.f32.mrf.mxu2 }
 0x382   : > { %v2657_v3 = vadd.f32 %v2588_v35, %v2266_v11 }
 0x383   : > { %3150 = vmatpush.bf16.msra.mxu2 %v9283_v46  ;;  %v2720_v18 = vmax.f32 %v2656_v57, 0.0 }
 0x384   : > { %v2721_v37 = vmax.f32 %v2657_v3, 0.0 }
 0x385   : > { %v9405_v36 = vpack.c.bf16 %v2720_v18, %v2718_v50 }
 0x386   : > { %v9407_v46 = vpack.c.bf16 %v2721_v37, %v2719_v48 }
 0x387   : > { %3151 = vmatpush.bf16.msra.mxu2 %v9271_v53  ;;  %v2268_v53 = vadd.f32 %v2200_v39, %v11321_v30  ;;  %v11327_v30 = vld [vmem:[#allocation39_spill] sm:$0xff] }
 0x388   : > { %v2502_v19 = vpop.f32.mrf.mxu0 }
 0x389   : > { %v2591_v55 = vpop.f32.mrf.mxu1  ;;  %v2658_v26 = vadd.f32 %v2502_v19, %v2267_v24  ;;  %v2123_v8 = vpop.f32.mrf.mxu2  ;;  %v11325_v19 = vld [vmem:[#allocation36_spill] sm:$0xff] }
 0x38a   : > { %v2659_v44 = vadd.f32 %v2591_v55, %v2268_v53  ;;  %v2277_v24 = vadd.f32 %v2123_v8, %v11326_v29 }
 0x38b   : > { %3152 = vmatpush.bf16.msra.mxu2 %v9261_v62  ;;  %v2270_v62 = vadd.f32 %v2202_v38, %v11323_v5  ;;  %v2722_v16 = vmax.f32 %v2658_v26, 0.0 }
 0x38f   : > { %3153 = vmatpush.bf16.msra.mxu2 %v9251_v49  ;;  %v2723_v49 = vmax.f32 %v2659_v44, 0.0 }
 0x390   : > { %v2504_v51 = vpop.f32.mrf.mxu0 }
 0x391   : > { %v2593_v6 = vpop.f32.mrf.mxu1  ;;  %v2660_v25 = vadd.f32 %v2504_v51, %v2269_v34 }
 0x392   : > { %v2661_v61 = vadd.f32 %v2593_v6, %v2270_v62 }
 0x393   : > { %3154 = vmatpush.bf16.msra.mxu2 %v9241_v31  ;;  %v2724_v40 = vmax.f32 %v2660_v25, 0.0  ;;  %v2207_v31 = vpop.f32.mrf.mxu3 }
 0x394   : > { %v2725_v60 = vmax.f32 %v2661_v61, 0.0  ;;  %v2274_v54 = vadd.f32 %v2207_v31, %v9218_v59  ;;  %v2275_v59 = vadd.f32 %v2121_v0, %v9223_v10  ;;  %v7525_v31 = vld [vmem:[%s11090_s3 + $0x24] sm:$0xf0]  ;;  %v7526_v0 = vld [vmem:[%s11090_s3 + $0x34] sm:$0xf] }
 0x395   : > { %v9415_v45 = vpack.c.bf16 %v2724_v40, %v2722_v16  ;;  %v7523_v40 = vld [vmem:[%s11090_s3 + $0x14] sm:$0xf0] }
 0x396   : > { %v9417_v7 = vpack.c.bf16 %v2725_v60, %v2723_v49  ;;  %v6495_v49 = vld [vmem:[%s11090_s3 + $0x10] sm:$0xf] }
 0x397   : > { %v9438_v60 = vor.u32 %v7523_v40, %v6495_v49  ;;  %v6595_v49 = vld [vmem:[%s11090_s3 + $0xa0] sm:$0xf]  ;;  %v7541_v40 = vld [vmem:[%s11090_s3 + $0xa4] sm:$0xf0] }
 0x398   : > { %v2507_v28 = vpop.f32.mrf.mxu0 }
 0x399   : > { %v2596_v20 = vpop.f32.mrf.mxu1  ;;  %v2662_v39 = vadd.f32 %v2507_v28, %v2271_v4  ;;  %2885 = vmatmul.bf16.gmra.mxu2 %v9438_v60  ;;  %v9455_v28 = vor.u32 %v7525_v31, %v6503_v2  ;;  %v9657_v31 = vor.u32 %v7541_v40, %v6595_v49 }
 0x39a   : > { %v2663_v63 = vadd.f32 %v2596_v20, %v2272_v56  ;;  %v7520_v20 = vld [vmem:[%s11090_s3 + $0x4] sm:$0xf]  ;;  %v6511_v56 = vld [vmem:[%s11090_s3 + $0x30] sm:$0xf] }
 0x39b   : > { %v2210_v35 = vpop.f32.mrf.mxu3  ;;  %v2726_v57 = vmax.f32 %v2662_v39, 0.0  ;;  %v9466_v4 = vor.u32 %v7520_v20, %v6489_v22  ;;  %v7522_v39 = vld [vmem:[%s11090_s3 + $0x14] sm:$0xf] }
 0x39c   : > { %v2727_v3 = vmax.f32 %v2663_v63, 0.0  ;;  %v2276_v55 = vadd.f32 %v2210_v35, %v11325_v19  ;;  %v6497_v63 = vld [vmem:[%s11090_s3 + $0x18] sm:$0xf0] }
 0x3a0   : > { %v2509_v33 = vpop.f32.mrf.mxu0 }
 0x3a1   : > { %v2598_v12 = vpop.f32.mrf.mxu1  ;;  %v2664_v23 = vadd.f32 %v2509_v33, %v2273_v41  ;;  %v7527_v41 = vld [vmem:[%s11090_s3 + $0x34] sm:$0xf0]  ;;  %v6519_v33 = vld [vmem:[%s11090_s3 + $0x40] sm:$0xf] }
 0x3a2   : > { %v2665_v11 = vadd.f32 %v2598_v12, %v2274_v54  ;;  %v9479_v54 = vor.u32 %v7527_v41, %v6511_v56 }
 0x3a3   : > { %v2728_v32 = vmax.f32 %v2664_v23, 0.0  ;;  %v2212_v37 = vpop.f32.mrf.mxu3  ;;  %v6527_v23 = vld [vmem:[%s11090_s3 + $0x50] sm:$0xf] }
 0x3a4   : > { %v2729_v38 = vmax.f32 %v2665_v11, 0.0  ;;  %v2278_v53 = vadd.f32 %v2212_v37, %v11327_v30  ;;  %v7532_v37 = vld [vmem:[%s11090_s3 + $0x64] sm:$0xf]  ;;  %v7537_v30 = vld [vmem:[%s11090_s3 + $0x84] sm:$0xf0] }
 0x3a5   : > { %v9423_v50 = vpack.c.bf16 %v2728_v32, %v2726_v57  ;;  %v7533_v57 = vld [vmem:[%s11090_s3 + $0x64] sm:$0xf0]  ;;  %v7530_v32 = vld [vmem:[%s11090_s3 + $0x54] sm:$0xf] }
 0x3a6   : > { %v2763_v48 = vpack.c.bf16 %v2729_v38, %v2727_v3 }
 0x3a8   : > { %v2512_v14 = vpop.f32.mrf.mxu0 }
 0x3a9   : > { %v2601_v18 = vpop.f32.mrf.mxu1  ;;  %v2666_v1 = vadd.f32 %v2512_v14, %v2275_v59  ;;  %2890 = vmatmul.bf16.gmra.mxu2 %v9455_v28  ;;  %v7534_v14 = vld [vmem:[%s11090_s3 + $0x74] sm:$0xf]  ;;  %v6537_v59 = vld [vmem:[%s11090_s3 + $0x68] sm:$0xf0] }
 0x3aa   : > { %v2667_v42 = vadd.f32 %v2601_v18, %v2276_v55  ;;  %v9598_v19 = vor.u32 %v7532_v37, %v6537_v59  ;;  %v7547_v37 = vld [vmem:[%s11090_s3 + $0xd4] sm:$0xf0] }
 0x3ab   : > { %v2730_v26 = vmax.f32 %v2666_v1, 0.0 }
 0x3ac   : > { %v2731_v44 = vmax.f32 %v2667_v42, 0.0  ;;  %v6581_v42 = vld [vmem:[%s11090_s3 + $0x88] sm:$0xf0] }
 0x3b0   : > { %v2514_v52 = vpop.f32.mrf.mxu0 }
 0x3b1   : > { %v2603_v34 = vpop.f32.mrf.mxu1  ;;  %v2668_v5 = vadd.f32 %v2514_v52, %v2277_v24  ;;  %v6579_v24 = vld [vmem:[%s11090_s3 + $0x80] sm:$0xf] }
 0x3b2   : > { %v2669_v62 = vadd.f32 %v2603_v34, %v2278_v53  ;;  %v7536_v53 = vld [vmem:[%s11090_s3 + $0x84] sm:$0xf]  ;;  %v9611_v1 = vor.u32 %v7537_v30, %v6579_v24 }
 0x3b3   : > { %v2732_v51 = vmax.f32 %v2668_v5, 0.0  ;;  %v9616_v52 = vor.u32 %v7536_v53, %v6581_v42  ;;  %v6587_v5 = vld [vmem:[%s11090_s3 + $0x90] sm:$0xf] }
 0x3b4   : > { %v2733_v6 = vmax.f32 %v2669_v62, 0.0  ;;  %v7539_v62 = vld [vmem:[%s11090_s3 + $0x94] sm:$0xf0] }
 0x3b5   : > { %v2764_v25 = vpack.c.bf16 %v2732_v51, %v2730_v26  ;;  %v7538_v26 = vld [vmem:[%s11090_s3 + $0x94] sm:$0xf]  ;;  %v9633_v51 = vor.u32 %v7539_v62, %v6587_v5 }
 0x3b6   : > { %v2765_v61 = vpack.c.bf16 %v2733_v6, %v2731_v44  ;;  %v6589_v6 = vld [vmem:[%s11090_s3 + $0x98] sm:$0xf0] }
 0x3b7   : > { %v2867_v10 = vsel %vm2300_vm3, %v2764_v25, 0  ;;  %v9638_v25 = vor.u32 %v7538_v26, %v6589_v6 }
 0x3b8   : > { %v2870_v16 = vsel %vm2300_vm3, %v2765_v61, 0  ;;  %2916 = vmatpush.bf16.msra.mxu3 %v2867_v10 }
 0x3b9   : > { %3279 = vmatpush.bf16.msrb.mxu1 %v2870_v16  ;;  %2895 = vmatmul.bf16.gmra.mxu2 %v9479_v54 }
 0x3bc   : > { %2917 = vmatpush.bf16.msra.mxu3 %v9423_v50 }
 0x3bd   : > { %3280 = vmatpush.bf16.msrb.mxu1 %v2763_v48 }
 0x3c0   : > { %2918 = vmatpush.bf16.msra.mxu3 %v9415_v45 }
 0x3c1   : > { %3281 = vmatpush.bf16.msrb.mxu1 %v9417_v7 }
 0x3c4   : > { %2919 = vmatpush.bf16.msra.mxu3 %v9405_v36 }
 0x3c5   : > { %3282 = vmatpush.bf16.msrb.mxu1 %v9407_v46 }
 0x3c8   : > { %2920 = vmatpush.bf16.msra.mxu3 %v9393_v27 }
 0x3c9   : > { %3283 = vmatpush.bf16.msrb.mxu1 %v9395_v9 }
 0x3cc   : > { %2921 = vmatpush.bf16.msra.mxu3 %v9378_v13 }
 0x3cd   : > { %3284 = vmatpush.bf16.msrb.mxu1 %v9380_v21 }
 0x3d0   : > { %2922 = vmatpush.bf16.msra.mxu3 %v9363_v58 }
 0x3d1   : > { %3285 = vmatpush.bf16.msrb.mxu1 %v9365_v43 }
 0x3d4   : > { %2923 = vmatpush.bf16.msra.mxu3 %v9337_v47 }
 0x3d5   : > { %3286 = vmatpush.bf16.msrb.mxu1 %v9339_v15 }
 0x3d7   : > { %6541 = vmatmul.msk.bf16.vlgmr.msra.gmra.mxu3 %vm2843_vm4, %v9466_v4 }
 0x3d8   : > { %3004 = vmatpush.bf16.msrb.mxu3 %v2870_v16 }
 0x3d9   : > { %v2881_v55 = vpop.f32.mrf.mxu2 }
 0x3dc   : > { %3005 = vmatpush.bf16.msrb.mxu3 %v2763_v48  ;;  %v7535_v48 = vld [vmem:[%s11090_s3 + $0x74] sm:$0xf0] }
 0x3e0   : > { %3006 = vmatpush.bf16.msrb.mxu3 %v9417_v7  ;;  %v9489_v7 = vor.u32 %v7522_v39, %v6497_v63  ;;  %v6603_v39 = vld [vmem:[%s11090_s3 + $0xb0] sm:$0xf]  ;;  %v7543_v63 = vld [vmem:[%s11090_s3 + $0xb4] sm:$0xf0] }
 0x3e1   : > { %v2883_v29 = vpop.f32.mrf.mxu2 }
 0x3e4   : > { %3007 = vmatpush.bf16.msrb.mxu3 %v9407_v46  ;;  %v7529_v46 = vld [vmem:[%s11090_s3 + $0x44] sm:$0xf0] }
 0x3e5   : > { %v9502_v12 = vor.u32 %v7529_v46, %v6519_v33  ;;  %v9683_v46 = vor.u32 %v7543_v63, %v6603_v39 }
 0x3e7   : > { %6542 = vmatmul.msk.bf16.gmra.mxu3 %vm2843_vm4, %v9489_v7  ;;  %2900 = vmatmul.bf16.gmra.mxu2 %v9502_v12 }
 0x3e8   : > { %3008 = vmatpush.bf16.msrb.mxu3 %v9395_v9  ;;  %v7524_v9 = vld [vmem:[%s11090_s3 + $0x24] sm:$0xf] }
 0x3ec   : > { %3009 = vmatpush.bf16.msrb.mxu3 %v9380_v21  ;;  %v6505_v21 = vld [vmem:[%s11090_s3 + $0x28] sm:$0xf0] }
 0x3f0   : > { %3010 = vmatpush.bf16.msrb.mxu3 %v9365_v43  ;;  %v9512_v43 = vor.u32 %v7524_v9, %v6505_v21 }
 0x3f4   : > { %3011 = vmatpush.bf16.msrb.mxu3 %v9339_v15  ;;  %v7531_v15 = vld [vmem:[%s11090_s3 + $0x54] sm:$0xf0] }
 0x3f5   : > { %v9524_v11 = vor.u32 %v7531_v15, %v6527_v23 }
 0x3f7   : > { %6543 = vmatmul.msk.bf16.gmra.mxu3 %vm2843_vm4, %v9512_v43  ;;  %2905 = vmatmul.bf16.gmra.mxu2 %v9524_v11 }
 0x3f8   : > { %3191 = vmatpush.bf16.msra.mxu3 %v2867_v10 }
 0x3fc   : > { %3192 = vmatpush.bf16.msra.mxu3 %v9423_v50  ;;  %v6571_v50 = vld [vmem:[%s11090_s3 + $0x70] sm:$0xf] }
 0x3fd   : > { %v9581_v18 = vor.u32 %v7535_v48, %v6571_v50 }
 0x3ff   : > { %3243 = vmatmul.bf16.vlgmr.msrb.gmra.mxu0 %v9581_v18 }
 0x400   : > { %3193 = vmatpush.bf16.msra.mxu3 %v9415_v45  ;;  %v6513_v45 = vld [vmem:[%s11090_s3 + $0x38] sm:$0xf0] }
 0x401   : > { %v9535_v35 = vor.u32 %v7526_v0, %v6513_v45  ;;  %v6611_v45 = vld [vmem:[%s11090_s3 + $0xc0] sm:$0xf] }
 0x404   : > { %3194 = vmatpush.bf16.msra.mxu3 %v9405_v36  ;;  %v6535_v36 = vld [vmem:[%s11090_s3 + $0x60] sm:$0xf] }
 0x405   : > { %v9547_v3 = vor.u32 %v7533_v57, %v6535_v36  ;;  %v7545_v36 = vld [vmem:[%s11090_s3 + $0xc4] sm:$0xf0] }
 0x407   : > { %6544 = vmatmul.msk.bf16.gmra.mxu3 %vm2843_vm4, %v9535_v35  ;;  %2910 = vmatmul.bf16.gmra.mxu2 %v9547_v3 }
 0x408   : > { %3195 = vmatpush.bf16.msra.mxu3 %v9393_v27 }
 0x40c   : > { %3196 = vmatpush.bf16.msra.mxu3 %v9378_v13  ;;  %v7528_v13 = vld [vmem:[%s11090_s3 + $0x44] sm:$0xf] }
 0x40f   : > { %3248 = vmatmul.bf16.gmra.mxu0 %v9611_v1 }
 0x410   : > { %3197 = vmatpush.bf16.msra.mxu3 %v9363_v58  ;;  %v6521_v58 = vld [vmem:[%s11090_s3 + $0x48] sm:$0xf0] }
 0x411   : > { %v9557_v27 = vor.u32 %v7528_v13, %v6521_v58  ;;  %v9709_v13 = vor.u32 %v7545_v36, %v6611_v45 }
 0x414   : > { %3198 = vmatpush.bf16.msra.mxu3 %v9337_v47  ;;  %v6529_v47 = vld [vmem:[%s11090_s3 + $0x58] sm:$0xf0] }
 0x415   : > { %v9568_v38 = vor.u32 %v7530_v32, %v6529_v47 }
 0x417   : > { %6545 = vmatmul.msk.bf16.gmra.mxu3 %vm2843_vm4, %v9557_v27  ;;  %2968 = vmatmul.bf16.vlgmr.msrb.gmra.mxu2 %v9359_v17  ;;  %v6573_v17 = vld [vmem:[%s11090_s3 + $0x78] sm:$0xf0] }
 0x418   : > { %v9586_v8 = vor.u32 %v7534_v14, %v6573_v17  ;;  %v6619_v17 = vld [vmem:[%s11090_s3 + $0xd0] sm:$0xf] }
 0x41a   : > { %6632 = vmatmul.msk.bf16.vlgmr.msrb.gmra.mxu1 %vm2843_vm4, %v9586_v8 }
 0x41c   : > { %v2886_v34 = vpop.f32.mrf.mxu2 }
 0x41f   : > { %3253 = vmatmul.bf16.gmra.mxu0 %v9633_v51 }
 0x424   : > { %v2888_v44 = vpop.f32.mrf.mxu2 }
 0x427   : > { %6546 = vmatmul.msk.bf16.gmra.mxu3 %vm2843_vm4, %v9568_v38  ;;  %2973 = vmatmul.bf16.gmra.mxu2 %v9438_v60  ;;  %v7540_v60 = vld [vmem:[%s11090_s3 + $0xa4] sm:$0xf] }
 0x42a   : > { %6633 = vmatmul.msk.bf16.gmra.mxu1 %vm2843_vm4, %v9616_v52 }
 0x42c   : > { %v2891_v61 = vpop.f32.mrf.mxu2 }
 0x42f   : > { %3258 = vmatmul.bf16.gmra.mxu0 %v9657_v31 }
 0x434   : > { %v2893_v2 = vpop.f32.mrf.mxu2 }
 0x437   : > { %6547 = vmatmul.msk.bf16.gmra.mxu3 %vm2843_vm4, %v9598_v19  ;;  %2978 = vmatmul.bf16.gmra.mxu2 %v9455_v28  ;;  %v6597_v28 = vld [vmem:[%s11090_s3 + $0xa8] sm:$0xf0] }
 0x438   : > { %v9662_v20 = vor.u32 %v7540_v60, %v6597_v28 }
 0x43a   : > { %6634 = vmatmul.msk.bf16.gmra.mxu1 %vm2843_vm4, %v9638_v25 }
 0x43c   : > { %v2896_v56 = vpop.f32.mrf.mxu2 }
 0x43f   : > { %3263 = vmatmul.bf16.gmra.mxu0 %v9683_v46 }
 0x444   : > { %v2898_v33 = vpop.f32.mrf.mxu2 }
 0x447   : > { %6548 = vmatmul.msk.bf16.vlgmr.msrb.gmra.mxu3 %vm2843_vm4, %v9466_v4  ;;  %2983 = vmatmul.bf16.gmra.mxu2 %v9479_v54 }
 0x44a   : > { %6635 = vmatmul.msk.bf16.gmra.mxu1 %vm2843_vm4, %v9662_v20 }
 0x44f   : > { %3268 = vmatmul.bf16.gmra.mxu0 %v9709_v13 }
 0x457   : > { %6549 = vmatmul.msk.bf16.gmra.mxu3 %vm2843_vm4, %v9489_v7  ;;  %2988 = vmatmul.bf16.gmra.mxu2 %v9502_v12  ;;  %v7542_v7 = vld [vmem:[%s11090_s3 + $0xb4] sm:$0xf]  ;;  %v6605_v12 = vld [vmem:[%s11090_s3 + $0xb8] sm:$0xf0] }
 0x458   : > { %v9688_v9 = vor.u32 %v7542_v7, %v6605_v12 }
 0x45a   : > { %v2925_v10 = vpop.f32.mrf.mxu3  ;;  %6636 = vmatmul.msk.bf16.gmra.mxu1 %vm2843_vm4, %v9688_v9 }
 0x45b   : > { %v9646_v16 = vadd.f32 %v2925_v10, %v2881_v55  ;;  %v9735_v55 = vor.u32 %v7547_v37, %v6619_v17 }
 0x45f   : > { %3273 = vmatmul.bf16.gmra.mxu0 %v9735_v55 }
 0x462   : > { %v2927_v22 = vpop.f32.mrf.mxu3 }
 0x463   : > { %v9668_v4 = vadd.f32 %v2927_v22, %v2883_v29 }
 0x467   : > { %6550 = vmatmul.msk.bf16.gmra.mxu3 %vm2843_vm4, %v9512_v43  ;;  %2993 = vmatmul.bf16.gmra.mxu2 %v9524_v11  ;;  %v7544_v11 = vld [vmem:[%s11090_s3 + $0xc4] sm:$0xf] }
 0x46a   : > { %v2930_v41 = vpop.f32.mrf.mxu3  ;;  %v2901_v23 = vpop.f32.mrf.mxu2 }
 0x46b   : > { %v9672_v54 = vadd.f32 %v2930_v41, %v2886_v34  ;;  %v7566_v41 = vld [vmem:[%s11091_s4 + $0x94] sm:$0xff] }
 0x472   : > { %v2932_v21 = vpop.f32.mrf.mxu3  ;;  %v2903_v57 = vpop.f32.mrf.mxu2 }
 0x473   : > { %v9694_v43 = vadd.f32 %v2932_v21, %v2888_v44 }
 0x477   : > { %6551 = vmatmul.msk.bf16.gmra.mxu3 %vm2843_vm4, %v9535_v35  ;;  %v6613_v35 = vld [vmem:[%s11090_s3 + $0xc8] sm:$0xf0]  ;;  %2998 = vmatmul.bf16.gmra.mxu2 %v9547_v3  ;;  %v7546_v3 = vld [vmem:[%s11090_s3 + $0xd4] sm:$0xf] }
 0x478   : > { %v9714_v58 = vor.u32 %v7544_v11, %v6613_v35 }
 0x47a   : > { %v2935_v15 = vpop.f32.mrf.mxu3  ;;  %6637 = vmatmul.msk.bf16.gmra.mxu1 %vm2843_vm4, %v9714_v58  ;;  %v2906_v50 = vpop.f32.mrf.mxu2 }
 0x47b   : > { %v9698_v0 = vadd.f32 %v2935_v15, %v2891_v61 }
 0x47c   : > { %v3244_v10 = vpop.f32.mrf.mxu0 }
 0x482   : > { %v2937_v32 = vpop.f32.mrf.mxu3  ;;  %v2908_v59 = vpop.f32.mrf.mxu2 }
 0x483   : > { %v9720_v47 = vadd.f32 %v2937_v32, %v2893_v2 }
 0x487   : > { %6552 = vmatmul.msk.bf16.gmra.mxu3 %vm2843_vm4, %v9557_v27  ;;  %v6621_v27 = vld [vmem:[%s11090_s3 + $0xd8] sm:$0xf0]  ;;  %3155 = vmatmul.bf16.vlgmr.msra.gmra.mxu2 %v9581_v18  ;;  %v6706_v18 = vld [vmem:[%s11091_s4 + $0xa4] sm:$0xf] }
 0x488   : > { %v9740_v29 = vor.u32 %v7546_v3, %v6621_v27  ;;  %v3626_v61 = vunpack.c.l.b16 %v6706_v18 }
 0x48a   : > { %v2940_v48 = vpop.f32.mrf.mxu3  ;;  %6638 = vmatmul.msk.bf16.gmra.mxu1 %vm2843_vm4, %v9740_v29  ;;  %v2911_v53 = vpop.f32.mrf.mxu2  ;;  %v3637_v60 = vpack.c.b16 %v3626_v61, %v3626_v61 }
 0x48b   : > { %v9724_v14 = vadd.f32 %v2940_v48, %v2896_v56  ;;  %v3246_v56 = vpop.f32.mrf.mxu0 }
 0x492   : > { %v2942_v24 = vpop.f32.mrf.mxu3  ;;  %v2913_v5 = vpop.f32.mrf.mxu2 }
 0x493   : > { %v9746_v30 = vadd.f32 %v2942_v24, %v2898_v33  ;;  %v3249_v33 = vpop.f32.mrf.mxu0 }
 0x497   : > { %6553 = vmatmul.msk.bf16.gmra.mxu3 %vm2843_vm4, %v9568_v38  ;;  %3160 = vmatmul.bf16.gmra.mxu2 %v9611_v1  ;;  %v3288_v40 = vpop.f32.mrf.mxu1  ;;  %v3649_v1 = vsel %vm3471_vm5, %v3637_v60, 0 }
 0x498   : > { %3700 = vmatpush.bf16.msra.mxu1 %v3649_v1  ;;  %v3289_v35 = vadd.f32 %v3288_v40, %v3244_v10 }
 0x49a   : > { %v2945_v42 = vpop.f32.mrf.mxu3  ;;  %v2969_v44 = vpop.f32.mrf.mxu2 }
 0x49b   : > { %v9750_v34 = vadd.f32 %v2945_v42, %v2901_v23  ;;  %v3251_v45 = vpop.f32.mrf.mxu0 }
 0x49f   : > { %v3290_v39 = vpop.f32.mrf.mxu1 }
 0x4a0   : > { %v3291_v32 = vadd.f32 %v3290_v39, %v3246_v56 }
 0x4a2   : > { %v2947_v62 = vpop.f32.mrf.mxu3  ;;  %v2971_v49 = vpop.f32.mrf.mxu2 }
 0x4a3   : > { %v9753_v26 = vadd.f32 %v2947_v62, %v2903_v57  ;;  %v3254_v17 = vpop.f32.mrf.mxu0 }
 0x4a7   : > { %6554 = vmatmul.msk.bf16.gmra.mxu3 %vm2843_vm4, %v9598_v19  ;;  %3165 = vmatmul.bf16.gmra.mxu2 %v9633_v51  ;;  %v7567_v19 = vld [vmem:[%s11091_s4 + $0x9c] sm:$0xff]  ;;  %v3293_v12 = vpop.f32.mrf.mxu1 }
 0x4a8   : > { %3701 = vmatpush.bf16.msra.mxu1 %v7567_v19 }
 0x4aa   : > { %v2950_v6 = vpop.f32.mrf.mxu3  ;;  %v2974_v22 = vpop.f32.mrf.mxu2 }
 0x4ab   : > { %v9760_v38 = vadd.f32 %v2950_v6, %v2906_v50  ;;  %v3256_v24 = vpop.f32.mrf.mxu0 }
 0x4ac   : > { %3702 = vmatpush.bf16.msra.mxu1 %v7566_v41 }
 0x4af   : > { %v3295_v11 = vpop.f32.mrf.mxu1 }
 0x4b0   : > { %v3296_v62 = vadd.f32 %v3295_v11, %v3251_v45 }
 0x4b2   : > { %v2952_v2 = vpop.f32.mrf.mxu3  ;;  %v2976_v7 = vpop.f32.mrf.mxu2 }
 0x4b3   : > { %v9767_v28 = vadd.f32 %v2952_v2, %v2908_v59 }
 0x4b7   : > { %6625 = vmatmul.msk.bf16.vlgmr.msra.gmra.mxu3 %vm2843_vm4, %v9586_v8  ;;  %3170 = vmatmul.bf16.gmra.mxu2 %v9657_v31  ;;  %v3298_v37 = vpop.f32.mrf.mxu1 }
 0x4b8   : > { %v3299_v19 = vadd.f32 %v3298_v37, %v3254_v17  ;;  %v7556_v17 = vld [vmem:[%s11091_s4 + $0x40] sm:$0xff] }
 0x4ba   : > { %v2955_v51 = vpop.f32.mrf.mxu3  ;;  %v2979_v15 = vpop.f32.mrf.mxu2 }
 0x4bb   : > { %v9774_v63 = vadd.f32 %v2955_v51, %v2911_v53 }
 0x4bf   : > { %v3300_v53 = vpop.f32.mrf.mxu1 }
 0x4c0   : > { %v3301_v2 = vadd.f32 %v3300_v53, %v3256_v24 }
 0x4c2   : > { %v2957_v21 = vpop.f32.mrf.mxu3  ;;  %v2981_v8 = vpop.f32.mrf.mxu2 }
 0x4c3   : > { %v9777_v23 = vadd.f32 %v2957_v21, %v2913_v5  ;;  %v3294_v5 = vadd.f32 %v3293_v12, %v3249_v33 }
 0x4c7   : > { %6626 = vmatmul.msk.bf16.gmra.mxu3 %vm2843_vm4, %v9616_v52  ;;  %3175 = vmatmul.bf16.gmra.mxu2 %v9683_v46  ;;  %v3303_v40 = vpop.f32.mrf.mxu1 }
 0x4ca   : > { %v3013_v36 = vpop.f32.mrf.mxu3  ;;  %v2984_v31 = vpop.f32.mrf.mxu2 }
 0x4cb   : > { %v3014_v57 = vadd.f32 %v3013_v36, %v2969_v44 }
 0x4cd   : > { %v3324_v3 = vmax.f32 %v3014_v57, %v3289_v35 }
 0x4cf   : > { %v3305_v41 = vpop.f32.mrf.mxu1 }
 0x4d2   : > { %v3015_v50 = vpop.f32.mrf.mxu3  ;;  %v2986_v46 = vpop.f32.mrf.mxu2 }
 0x4d3   : > { %v3016_v48 = vadd.f32 %v3015_v50, %v2971_v49  ;;  %v3259_v49 = vpop.f32.mrf.mxu0 }
 0x4d4   : > { %v3304_v57 = vadd.f32 %v3303_v40, %v3259_v49 }
 0x4d5   : > { %v3326_v59 = vmax.f32 %v3016_v48, %v3291_v32 }
 0x4d7   : > { %6627 = vmatmul.msk.bf16.gmra.mxu3 %vm2843_vm4, %v9638_v25  ;;  %v9784_v52 = vpack.c.bf16 %v3326_v59, %v3324_v3  ;;  %3180 = vmatmul.bf16.gmra.mxu2 %v9709_v13  ;;  %v3308_v11 = vpop.f32.mrf.mxu1 }
 0x4d9   : > { %6747 = vmatmul.msk.bf16.vlgmr.msra.gmra.mxu1 %vm3449_vm6, %v9784_v52 }
 0x4da   : > { %v3018_v27 = vpop.f32.mrf.mxu3  ;;  %v2989_v6 = vpop.f32.mrf.mxu2 }
 0x4db   : > { %v3019_v42 = vadd.f32 %v3018_v27, %v2974_v22  ;;  %v3261_v22 = vpop.f32.mrf.mxu0 }
 0x4dc   : > { %v3306_v35 = vadd.f32 %v3305_v41, %v3261_v22 }
 0x4dd   : > { %v3328_v61 = vmax.f32 %v3019_v42, %v3294_v5  ;;  %v7564_v42 = vld [vmem:[%s11091_s4 + $0x84] sm:$0xff] }
 0x4df   : > { %v3310_v27 = vpop.f32.mrf.mxu1 }
 0x4e2   : > { %v3020_v44 = vpop.f32.mrf.mxu3  ;;  %v2991_v1 = vpop.f32.mrf.mxu2 }
 0x4e3   : > { %v3021_v18 = vadd.f32 %v3020_v44, %v2976_v7  ;;  %v3385_v7 = vld [vmem:[%s11091_s4 + $0x50] sm:$0xf]  ;;  %v3264_v45 = vpop.f32.mrf.mxu0 }
 0x4e4   : > { %v3309_v49 = vadd.f32 %v3308_v11, %v3264_v45  ;;  %v7549_v45 = vld [vmem:[%s11091_s4 + $0x8] sm:$0xff] }
 0x4e5   : > { %v3330_v10 = vmax.f32 %v3021_v18, %v3296_v62 }
 0x4e7   : > { %6628 = vmatmul.msk.bf16.gmra.mxu3 %vm2843_vm4, %v9662_v20  ;;  %v9791_v25 = vpack.c.bf16 %v3330_v10, %v3328_v61  ;;  %3185 = vmatmul.bf16.gmra.mxu2 %v9735_v55  ;;  %v3427_v55 = vunpack.c.l.b16 %v3385_v7  ;;  %v7553_v61 = vld [vmem:[%s11091_s4 + $0x28] sm:$0xff]  ;;  %v7563_v10 = vld [vmem:[%s11091_s4 + $0x7c] sm:$0xff] }
 0x4e9   : > { %6748 = vmatmul.msk.bf16.gmra.mxu1 %vm3449_vm6, %v9791_v25 }
 0x4ea   : > { %v3023_v60 = vpop.f32.mrf.mxu3  ;;  %v9803_v12 = vpop.f32.mrf.mxu2 }
 0x4eb   : > { %v3024_v13 = vadd.f32 %v3023_v60, %v2979_v15  ;;  %v3438_v15 = vpack.c.b16 %v3427_v55, %v3427_v55  ;;  %v3266_v59 = vpop.f32.mrf.mxu0  ;;  %v7560_v55 = vld [vmem:[%s11091_s4 + $0x64] sm:$0xff] }
 0x4ec   : > { %v3311_v40 = vadd.f32 %v3310_v27, %v3266_v59 }
 0x4ed   : > { %v3332_v51 = vmax.f32 %v3024_v13, %v3299_v19  ;;  %v3473_v36 = vsel %vm3471_vm5, %v3438_v15, 0  ;;  %v7552_v19 = vld [vmem:[%s11091_s4 + $0x20] sm:$0xff] }
 0x4ee   : > { %3524 = vmatpush.bf16.msrb.mxu3 %v3473_v36  ;;  %v7559_v36 = vld [vmem:[%s11091_s4 + $0x5c] sm:$0xff] }
 0x4f2   : > { %v3025_v56 = vpop.f32.mrf.mxu3  ;;  %v2996_v50 = vpop.f32.mrf.mxu2 }
 0x4f3   : > { %v3026_v39 = vadd.f32 %v3025_v56, %v2981_v8  ;;  %v3269_v62 = vpop.f32.mrf.mxu0 }
 0x4f5   : > { %v3334_v20 = vmax.f32 %v3026_v39, %v3301_v2  ;;  %v7561_v39 = vld [vmem:[%s11091_s4 + $0x6c] sm:$0xff] }
 0x4f7   : > { %6629 = vmatmul.msk.bf16.gmra.mxu3 %vm2843_vm4, %v9688_v9  ;;  %v9801_v33 = vpack.c.bf16 %v3334_v20, %v3332_v51  ;;  %v7557_v9 = vld [vmem:[%s11091_s4 + $0x48] sm:$0xff]  ;;  %v3313_v44 = vpop.f32.mrf.mxu1 }
 0x4f8   : > { %3525 = vmatpush.bf16.msrb.mxu3 %v7557_v9  ;;  %v3314_v11 = vadd.f32 %v3313_v44, %v3269_v62 }
 0x4f9   : > { %6749 = vmatmul.msk.bf16.gmra.mxu1 %vm3449_vm6, %v9801_v33 }
 0x4fa   : > { %v3028_v21 = vpop.f32.mrf.mxu3  ;;  %v2999_v5 = vpop.f32.mrf.mxu2 }
 0x4fb   : > { %v3029_v8 = vadd.f32 %v3028_v21, %v2984_v31  ;;  %v7555_v31 = vld [vmem:[%s11091_s4 + $0x38] sm:$0xff]  ;;  %v3271_v51 = vpop.f32.mrf.mxu0 }
 0x4fc   : > { %3526 = vmatpush.bf16.msrb.mxu3 %v7556_v17  ;;  %3475 = vmatpush.bf16.msrb.mxu2 %v7555_v31 }
 0x4fd   : > { %v3336_v37 = vmax.f32 %v3029_v8, %v3304_v57 }
 0x4ff   : > { %v3315_v7 = vpop.f32.mrf.mxu1 }
 0x500   : > { %v3316_v9 = vadd.f32 %v3315_v7, %v3271_v51 }
 0x502   : > { %v3030_v32 = vpop.f32.mrf.mxu3  ;;  %v3001_v56 = vpop.f32.mrf.mxu2 }
 0x503   : > { %v3031_v48 = vadd.f32 %v3030_v32, %v2986_v46  ;;  %v7565_v46 = vld [vmem:[%s11091_s4 + $0x8c] sm:$0xff] }
 0x504   : > { %3651 = vmatpush.bf16.msra.mxu0 %v7565_v46 }
 0x505   : > { %v3338_v3 = vmax.f32 %v3031_v48, %v3306_v35  ;;  %v3274_v35 = vpop.f32.mrf.mxu0  ;;  %v7558_v48 = vld [vmem:[%s11091_s4 + $0x54] sm:$0xff] }
 0x507   : > { %6630 = vmatmul.msk.bf16.gmra.mxu3 %vm2843_vm4, %v9714_v58  ;;  %v9816_v24 = vpack.c.bf16 %v3338_v3, %v3336_v37  ;;  %v7554_v58 = vld [vmem:[%s11091_s4 + $0x30] sm:$0xff]  ;;  %v3318_v32 = vpop.f32.mrf.mxu1 }
 0x508   : > { %3476 = vmatpush.bf16.msrb.mxu2 %v7554_v58  ;;  %3652 = vmatpush.bf16.msra.mxu0 %v7564_v42 }
 0x509   : > { %6750 = vmatmul.msk.bf16.gmra.mxu1 %vm3449_vm6, %v9816_v24 }
 0x50a   : > { %v3033_v53 = vpop.f32.mrf.mxu3  ;;  %v3156_v21 = vpop.f32.mrf.mxu2 }
 0x50b   : > { %v3034_v18 = vadd.f32 %v3033_v53, %v2989_v6  ;;  %v7562_v6 = vld [vmem:[%s11091_s4 + $0x74] sm:$0xff]  ;;  %v3319_v53 = vadd.f32 %v3318_v32, %v3274_v35 }
 0x50c   : > { %3477 = vmatpush.bf16.msrb.mxu2 %v7553_v61  ;;  %3653 = vmatpush.bf16.msra.mxu0 %v7563_v10 }
 0x50d   : > { %v3340_v2 = vmax.f32 %v3034_v18, %v3309_v49  ;;  %v3276_v27 = vpop.f32.mrf.mxu0 }
 0x50f   : > { %v3320_v31 = vpop.f32.mrf.mxu1 }
 0x510   : > { %3478 = vmatpush.bf16.msrb.mxu2 %v7552_v19  ;;  %3654 = vmatpush.bf16.msra.mxu0 %v7562_v6  ;;  %v3321_v58 = vadd.f32 %v3320_v31, %v3276_v27 }
 0x512   : > { %v3035_v60 = vpop.f32.mrf.mxu3  ;;  %v3158_v59 = vpop.f32.mrf.mxu2 }
 0x513   : > { %v3036_v13 = vadd.f32 %v3035_v60, %v2991_v1  ;;  %v7551_v1 = vld [vmem:[%s11091_s4 + $0x18] sm:$0xff] }
 0x514   : > { %3479 = vmatpush.bf16.msrb.mxu2 %v7551_v1  ;;  %3655 = vmatpush.bf16.msra.mxu0 %v7561_v39 }
 0x515   : > { %v3342_v22 = vmax.f32 %v3036_v13, %v3311_v40 }
 0x517   : > { %6631 = vmatmul.msk.bf16.gmra.mxu3 %vm2843_vm4, %v9740_v29  ;;  %v9846_v41 = vpack.c.bf16 %v3342_v22, %v3340_v2  ;;  %v7550_v29 = vld [vmem:[%s11091_s4 + $0x10] sm:$0xff] }
 0x518   : > { %3480 = vmatpush.bf16.msrb.mxu2 %v7550_v29  ;;  %3656 = vmatpush.bf16.msra.mxu0 %v7560_v55 }
 0x519   : > { %6751 = vmatmul.msk.bf16.gmra.mxu1 %vm3449_vm6, %v9846_v41 }
 0x51a   : > { %v3038_v20 = vpop.f32.mrf.mxu3  ;;  %v3161_v44 = vpop.f32.mrf.mxu2 }
 0x51b   : > { %v3039_v15 = vadd.f32 %v3038_v20, %v9803_v12  ;;  %v7548_v12 = vld [vmem:[%s11091_s4] sm:$0xff] }
 0x51c   : > { %3481 = vmatpush.bf16.msrb.mxu2 %v7549_v45  ;;  %3657 = vmatpush.bf16.msra.mxu0 %v7559_v36 }
 0x51d   : > { %v3344_v17 = vmax.f32 %v3039_v15, %v3314_v11 }
 0x520   : > { %3482 = vmatpush.bf16.msrb.mxu2 %v7548_v12  ;;  %3658 = vmatpush.bf16.msra.mxu0 %v7558_v48 }
 0x522   : > { %v3040_v8 = vpop.f32.mrf.mxu3  ;;  %v3163_v49 = vpop.f32.mrf.mxu2 }
 0x523   : > { %v3041_v57 = vadd.f32 %v3040_v8, %v2996_v50 }
 0x525   : > { %v3346_v37 = vmax.f32 %v3041_v57, %v3316_v9 }
 0x527   : > { %6679 = vmatmul.msk.bf16.vlgmr.msrb.gmra.mxu3 %vm3449_vm6, %v9784_v52  ;;  %v3362_v3 = vpack.c.bf16 %v3346_v37, %v3344_v17 }
 0x529   : > { %6752 = vmatmul.msk.bf16.gmra.mxu1 %vm3449_vm6, %v3362_v3 }
 0x52a   : > { %v3043_v50 = vpop.f32.mrf.mxu3  ;;  %v3166_v2 = vpop.f32.mrf.mxu2 }
 0x52b   : > { %v3044_v46 = vadd.f32 %v3043_v50, %v2999_v5 }
 0x52d   : > { %v3348_v18 = vmax.f32 %v3044_v46, %v3319_v53 }
 0x532   : > { %v3045_v42 = vpop.f32.mrf.mxu3  ;;  %v3168_v1 = vpop.f32.mrf.mxu2 }
 0x533   : > { %v3046_v62 = vadd.f32 %v3045_v42, %v3001_v56 }
 0x535   : > { %v3350_v61 = vmax.f32 %v3046_v62, %v3321_v58 }
 0x537   : > { %6680 = vmatmul.msk.bf16.gmra.mxu3 %vm3449_vm6, %v9791_v25  ;;  %v3364_v52 = vpack.c.bf16 %v3350_v61, %v3348_v18 }
 0x539   : > { %6753 = vmatmul.msk.bf16.gmra.mxu1 %vm3449_vm6, %v3364_v52 }
 0x53a   : > { %v3200_v10 = vpop.f32.mrf.mxu3 }
 0x53b   : > { %v3201_v40 = vadd.f32 %v3200_v10, %v3156_v21 }
 0x53d   : > { %v3323_v5 = vmax.f32 %v9646_v16, %v3201_v40 }
 0x542   : > { %v3202_v60 = vpop.f32.mrf.mxu3 }
 0x543   : > { %v3203_v13 = vadd.f32 %v3202_v60, %v3158_v59 }
 0x545   : > { %v3325_v19 = vmax.f32 %v9668_v4, %v3203_v13  ;;  %v3171_v4 = vpop.f32.mrf.mxu2 }
 0x547   : > { %v3351_v6 = vpack.c.bf16 %v3325_v19, %v3323_v5  ;;  %6681 = vmatmul.msk.bf16.gmra.mxu3 %vm3449_vm6, %v9801_v33  ;;  %v7581_v5 = vld [vmem:[%s11092_s5 + $0x44] sm:$0xf] }
 0x549   : > { %3483 = vmatmul.bf16.vlgmr.msrb.gmra.mxu2 %v3351_v6  ;;  %3659 = vmatmul.bf16.vlgmr.msra.gmra.mxu0 %v3351_v6  ;;  %v6810_v6 = vld [vmem:[%s11092_s5 + $0x48] sm:$0xf0] }
 0x54a   : > { %v3205_v25 = vpop.f32.mrf.mxu3 }
 0x54b   : > { %v3206_v22 = vadd.f32 %v3205_v25, %v3161_v44 }
 0x54d   : > { %v3327_v51 = vmax.f32 %v9672_v54, %v3206_v22  ;;  %v3173_v45 = vpop.f32.mrf.mxu2 }
 0x552   : > { %v3207_v56 = vpop.f32.mrf.mxu3 }
 0x553   : > { %v3208_v39 = vadd.f32 %v3207_v56, %v3163_v49  ;;  %v6800_v56 = vld [vmem:[%s11092_s5 + $0x30] sm:$0xf] }
 0x555   : > { %v3329_v20 = vmax.f32 %v9694_v43, %v3208_v39  ;;  %v3176_v43 = vpop.f32.mrf.mxu2  ;;  %v7579_v39 = vld [vmem:[%s11092_s5 + $0x34] sm:$0xf] }
 0x556   : > { %v9920_v25 = vpop.f32.mrf.mxu1 }
 0x557   : > { %v3353_v7 = vpack.c.bf16 %v3329_v20, %v3327_v51  ;;  %6682 = vmatmul.msk.bf16.gmra.mxu3 %vm3449_vm6, %v9816_v24  ;;  %v6802_v20 = vld [vmem:[%s11092_s5 + $0x38] sm:$0xf0] }
 0x559   : > { %3488 = vmatmul.bf16.gmra.mxu2 %v3353_v7  ;;  %3664 = vmatmul.bf16.gmra.mxu0 %v3353_v7  ;;  %v6805_v7 = vor.u32 %v7579_v39, %v6802_v20  ;;  %v6851_v39 = vld [vmem:[%s11092_s5 + $0x70] sm:$0xf0] }
 0x55a   : > { %v3210_v16 = vpop.f32.mrf.mxu3 }
 0x55b   : > { %v3211_v33 = vadd.f32 %v3210_v16, %v3166_v2  ;;  %v6813_v2 = vor.u32 %v7581_v5, %v6810_v6  ;;  %v6792_v16 = vld [vmem:[%s11092_s5 + $0x20] sm:$0xf] }
 0x55d   : > { %v3331_v21 = vmax.f32 %v9698_v0, %v3211_v33  ;;  %v7577_v33 = vld [vmem:[%s11092_s5 + $0x24] sm:$0xf] }
 0x562   : > { %v3212_v29 = vpop.f32.mrf.mxu3 }
 0x563   : > { %v3213_v55 = vadd.f32 %v3212_v29, %v3168_v1  ;;  %v7580_v1 = vld [vmem:[%s11092_s5 + $0x34] sm:$0xf0] }
 0x564   : > { %v6801_v51 = vor.u32 %v7580_v1, %v6800_v56 }
 0x565   : > { %v3333_v15 = vmax.f32 %v9720_v47, %v3213_v55  ;;  %v3178_v47 = vpop.f32.mrf.mxu2  ;;  %v6794_v55 = vld [vmem:[%s11092_s5 + $0x28] sm:$0xf0] }
 0x567   : > { %v3355_v36 = vpack.c.bf16 %v3333_v15, %v3331_v21  ;;  %6683 = vmatmul.msk.bf16.gmra.mxu3 %vm3449_vm6, %v9846_v41  ;;  %v6797_v21 = vor.u32 %v7577_v33, %v6794_v55  ;;  %v6784_v15 = vld [vmem:[%s11092_s5 + $0x10] sm:$0xf] }
 0x569   : > { %3493 = vmatmul.bf16.gmra.mxu2 %v3355_v36  ;;  %3669 = vmatmul.bf16.gmra.mxu0 %v3355_v36  ;;  %v7575_v36 = vld [vmem:[%s11092_s5 + $0x14] sm:$0xf] }
 0x56a   : > { %v3215_v54 = vpop.f32.mrf.mxu3 }
 0x56b   : > { %v3216_v24 = vadd.f32 %v3215_v54, %v3171_v4  ;;  %v7578_v4 = vld [vmem:[%s11092_s5 + $0x24] sm:$0xf0]  ;;  %v9957_v54 = vpop.f32.mrf.mxu1 }
 0x56c   : > { %v6793_v29 = vor.u32 %v7578_v4, %v6792_v16  ;;  %v7584_v16 = vld [vmem:[%s11092_s5 + $0x5c] sm:$0xf0]  ;;  %v7583_v4 = vld [vmem:[%s11092_s5 + $0x5c] sm:$0xf] }
 0x56d   : > { %v3335_v8 = vmax.f32 %v9724_v14, %v3216_v24  ;;  %v3181_v48 = vpop.f32.mrf.mxu2  ;;  %v6786_v24 = vld [vmem:[%s11092_s5 + $0x18] sm:$0xf0] }
 0x572   : > { %v3217_v11 = vpop.f32.mrf.mxu3 }
 0x573   : > { %v3218_v9 = vadd.f32 %v3217_v11, %v3173_v45  ;;  %v7576_v45 = vld [vmem:[%s11092_s5 + $0x14] sm:$0xf0] }
 0x575   : > { %v3337_v57 = vmax.f32 %v9746_v30, %v3218_v9  ;;  %v3183_v30 = vpop.f32.mrf.mxu2  ;;  %v6789_v9 = vor.u32 %v7575_v36, %v6786_v24 }
 0x577   : > { %v3357_v35 = vpack.c.bf16 %v3337_v57, %v3335_v8  ;;  %6684 = vmatmul.msk.bf16.gmra.mxu3 %vm3449_vm6, %v3362_v3  ;;  %v6838_v8 = vld [vmem:[%s11092_s5 + $0xa8] sm:$0x33]  ;;  %v6776_v57 = vld [vmem:[%s11092_s5] sm:$0xf] }
 0x579   : > { %3498 = vmatmul.bf16.gmra.mxu2 %v3357_v35  ;;  %3674 = vmatmul.bf16.gmra.mxu0 %v3357_v35  ;;  %v7574_v35 = vld [vmem:[%s11092_s5 + $0x4] sm:$0xf0] }
 0x57a   : > { %v3220_v0 = vpop.f32.mrf.mxu3 }
 0x57b   : > { %v3221_v32 = vadd.f32 %v3220_v0, %v3176_v43  ;;  %v6785_v43 = vor.u32 %v7576_v45, %v6784_v15  ;;  %v7573_v0 = vld [vmem:[%s11092_s5 + $0x4] sm:$0xf] }
 0x57d   : > { %v3339_v17 = vmax.f32 %v9750_v34, %v3221_v32  ;;  %v3186_v58 = vpop.f32.mrf.mxu2  ;;  %v4145_v32 = vunpack.c.h.b16 %v6838_v8 }
 0x582   : > { %v3222_v41 = vpop.f32.mrf.mxu3 }
 0x583   : > { %v3223_v12 = vadd.f32 %v3222_v41, %v3178_v47  ;;  %v4144_v47 = vunpack.c.l.b16 %v6838_v8  ;;  %v6777_v41 = vor.u32 %v7574_v35, %v6776_v57 }
 0x585   : > { %v3341_v37 = vmax.f32 %v9753_v26, %v3223_v12  ;;  %v3188_v42 = vpop.f32.mrf.mxu2  ;;  %v6778_v12 = vld [vmem:[%s11092_s5 + $0x8] sm:$0xf0] }
 0x587   : > { %v3359_v50 = vpack.c.bf16 %v3341_v37, %v3339_v17  ;;  %6685 = vmatmul.msk.bf16.gmra.mxu3 %vm3449_vm6, %v3364_v52  ;;  %v4156_v17 = vpack.c.b16 %v4144_v47, %v4144_v47  ;;  %v4157_v37 = vpack.c.b16 %v4145_v32, %v4145_v32 }
 0x589   : > { %3503 = vmatmul.bf16.gmra.mxu2 %v3359_v50  ;;  %3679 = vmatmul.bf16.gmra.mxu0 %v3359_v50  ;;  %v4190_v50 = vsel %vm3920_vm7, %v4156_v17, 0 }
 0x58a   : > { %v3225_v14 = vpop.f32.mrf.mxu3  ;;  %4197 = vmatpush.bf16.msrb.mxu0 %v4190_v50 }
 0x58b   : > { %v3226_v3 = vadd.f32 %v3225_v14, %v3181_v48  ;;  %v6781_v48 = vor.u32 %v7573_v0, %v6778_v12  ;;  %v4193_v14 = vsel %vm3920_vm7, %v4157_v37, 0 }
 0x58c   : > { %4241 = vmatpush.bf16.msrb.mxu1 %v4193_v14 }
 0x58d   : > { %v3343_v31 = vmax.f32 %v9760_v38, %v3226_v3  ;;  %v3807_v38 = vld [vmem:[%s11092_s5 + $0x50] sm:$0x33]  ;;  %v7592_v3 = vld [vmem:[%s11092_s5 + $0x9c] sm:$0xf0] }
 0x58e   : > { %v3874_v10 = vunpack.c.l.b16 %v3807_v38 }
 0x590   : > { %v3886_v49 = vpack.c.b16 %v3874_v10, %v3874_v10  ;;  %v7588_v10 = vld [vmem:[%s11092_s5 + $0x7c] sm:$0xf0] }
 0x592   : > { %v3227_v59 = vpop.f32.mrf.mxu3  ;;  %v3922_v60 = vsel %vm3920_vm7, %v3886_v49, 0 }
 0x593   : > { %v3228_v27 = vadd.f32 %v3227_v59, %v3183_v30  ;;  %3929 = vmatpush.bf16.msra.mxu2 %v3922_v60  ;;  %v6873_v30 = vld [vmem:[%s11092_s5 + $0x98] sm:$0xf]  ;;  %v7591_v59 = vld [vmem:[%s11092_s5 + $0x9c] sm:$0xf] }
 0x595   : > { %v3345_v46 = vmax.f32 %v9767_v28, %v3228_v27  ;;  %v3875_v28 = vunpack.c.h.b16 %v3807_v38  ;;  %v3709_v27 = vpop.f32.mrf.mxu1  ;;  %v6857_v38 = vld [vmem:[%s11092_s5 + $0x78] sm:$0xf] }
 0x596   : > { %v6858_v60 = vor.u32 %v7588_v10, %v6857_v38 }
 0x597   : > { %v3361_v53 = vpack.c.bf16 %v3345_v46, %v3343_v31  ;;  %v3887_v40 = vpack.c.b16 %v3875_v28, %v3875_v28  ;;  %v6874_v31 = vor.u32 %v7592_v3, %v6873_v30  ;;  %v6875_v46 = vld [vmem:[%s11092_s5 + $0xa0] sm:$0xf0]  ;;  %v7587_v28 = vld [vmem:[%s11092_s5 + $0x7c] sm:$0xf] }
 0x599   : > { %3508 = vmatmul.bf16.gmra.mxu2 %v3361_v53  ;;  %3684 = vmatmul.bf16.gmra.mxu0 %v3361_v53  ;;  %v3925_v13 = vsel %vm3920_vm7, %v3887_v40, 0 }
 0x59a   : > { %v3230_v34 = vpop.f32.mrf.mxu3  ;;  %3973 = vmatpush.bf16.msra.mxu3 %v3925_v13  ;;  %4198 = vmatpush.bf16.msrb.mxu0 %v6874_v31  ;;  %v6859_v13 = vld [vmem:[%s11092_s5 + $0x80] sm:$0xf0] }
 0x59b   : > { %v3231_v26 = vadd.f32 %v3230_v34, %v3186_v58  ;;  %v6878_v34 = vor.u32 %v7591_v59, %v6875_v46 }
 0x59d   : > { %v3347_v18 = vmax.f32 %v9774_v63, %v3231_v26  ;;  %v6808_v63 = vld [vmem:[%s11092_s5 + $0x40] sm:$0xf]  ;;  %4242 = vmatpush.bf16.msrb.mxu1 %v6878_v34  ;;  %v6865_v26 = vld [vmem:[%s11092_s5 + $0x88] sm:$0xf] }
 0x59e   : > { %3974 = vmatpush.bf16.msra.mxu3 %v6813_v2  ;;  %v6849_v2 = vld [vmem:[%s11092_s5 + $0x68] sm:$0xf] }
 0x5a2   : > { %v3232_v62 = vpop.f32.mrf.mxu3  ;;  %3975 = vmatpush.bf16.msra.mxu3 %v6805_v7  ;;  %v6841_v7 = vld [vmem:[%s11092_s5 + $0x58] sm:$0xf] }
 0x5a3   : > { %v3233_v44 = vadd.f32 %v3232_v62, %v3188_v42  ;;  %v7590_v42 = vld [vmem:[%s11092_s5 + $0x8c] sm:$0xf0]  ;;  %v7589_v62 = vld [vmem:[%s11092_s5 + $0x8c] sm:$0xf]  ;;  %v6842_v55 = vor.u32 %v7584_v16, %v6841_v7 }
 0x5a5   : > { %v3349_v61 = vmax.f32 %v9777_v23, %v3233_v44  ;;  %v7582_v23 = vld [vmem:[%s11092_s5 + $0x44] sm:$0xf0]  ;;  %v6866_v44 = vor.u32 %v7590_v42, %v6865_v26 }
 0x5a6   : > { %v6809_v19 = vor.u32 %v7582_v23, %v6808_v63  ;;  %3976 = vmatpush.bf16.msra.mxu3 %v6797_v21  ;;  %v6862_v23 = vor.u32 %v7587_v28, %v6859_v13  ;;  %v6843_v21 = vld [vmem:[%s11092_s5 + $0x60] sm:$0xf0] }
 0x5a7   : > { %v3363_v52 = vpack.c.bf16 %v3349_v61, %v3347_v18  ;;  %v6867_v18 = vld [vmem:[%s11092_s5 + $0x90] sm:$0xf0]  ;;  %4199 = vmatpush.bf16.msrb.mxu0 %v6866_v44  ;;  %v6846_v45 = vor.u32 %v7583_v4, %v6843_v21 }
 0x5a8   : > { %3930 = vmatpush.bf16.msra.mxu2 %v6809_v19  ;;  %v6870_v61 = vor.u32 %v7589_v62, %v6867_v18  ;;  %v3711_v19 = vpop.f32.mrf.mxu1 }
 0x5a9   : > { %3513 = vmatmul.bf16.gmra.mxu2 %v3363_v52  ;;  %3689 = vmatmul.bf16.gmra.mxu0 %v3363_v52 }
 0x5aa   : > { %v9922_v22 = vpop.f32.mrf.mxu3  ;;  %3977 = vmatpush.bf16.msra.mxu3 %v6789_v9  ;;  %4243 = vmatpush.bf16.msrb.mxu1 %v6870_v61 }
 0x5ab   : > { %4200 = vmatpush.bf16.msrb.mxu0 %v6858_v60 }
 0x5ac   : > { %3931 = vmatpush.bf16.msra.mxu2 %v6801_v51 }
 0x5ae   : > { %3978 = vmatpush.bf16.msra.mxu3 %v6781_v48  ;;  %4244 = vmatpush.bf16.msrb.mxu1 %v6862_v23 }
 0x5b0   : > { %3932 = vmatpush.bf16.msra.mxu2 %v6793_v29  ;;  %v3714_v24 = vpop.f32.mrf.mxu1 }
 0x5b2   : > { %v9962_v11 = vpop.f32.mrf.mxu3 }
 0x5b4   : > { %3933 = vmatpush.bf16.msra.mxu2 %v6785_v43 }
 0x5b8   : > { %3934 = vmatpush.bf16.msra.mxu2 %v6777_v41  ;;  %v3716_v32 = vpop.f32.mrf.mxu1 }
 0x5ba   : > { %v3533_v58 = vpop.f32.mrf.mxu3 }
 0x5c0   : > { %v3719_v26 = vpop.f32.mrf.mxu1 }
 0x5c2   : > { %v3535_v6 = vpop.f32.mrf.mxu3 }
 0x5c6   : > { %v3660_v53 = vpop.f32.mrf.mxu0 }
 0x5c7   : > { %v3705_v49 = vadd.f32 %v9920_v25, %v3660_v53  ;;  %v7586_v25 = vld [vmem:[%s11092_s5 + $0x6c] sm:$0xf0] }
 0x5c8   : > { %v6850_v1 = vor.u32 %v7586_v25, %v6849_v2 }
 0x5ca   : > { %4201 = vmatpush.bf16.msrb.mxu0 %v6850_v1  ;;  %v3538_v9 = vpop.f32.mrf.mxu3 }
 0x5cc   : > { %v3484_v52 = vpop.f32.mrf.mxu2 }
 0x5cd   : > { %v3529_v40 = vadd.f32 %v9922_v22, %v3484_v52  ;;  %v7585_v22 = vld [vmem:[%s11092_s5 + $0x6c] sm:$0xf] }
 0x5ce   : > { %v3662_v63 = vpop.f32.mrf.mxu0  ;;  %v6854_v51 = vor.u32 %v7585_v22, %v6851_v39  ;;  %4202 = vmatpush.bf16.msrb.mxu0 %v6842_v55 }
 0x5cf   : > { %v3739_v5 = vmax.f32 %v3529_v40, %v3705_v49  ;;  %v3707_v33 = vadd.f32 %v9957_v54, %v3662_v63 }
 0x5d0   : > { %4245 = vmatpush.bf16.msrb.mxu1 %v6854_v51 }
 0x5d1   : > { %v3753_v56 = vpack.c.bf16 %v3739_v5, %v3739_v5 }
 0x5d2   : > { %v3540_v12 = vpop.f32.mrf.mxu3 }
 0x5d3   : > { %3768 = vst.msk [vmem:[#allocation2] sm:$0xf] %vm3767_vm8, %v3753_v56 }
 0x5d4   : > { %v3486_v20 = vpop.f32.mrf.mxu2  ;;  %4246 = vmatpush.bf16.msrb.mxu1 %v6846_v45 }
 0x5d5   : > { %v3531_v29 = vadd.f32 %v9962_v11, %v3486_v20 }
 0x5d6   : > { %v3665_v15 = vpop.f32.mrf.mxu0 }
 0x5d7   : > { %v3740_v36 = vmax.f32 %v3531_v29, %v3707_v33  ;;  %v3710_v57 = vadd.f32 %v3709_v27, %v3665_v15  ;;  %v3721_v33 = vpop.f32.mrf.mxu1 }
 0x5d9   : > { %v3754_v43 = vpack.c.bf16 %v3740_v36, %v3740_v36 }
 0x5da   : > { %v4311_v37 = vld [vmem:[#allocation2] sm:$0xe]  ;;  %v3543_v62 = vpop.f32.mrf.mxu3 }
 0x5db   : > { %3769 = vst.msk [vmem:[#allocation2 + $0x4] sm:$0xf] %vm3767_vm8, %v3754_v43  ;;  %v4325_v3 = vunpack.c.l.b16 %v4311_v37  ;;  %v4789_v46 = vld [vmem:[#allocation2] sm:$0xc] }
 0x5dc   : > { %v3489_v8 = vpop.f32.mrf.mxu2  ;;  %v4803_v52 = vunpack.c.l.b16 %v4789_v46 }
 0x5dd   : > { %v3534_v54 = vadd.f32 %v3533_v58, %v3489_v8 }
 0x5de   : > { %v3667_v35 = vpop.f32.mrf.mxu0 }
 0x5df   : > { %v3741_v11 = vmax.f32 %v3534_v54, %v3710_v57  ;;  %v3712_v48 = vadd.f32 %v3711_v19, %v3667_v35 }
 0x5e1   : > { %v3755_v0 = vpack.c.bf16 %v3741_v11, %v3741_v11  ;;  %v3724_v11 = vpop.f32.mrf.mxu1 }
 0x5e2   : > { %v7689_v47 = vld [vmem:[#allocation2] sm:$0xff]   ;;  %v3545_v21 = vpop.f32.mrf.mxu3 }
 0x5e3   : > { %3770 = vst.msk [vmem:[#allocation2 + $0x8] sm:$0xf] %vm3767_vm8, %v3755_v0  ;;  %6814 = vmatmul.msk.bf16.vlgmr.msra.gmra.mxu2 %vm3898_vm9, %v7689_v47  ;;  %6821 = vmatmul.msk.bf16.vlgmr.msra.gmra.mxu3 %vm3898_vm9, %v7689_v47  ;;  %v7691_v14 = vunpack.c.h.b16 %v7689_v47  ;;  %v4066_v53 = vshll.u32 %v7689_v47, 16  ;;  %v4064_v40 = vshrl.u32 %v7689_v47, 16 }
 0x5e4   : > { %v3491_v41 = vpop.f32.mrf.mxu2 }
 0x5e5   : > { %v3536_v17 = vadd.f32 %v3535_v6, %v3491_v41  ;;  %v4326_v27 = vpack.c.b16 %v7691_v14, %v4325_v3  ;;  %v4068_v10 = vrot.slane %v4066_v53, 1  ;;  %v4804_v28 = vpack.c.b16 %v7691_v14, %v4803_v52 }
 0x5e6   : > { %v3670_v50 = vpop.f32.mrf.mxu0 }
 0x5e7   : > { %v3742_v30 = vmax.f32 %v3536_v17, %v3712_v48  ;;  %v3715_v58 = vadd.f32 %v3714_v24, %v3670_v50  ;;  %v4555_v18 = vshrl.u32 %v4326_v27, 16  ;;  %v4558_v61 = vshll.u32 %v4326_v27, 16 }
 0x5e8   : > { %v4327_v60 = vrot.slane %v4326_v27, 1  ;;  %v4069_v56 = vor.u32 %v4068_v10, %v4064_v40  ;;  %v4805_v1 = vrot.slane %v4804_v28, 2 }
 0x5e9   : > { %v3756_v59 = vpack.c.bf16 %v3742_v30, %v3742_v30  ;;  %v4557_v13 = vrot.slane %v4555_v18, 1  ;;  %v4560_v63 = vrot.slane %v4558_v61, 2 }
 0x5ea   : > { %v3548_v47 = vpop.f32.mrf.mxu3 }
 0x5eb   : > { %3771 = vst.msk [vmem:[#allocation2 + $0xc] sm:$0xf] %vm3767_vm8, %v3756_v59  ;;  %v4561_v15 = vor.u32 %v4560_v63, %v4557_v13 }
 0x5ec   : > { %v3494_v31 = vpop.f32.mrf.mxu2 }
 0x5ed   : > { %v3539_v34 = vadd.f32 %v3538_v9, %v3494_v31 }
 0x5ee   : > { %v3672_v42 = vpop.f32.mrf.mxu0 }
 0x5ef   : > { %v3743_v44 = vmax.f32 %v3539_v34, %v3715_v58  ;;  %v3717_v25 = vadd.f32 %v3716_v32, %v3672_v42 }
 0x5f1   : > { %v3757_v38 = vpack.c.bf16 %v3743_v44, %v3743_v44 }
 0x5f2   : > { %v7568_v49 = vld [vmem:[#allocation2 + $0x8] sm:$0xff]  ;;  %v3550_v18 = vpop.f32.mrf.mxu3 }
 0x5f3   : > { %3772 = vst.msk [vmem:[#allocation2 + $0x10] sm:$0xf] %vm3767_vm8, %v3757_v38  ;;  %6815 = vmatmul.msk.bf16.gmra.mxu2 %vm3898_vm9, %v7568_v49  ;;  %6822 = vmatmul.msk.bf16.gmra.mxu3 %vm3898_vm9, %v7568_v49  ;;  %v4070_v5 = vshll.u32 %v7568_v49, 16  ;;  %v4074_v19 = vshrl.u32 %v7568_v49, 16  ;;  %v4328_v6 = vrot.slane %v7568_v49, 1  ;;  %v4806_v2 = vrot.slane %v7568_v49, 2 }
 0x5f4   : > { %v3496_v23 = vpop.f32.mrf.mxu2 }
 0x5f5   : > { %v3541_v22 = vadd.f32 %v3540_v12, %v3496_v23  ;;  %v4072_v51 = vrot.slane %v4070_v5, 1  ;;  %v4562_v20 = vrot.slane %v4074_v19, 1  ;;  %v10055_v7 = vsel %vm1476_vm1, %v4327_v60, %v4328_v6 }
 0x5f6   : > { %v3675_v39 = vpop.f32.mrf.mxu0  ;;  %v4563_v16 = vrot.slane %v4070_v5, 2  ;;  %v10058_v29 = vsel %vm2300_vm3, %v4805_v1, %v4806_v2 }
 0x5f7   : > { %v3744_v4 = vmax.f32 %v3541_v22, %v3717_v25  ;;  %v4073_v55 = vsel %vm989_vm0, %v4069_v56, %v4072_v51  ;;  %v3720_v9 = vadd.f32 %v3719_v26, %v3675_v39  ;;  %v4076_v14 = vor.u32 %v4074_v19, %v4072_v51 }
 0x5f8   : > { %v4564_v45 = vor.u32 %v4563_v16, %v4562_v20  ;;  %6879 = vmatmul.msk.bf16.vlgmr.msrb.gmra.mxu0 %vm3898_vm9, %v4073_v55  ;;  %6886 = vmatmul.msk.bf16.vlgmr.msrb.gmra.mxu1 %vm3898_vm9, %v4073_v55 }
 0x5f9   : > { %v3758_v36 = vpack.c.bf16 %v3744_v4, %v3744_v4 }
 0x5fa   : > { %v10064_v43 = vsel %vm1867_vm2, %v4561_v15, %v4564_v45  ;;  %v3553_v56 = vpop.f32.mrf.mxu3  ;;  %v6903_v15 = vld [vmem:[%s11092_s5 + $0x100] sm:$0x33] }
 0x5fb   : > { %3773 = vst.msk [vmem:[#allocation2 + $0x14] sm:$0xf] %vm3767_vm8, %v3758_v36  ;;  %v4371_v36 = vunpack.c.l.b16 %v6903_v15 }
 0x5fc   : > { %v3499_v24 = vpop.f32.mrf.mxu2 }
 0x5fd   : > { %v3544_v8 = vadd.f32 %v3543_v62, %v3499_v24  ;;  %v3726_v62 = vpop.f32.mrf.mxu1  ;;  %v4372_v24 = vunpack.c.h.b16 %v6903_v15 }
 0x5fe   : > { %v3677_v57 = vpop.f32.mrf.mxu0 }
 0x5ff   : > { %v3745_v54 = vmax.f32 %v3544_v8, %v3720_v9  ;;  %v3722_v37 = vadd.f32 %v3721_v33, %v3677_v57  ;;  %v6938_v57 = vld [vmem:[%s11092_s5 + $0xf0] sm:$0xf] }
 0x601   : > { %v3759_v35 = vpack.c.bf16 %v3745_v54, %v3745_v54 }
 0x602   : > { %v7569_v0 = vld [vmem:[#allocation2 + $0x10] sm:$0xff] }
 0x603   : > { %3774 = vst.msk [vmem:[#allocation2 + $0x18] sm:$0xf] %vm3767_vm8, %v3759_v35  ;;  %6816 = vmatmul.msk.bf16.gmra.mxu2 %vm3898_vm9, %v7569_v0  ;;  %6823 = vmatmul.msk.bf16.gmra.mxu3 %vm3898_vm9, %v7569_v0  ;;  %v4077_v41 = vshll.u32 %v7569_v0, 16  ;;  %v4081_v12 = vshrl.u32 %v7569_v0, 16  ;;  %v4330_v48 = vrot.slane %v7569_v0, 1  ;;  %v4808_v17 = vrot.slane %v7569_v0, 2 }
 0x604   : > { %v3501_v32 = vpop.f32.mrf.mxu2  ;;  %v4383_v35 = vpack.c.b16 %v4371_v36, %v4371_v36  ;;  %v7602_v0 = vld [vmem:[%s11092_s5 + $0xf4] sm:$0xf0]  ;;  %v6914_v36 = vld [vmem:[%s11092_s5 + $0xc0] sm:$0xf] }
 0x605   : > { %v3546_v50 = vadd.f32 %v3545_v21, %v3501_v32  ;;  %v4079_v3 = vrot.slane %v4077_v41, 1  ;;  %v10071_v59 = vsel %vm1476_vm1, %v4328_v6, %v4330_v48  ;;  %v4566_v27 = vrot.slane %v4081_v12, 1  ;;  %v3729_v6 = vpop.f32.mrf.mxu1  ;;  %v6940_v32 = vld [vmem:[%s11092_s5 + $0xf8] sm:$0xf0] }
 0x606   : > { %v3680_v30 = vpop.f32.mrf.mxu0  ;;  %v4567_v31 = vrot.slane %v4077_v41, 2  ;;  %v10074_v53 = vsel %vm2300_vm3, %v4806_v2, %v4808_v17 }
 0x607   : > { %v3746_v46 = vmax.f32 %v3546_v50, %v3722_v37  ;;  %v4080_v58 = vsel %vm989_vm0, %v4076_v14, %v4079_v3  ;;  %v3725_v61 = vadd.f32 %v3724_v11, %v3680_v30  ;;  %v4083_v2 = vor.u32 %v4081_v12, %v4079_v3 }
 0x608   : > { %v4568_v34 = vor.u32 %v4567_v31, %v4566_v27  ;;  %6880 = vmatmul.msk.bf16.gmra.mxu0 %vm3898_vm9, %v4080_v58  ;;  %6887 = vmatmul.msk.bf16.gmra.mxu1 %vm3898_vm9, %v4080_v58  ;;  %v4384_v11 = vpack.c.b16 %v4372_v24, %v4372_v24  ;;  %v6939_v14 = vor.u32 %v7602_v0, %v6938_v57  ;;  %v7596_v24 = vld [vmem:[%s11092_s5 + $0xc4] sm:$0xf0]  ;;  %v6968_v0 = vld [vmem:[%s11092_s5 + $0x158] sm:$0x33] }
 0x609   : > { %v3760_v26 = vpack.c.bf16 %v3746_v46, %v3746_v46 }
 0x60a   : > { %v10080_v42 = vsel %vm1867_vm2, %v4564_v45, %v4568_v34  ;;  %v4420_v37 = vsel %vm3920_vm7, %v4384_v11, 0  ;;  %v6906_v11 = vld [vmem:[%s11092_s5 + $0xb0] sm:$0xf] }
 0x60b   : > { %3775 = vst.msk [vmem:[#allocation2 + $0x1c] sm:$0xf] %vm3767_vm8, %v3760_v26  ;;  %4468 = vmatpush.bf16.msrb.mxu3 %v4420_v37 }
 0x60c   : > { %v3504_v44 = vpop.f32.mrf.mxu2 }
 0x60d   : > { %v3549_v52 = vadd.f32 %v3548_v47, %v3504_v44  ;;  %v7601_v47 = vld [vmem:[%s11092_s5 + $0xf4] sm:$0xf]  ;;  %v3731_v12 = vpop.f32.mrf.mxu1 }
 0x60e   : > { %v3682_v38 = vpop.f32.mrf.mxu0  ;;  %v6943_v30 = vor.u32 %v7601_v47, %v6940_v32  ;;  %v7594_v32 = vld [vmem:[%s11092_s5 + $0xb4] sm:$0xf0] }
 0x60f   : > { %v3747_v10 = vmax.f32 %v3549_v52, %v3725_v61  ;;  %v3727_v5 = vadd.f32 %v3726_v62, %v3682_v38  ;;  %v6930_v61 = vld [vmem:[%s11092_s5 + $0xe0] sm:$0xf]  ;;  %v7600_v52 = vld [vmem:[%s11092_s5 + $0xe4] sm:$0xf0] }
 0x610   : > { %4469 = vmatpush.bf16.msrb.mxu3 %v6943_v30 }
 0x611   : > { %v3761_v28 = vpack.c.bf16 %v3747_v10, %v3747_v10 }
 0x612   : > { %v10083_v49 = vld [vmem:[#allocation2 + $0x18] sm:$0xff] }
 0x613   : > { %3776 = vst.msk [vmem:[#allocation2 + $0x20] sm:$0xf] %vm3767_vm8, %v3761_v28  ;;  %6817 = vmatmul.msk.bf16.gmra.mxu2 %vm3898_vm9, %v10083_v49  ;;  %6824 = vmatmul.msk.bf16.gmra.mxu3 %vm3898_vm9, %v10083_v49  ;;  %v4084_v60 = vshll.u32 %v10083_v49, 16  ;;  %v4088_v13 = vshrl.u32 %v10083_v49, 16  ;;  %v4332_v63 = vrot.slane %v10083_v49, 1  ;;  %v4810_v23 = vrot.slane %v10083_v49, 2 }
 0x614   : > { %v3506_v40 = vpop.f32.mrf.mxu2 }
 0x615   : > { %v3551_v19 = vadd.f32 %v3550_v18, %v3506_v40  ;;  %v4086_v22 = vrot.slane %v4084_v60, 1  ;;  %v10095_v1 = vsel %vm1476_vm1, %v4330_v48, %v4332_v63  ;;  %v4570_v39 = vrot.slane %v4088_v13, 1  ;;  %v3555_v48 = vpop.f32.mrf.mxu3 }
 0x616   : > { %v3685_v25 = vpop.f32.mrf.mxu0  ;;  %v4571_v51 = vrot.slane %v4084_v60, 2  ;;  %v10100_v16 = vsel %vm2300_vm3, %v4808_v17, %v4810_v23  ;;  %v4417_v17 = vsel %vm3920_vm7, %v4383_v35, 0  ;;  %v6931_v60 = vor.u32 %v7600_v52, %v6930_v61 }
 0x617   : > { %v3748_v20 = vmax.f32 %v3551_v19, %v3727_v5  ;;  %v4087_v4 = vsel %vm989_vm0, %v4083_v2, %v4086_v22  ;;  %v3730_v9 = vadd.f32 %v3729_v6, %v3685_v25  ;;  %4424 = vmatpush.bf16.msrb.mxu2 %v4417_v17  ;;  %v4090_v44 = vor.u32 %v4088_v13, %v4086_v22  ;;  %v7599_v13 = vld [vmem:[%s11092_s5 + $0xe4] sm:$0xf]  ;;  %v3734_v25 = vpop.f32.mrf.mxu1 }
 0x618   : > { %v10103_v33 = vor.u32 %v4571_v51, %v4570_v39  ;;  %6881 = vmatmul.msk.bf16.gmra.mxu0 %vm3898_vm9, %v4087_v4  ;;  %6888 = vmatmul.msk.bf16.gmra.mxu1 %vm3898_vm9, %v4087_v4  ;;  %v7598_v39 = vld [vmem:[%s11092_s5 + $0xd4] sm:$0xf0]  ;;  %v7597_v51 = vld [vmem:[%s11092_s5 + $0xd4] sm:$0xf]  ;;  %v6924_v4 = vld [vmem:[%s11092_s5 + $0xd8] sm:$0xf0]  ;;  %v4623_v17 = vunpack.c.h.b16 %v6968_v0 }
 0x619   : > { %v3762_v55 = vpack.c.bf16 %v3748_v20, %v3748_v20 }
 0x61a   : > { %v10109_v21 = vsel %vm1867_vm2, %v4568_v34, %v10103_v33 }
 0x61b   : > { %3777 = vst.msk [vmem:[#allocation2 + $0x24] sm:$0xf] %vm3767_vm8, %v3762_v55  ;;  %4425 = vmatpush.bf16.msrb.mxu2 %v6939_v14 }
 0x61c   : > { %v3509_v45 = vpop.f32.mrf.mxu2 }
 0x61d   : > { %v3554_v8 = vadd.f32 %v3553_v56, %v3509_v45  ;;  %v3558_v22 = vpop.f32.mrf.mxu3  ;;  %v6922_v56 = vld [vmem:[%s11092_s5 + $0xd0] sm:$0xf]  ;;  %v6927_v45 = vor.u32 %v7597_v51, %v6924_v4  ;;  %v7005_v4 = vld [vmem:[%s11092_s5 + $0x150] sm:$0xf0] }
 0x61e   : > { %v3687_v54 = vpop.f32.mrf.mxu0  ;;  %v6923_v20 = vor.u32 %v7598_v39, %v6922_v56  ;;  %v7611_v39 = vld [vmem:[%s11092_s5 + $0x14c] sm:$0xf] }
 0x61f   : > { %v3749_v41 = vmax.f32 %v3554_v8, %v3730_v9  ;;  %v3732_v26 = vadd.f32 %v3731_v12, %v3687_v54  ;;  %4426 = vmatpush.bf16.msrb.mxu2 %v6931_v60  ;;  %v7595_v9 = vld [vmem:[%s11092_s5 + $0xc4] sm:$0xf]  ;;  %v6915_v54 = vor.u32 %v7596_v24, %v6914_v36  ;;  %v6908_v12 = vld [vmem:[%s11092_s5 + $0xb8] sm:$0xf0]  ;;  %v7008_v36 = vor.u32 %v7611_v39, %v7005_v4  ;;  %v7610_v24 = vld [vmem:[%s11092_s5 + $0x13c] sm:$0xf0] }
 0x621   : > { %v3763_v50 = vpack.c.bf16 %v3749_v41, %v3749_v41  ;;  %v7593_v41 = vld [vmem:[%s11092_s5 + $0xb4] sm:$0xf] }
 0x622   : > { %v10129_v3 = vld [vmem:[#allocation2 + $0x20] sm:$0xff] }
 0x623   : > { %3778 = vst.msk [vmem:[#allocation2 + $0x28] sm:$0xf] %vm3767_vm8, %v3763_v50  ;;  %6818 = vmatmul.msk.bf16.gmra.mxu2 %vm3898_vm9, %v10129_v3  ;;  %6825 = vmatmul.msk.bf16.gmra.mxu3 %vm3898_vm9, %v10129_v3  ;;  %v4091_v31 = vshll.u32 %v10129_v3, 16  ;;  %v4095_v46 = vshrl.u32 %v10129_v3, 16  ;;  %v4334_v58 = vrot.slane %v10129_v3, 1  ;;  %v4812_v34 = vrot.slane %v10129_v3, 2 }
 0x624   : > { %v3511_v27 = vpop.f32.mrf.mxu2  ;;  %4427 = vmatpush.bf16.msrb.mxu2 %v6923_v20 }
 0x625   : > { %v3556_v62 = vadd.f32 %v3555_v48, %v3511_v27  ;;  %v10140_v18 = vrot.slane %v4091_v31, 1  ;;  %v10151_v38 = vsel %vm1476_vm1, %v4332_v63, %v4334_v58  ;;  %v4574_v10 = vrot.slane %v4095_v46, 1  ;;  %v6932_v63 = vld [vmem:[%s11092_s5 + $0xe8] sm:$0xf0]  ;;  %v3560_v52 = vpop.f32.mrf.mxu3 }
 0x626   : > { %v10160_v28 = vsel %vm2300_vm3, %v4810_v23, %v4812_v34  ;;  %v4575_v5 = vrot.slane %v4091_v31, 2  ;;  %v3690_v19 = vpop.f32.mrf.mxu0  ;;  %v6935_v2 = vor.u32 %v7599_v13, %v6932_v63  ;;  %v4622_v48 = vunpack.c.l.b16 %v6968_v0 }
 0x627   : > { %v3750_v40 = vmax.f32 %v3556_v62, %v3732_v26  ;;  %v4094_v6 = vsel %vm989_vm0, %v4090_v44, %v10140_v18  ;;  %v3735_v8 = vadd.f32 %v3734_v25, %v3690_v19  ;;  %v6907_v27 = vor.u32 %v7594_v32, %v6906_v11  ;;  %v3736_v62 = vpop.f32.mrf.mxu1  ;;  %v6989_v11 = vld [vmem:[%s11092_s5 + $0x130] sm:$0xf0]  ;;  %v6979_v32 = vld [vmem:[%s11092_s5 + $0x118] sm:$0xf] }
 0x628   : > { %6882 = vmatmul.msk.bf16.gmra.mxu0 %vm3898_vm9, %v4094_v6  ;;  %6889 = vmatmul.msk.bf16.gmra.mxu1 %vm3898_vm9, %v4094_v6  ;;  %v10172_v23 = vor.u32 %v4575_v5, %v4574_v10  ;;  %v4634_v50 = vpack.c.b16 %v4622_v48, %v4622_v48  ;;  %v6911_v31 = vor.u32 %v7593_v41, %v6908_v12  ;;  %v7606_v41 = vld [vmem:[%s11092_s5 + $0x11c] sm:$0xf0]  ;;  %v7605_v48 = vld [vmem:[%s11092_s5 + $0x11c] sm:$0xf] }
 0x629   : > { %v3764_v49 = vpack.c.bf16 %v3750_v40, %v3750_v40  ;;  %4470 = vmatpush.bf16.msrb.mxu3 %v6935_v2  ;;  %4428 = vmatpush.bf16.msrb.mxu2 %v6915_v54  ;;  %v4635_v26 = vpack.c.b16 %v4623_v17, %v4623_v17  ;;  %v4097_v19 = vor.u32 %v4095_v46, %v10140_v18  ;;  %v7003_v46 = vld [vmem:[%s11092_s5 + $0x148] sm:$0xf]  ;;  %v7612_v18 = vld [vmem:[%s11092_s5 + $0x14c] sm:$0xf0]  ;;  %v6981_v17 = vld [vmem:[%s11092_s5 + $0x120] sm:$0xf0] }
 0x62a   : > { %v10190_v55 = vsel %vm1867_vm2, %v10103_v33, %v10172_v23  ;;  %v6916_v33 = vld [vmem:[%s11092_s5 + $0xc8] sm:$0xf0]  ;;  %v4668_v44 = vsel %vm3920_vm7, %v4634_v50, 0  ;;  %v7004_v20 = vor.u32 %v7612_v18, %v7003_v46  ;;  %v7608_v54 = vld [vmem:[%s11092_s5 + $0x12c] sm:$0xf0] }
 0x62b   : > { %3779 = vst.msk [vmem:[#allocation2 + $0x2c] sm:$0xf] %vm3767_vm8, %v3764_v49  ;;  %v6919_v35 = vor.u32 %v7595_v9, %v6916_v33  ;;  %v4671_v60 = vsel %vm3920_vm7, %v4635_v26, 0  ;;  %4675 = vmatpush.bf16.msra.mxu0 %v4668_v44  ;;  %v6973_v46 = vld [vmem:[%s11092_s5 + $0x110] sm:$0xf0] }
 0x62c   : > { %v3514_v15 = vpop.f32.mrf.mxu2  ;;  %4719 = vmatpush.bf16.msra.mxu1 %v4671_v60 }
 0x62d   : > { %v3559_v57 = vadd.f32 %v3558_v22, %v3514_v15  ;;  %4471 = vmatpush.bf16.msrb.mxu3 %v6927_v45  ;;  %4429 = vmatpush.bf16.msrb.mxu2 %v6907_v27 }
 0x62e   : > { %v3692_v14 = vpop.f32.mrf.mxu0 }
 0x62f   : > { %v3751_v47 = vmax.f32 %v3559_v57, %v3735_v8  ;;  %v3737_v63 = vadd.f32 %v3736_v62, %v3692_v14  ;;  %4676 = vmatpush.bf16.msra.mxu0 %v7004_v20  ;;  %v7609_v8 = vld [vmem:[%s11092_s5 + $0x13c] sm:$0xf]  ;;  %v6987_v57 = vld [vmem:[%s11092_s5 + $0x128] sm:$0xf]  ;;  %v6980_v14 = vor.u32 %v7606_v41, %v6979_v32 }
 0x630   : > { %4720 = vmatpush.bf16.msra.mxu1 %v7008_v36  ;;  %v6988_v0 = vor.u32 %v7608_v54, %v6987_v57 }
 0x631   : > { %v3765_v37 = vpack.c.bf16 %v3751_v47, %v3751_v47  ;;  %4472 = vmatpush.bf16.msrb.mxu3 %v6919_v35  ;;  %v7607_v35 = vld [vmem:[%s11092_s5 + $0x12c] sm:$0xf] }
 0x632   : > { %v10219_v30 = vld [vmem:[#allocation2 + $0x28] sm:$0xff]  ;;  %v6992_v47 = vor.u32 %v7607_v35, %v6989_v11 }
 0x633   : > { %3780 = vst.msk [vmem:[#allocation2 + $0x30] sm:$0xf] %vm3767_vm8, %v3765_v37  ;;  %6819 = vmatmul.msk.bf16.gmra.mxu2 %vm3898_vm9, %v10219_v30  ;;  %6826 = vmatmul.msk.bf16.gmra.mxu3 %vm3898_vm9, %v10219_v30  ;;  %v4098_v10 = vshll.u32 %v10219_v30, 16  ;;  %v4102_v40 = vshrl.u32 %v10219_v30, 16  ;;  %v4336_v13 = vrot.slane %v10219_v30, 1  ;;  %v4814_v6 = vrot.slane %v10219_v30, 2 }
 0x634   : > { %v3516_v61 = vpop.f32.mrf.mxu2 }
 0x635   : > { %v3561_v5 = vadd.f32 %v3560_v52, %v3516_v61  ;;  %v4100_v2 = vrot.slane %v4098_v10, 1  ;;  %4473 = vmatpush.bf16.msrb.mxu3 %v6911_v31  ;;  %v10240_v49 = vsel %vm1476_vm1, %v4334_v58, %v4336_v13  ;;  %v4578_v25 = vrot.slane %v4102_v40, 1 }
 0x636   : > { %v4579_v22 = vrot.slane %v4098_v10, 2  ;;  %v10258_v58 = vsel %vm2300_vm3, %v4812_v34, %v4814_v6  ;;  %v6995_v34 = vld [vmem:[%s11092_s5 + $0x138] sm:$0xf]  ;;  %v6984_v61 = vor.u32 %v7605_v48, %v6981_v17 }
 0x637   : > { %v3752_v56 = vmax.f32 %v3561_v5, %v3737_v63  ;;  %v4101_v51 = vsel %vm989_vm0, %v4097_v19, %v4100_v2  ;;  %v6996_v9 = vor.u32 %v7610_v24, %v6995_v34  ;;  %v6971_v5 = vld [vmem:[%s11092_s5 + $0x108] sm:$0xf]  ;;  %v7604_v19 = vld [vmem:[%s11092_s5 + $0x10c] sm:$0xf0] }
 0x638   : > { %v10264_v15 = vor.u32 %v4579_v22, %v4578_v25  ;;  %6883 = vmatmul.msk.bf16.gmra.mxu0 %vm3898_vm9, %v4101_v51  ;;  %6890 = vmatmul.msk.bf16.gmra.mxu1 %vm3898_vm9, %v4101_v51  ;;  %v4104_v25 = vor.u32 %v4102_v40, %v4100_v2  ;;  %v6972_v22 = vor.u32 %v7604_v19, %v6971_v5 }
 0x639   : > { %v3766_v45 = vpack.c.bf16 %v3752_v56, %v3752_v56  ;;  %4677 = vmatpush.bf16.msra.mxu0 %v6996_v9  ;;  %v7603_v56 = vld [vmem:[%s11092_s5 + $0x10c] sm:$0xf] }
 0x63a   : > { %v10271_v3 = vsel %vm1867_vm2, %v10172_v23, %v10264_v15  ;;  %v6997_v23 = vld [vmem:[%s11092_s5 + $0x140] sm:$0xf0]  ;;  %v3795_v12 = vld [vmem:[#allocation2 + $0x30] sm:$0xf]  ;;  %v6976_v20 = vor.u32 %v7603_v56, %v6973_v46 }
 0x63b   : > { %3781 = vst.msk [vmem:[#allocation2 + $0x34] sm:$0xf] %vm3767_vm8, %v3766_v45  ;;  %v7000_v33 = vor.u32 %v7609_v8, %v6997_v23  ;;  %v3834_v31 = vunpack.c.l.b16 %v3795_v12 }
 0x63d   : > { %4721 = vmatpush.bf16.msra.mxu1 %v7000_v33  ;;  %4678 = vmatpush.bf16.msra.mxu0 %v6988_v0 }
 0x641   : > { %4722 = vmatpush.bf16.msra.mxu1 %v6992_v47  ;;  %4679 = vmatpush.bf16.msra.mxu0 %v6980_v14 }
 0x642   : > { %v3796_v37 = vld [vmem:[#allocation2 + $0x34] sm:$0x3] }
 0x643   : > { %v4048_v50 = vld [vmem:[#allocation2 + $0x34] sm:$0x7]  ;;  %v3835_v26 = vunpack.c.l.b16 %v3796_v37 }
 0x644   : > { %v4538_v27 = vld [vmem:[#allocation2 + $0x34] sm:$0xf]  ;;  %v4062_v62 = vunpack.c.l.b16 %v4048_v50 }
 0x645   : > { %v4552_v44 = vunpack.c.l.b16 %v4538_v27  ;;  %v3842_v52 = vpack.c.b16 %v3835_v26, %v3834_v31  ;;  %4723 = vmatpush.bf16.msra.mxu1 %v6984_v61  ;;  %4680 = vmatpush.bf16.msra.mxu0 %v6972_v22 }
 0x646   : > { %v4063_v10 = vpack.c.b16 %v4062_v62, %v3834_v31 }
 0x647   : > { %v4553_v60 = vpack.c.b16 %v4552_v44, %v3834_v31  ;;  %6820 = vmatmul.msk.bf16.gmra.mxu2 %vm3898_vm9, %v3842_v52  ;;  %6827 = vmatmul.msk.bf16.gmra.mxu3 %vm3898_vm9, %v3842_v52 }
 0x648   : > { %v4106_v63 = vshll.u32 %v4063_v10, 16  ;;  %v10326_v18 = vrot.slane %v4063_v10, 1  ;;  %v4110_v30 = vshrl.u32 %v4063_v10, 16 }
 0x649   : > { %v4583_v39 = vshrl.u32 %v4553_v60, 16  ;;  %v4586_v4 = vshll.u32 %v4553_v60, 16  ;;  %v10328_v45 = vrot.slane %v4553_v60, 2  ;;  %4724 = vmatpush.bf16.msra.mxu1 %v6976_v20  ;;  %v7033_v60 = vld [vmem:[%s11092_s5 + $0x1b0] sm:$0x33] }
 0x64a   : > { %v4108_v51 = vrot.slane %v4106_v63, 1  ;;  %v10334_v40 = vsel %vm1476_vm1, %v4336_v13, %v10326_v18  ;;  %v4849_v63 = vunpack.c.l.b16 %v7033_v60  ;;  %v4850_v5 = vunpack.c.h.b16 %v7033_v60 }
 0x64b   : > { %v4585_v2 = vrot.slane %v4583_v39, 1  ;;  %v4588_v34 = vrot.slane %v4586_v4, 2  ;;  %v10341_v24 = vsel %vm2300_vm3, %v4814_v6, %v10328_v45 }
 0x64c   : > { %v4109_v36 = vsel %vm989_vm0, %v4104_v25, %v4108_v51  ;;  %v4112_v6 = vor.u32 %v4110_v30, %v4108_v51  ;;  %v4861_v56 = vpack.c.b16 %v4849_v63, %v4849_v63  ;;  %v4862_v46 = vpack.c.b16 %v4850_v5, %v4850_v5  ;;  %v7616_v5 = vld [vmem:[%s11092_s5 + $0x174] sm:$0xf0] }
 0x64d   : > { %6884 = vmatmul.msk.bf16.gmra.mxu0 %vm3898_vm9, %v4109_v36  ;;  %6891 = vmatmul.msk.bf16.gmra.mxu1 %vm3898_vm9, %v4109_v36  ;;  %v10345_v9 = vor.u32 %v4588_v34, %v4585_v2  ;;  %v7068_v36 = vld [vmem:[%s11092_s5 + $0x1a0] sm:$0xf]  ;;  %v7622_v34 = vld [vmem:[%s11092_s5 + $0x1a4] sm:$0xf0] }
 0x64e   : > { %v4898_v2 = vsel %vm3920_vm7, %v4862_v46, 0  ;;  %v7069_v30 = vor.u32 %v7622_v34, %v7068_v36 }
 0x64f   : > { %v10350_v13 = vsel %vm1867_vm2, %v10264_v15, %v10345_v9  ;;  %4946 = vmatpush.bf16.msra.mxu3 %v4898_v2  ;;  %v7038_v2 = vld [vmem:[%s11092_s5 + $0x168] sm:$0xf0] }
 0x657   : > { %6944 = vmatmul.msk.bf16.vlgmr.msrb.gmra.mxu2 %vm3898_vm9, %v10055_v7  ;;  %6951 = vmatmul.msk.bf16.vlgmr.msrb.gmra.mxu3 %vm3898_vm9, %v10055_v7  ;;  %v3782_v7 = vld [vmem:[%s11093_s6] sm:$0x3] }
 0x658   : > { %v10369_v33 = vperm.slane %v3782_v7, 0  ;;  %v10371_v54 = vperm.slane %v3782_v7, 1 }
 0x65d   : > { %6885 = vmatmul.msk.bf16.gmra.mxu0 %vm3898_vm9, %v4112_v6  ;;  %6892 = vmatmul.msk.bf16.gmra.mxu1 %vm3898_vm9, %v4112_v6  ;;  %v7621_v6 = vld [vmem:[%s11092_s5 + $0x1a4] sm:$0xf] }
 0x666   : > { %v3936_v8 = vpop.f32.mrf.mxu2  ;;  %v3980_v23 = vpop.f32.mrf.mxu3 }
 0x667   : > { %6945 = vmatmul.msk.bf16.gmra.mxu2 %vm3898_vm9, %v10071_v59  ;;  %6952 = vmatmul.msk.bf16.gmra.mxu3 %vm3898_vm9, %v10071_v59  ;;  %v4020_v35 = vadd.f32 %v10369_v33, %v3936_v8  ;;  %v4021_v59 = vadd.f32 %v10371_v54, %v3980_v23  ;;  %v7070_v8 = vld [vmem:[%s11092_s5 + $0x1a8] sm:$0xf0] }
 0x668   : > { %v7073_v23 = vor.u32 %v7621_v6, %v7070_v8 }
 0x66a   : > { %4947 = vmatpush.bf16.msra.mxu3 %v7073_v23 }
 0x66d   : > { %7009 = vmatmul.msk.bf16.vlgmr.msra.gmra.mxu0 %vm3898_vm9, %v10064_v43  ;;  %7016 = vmatmul.msk.bf16.vlgmr.msra.gmra.mxu1 %vm3898_vm9, %v10064_v43 }
 0x66e   : > { %v3938_v15 = vpop.f32.mrf.mxu2  ;;  %v3982_v57 = vpop.f32.mrf.mxu3 }
 0x66f   : > { %v4022_v12 = vadd.f32 %v10369_v33, %v3938_v15  ;;  %v4023_v48 = vadd.f32 %v10371_v54, %v3982_v57 }
 0x675   : > { %v4204_v11 = vpop.f32.mrf.mxu0  ;;  %v4248_v0 = vpop.f32.mrf.mxu1 }
 0x676   : > { %v10375_v47 = vadd.f32 %v4204_v11, %v4020_v35  ;;  %v10377_v32 = vadd.f32 %v4248_v0, %v4021_v59  ;;  %v3941_v43 = vpop.f32.mrf.mxu2  ;;  %v3985_v41 = vpop.f32.mrf.mxu3  ;;  %v7060_v59 = vld [vmem:[%s11092_s5 + $0x190] sm:$0xf]  ;;  %v7620_v11 = vld [vmem:[%s11092_s5 + $0x194] sm:$0xf0]  ;;  %v7619_v0 = vld [vmem:[%s11092_s5 + $0x194] sm:$0xf] }
 0x677   : > { %6946 = vmatmul.msk.bf16.gmra.mxu2 %vm3898_vm9, %v10095_v1  ;;  %6953 = vmatmul.msk.bf16.gmra.mxu3 %vm3898_vm9, %v10095_v1  ;;  %v4024_v31 = vadd.f32 %v10369_v33, %v3941_v43  ;;  %v4025_v26 = vadd.f32 %v10371_v54, %v3985_v41 }
 0x67d   : > { %7010 = vmatmul.msk.bf16.gmra.mxu0 %vm3898_vm9, %v10080_v42  ;;  %7017 = vmatmul.msk.bf16.gmra.mxu1 %vm3898_vm9, %v10080_v42  ;;  %v4206_v17 = vpop.f32.mrf.mxu0  ;;  %v4250_v37 = vpop.f32.mrf.mxu1 }
 0x67e   : > { %v10389_v50 = vadd.f32 %v4206_v17, %v4022_v12  ;;  %v10391_v14 = vadd.f32 %v4250_v37, %v4023_v48  ;;  %v3943_v27 = vpop.f32.mrf.mxu2  ;;  %v3987_v1 = vpop.f32.mrf.mxu3  ;;  %v7061_v17 = vor.u32 %v7620_v11, %v7060_v59  ;;  %v7062_v37 = vld [vmem:[%s11092_s5 + $0x198] sm:$0xf0] }
 0x67f   : > { %v4026_v19 = vadd.f32 %v10369_v33, %v3943_v27  ;;  %v4027_v25 = vadd.f32 %v10371_v54, %v3987_v1  ;;  %v7065_v27 = vor.u32 %v7619_v0, %v7062_v37  ;;  %v7052_v1 = vld [vmem:[%s11092_s5 + $0x180] sm:$0xf] }
 0x681   : > { %4948 = vmatpush.bf16.msra.mxu3 %v7065_v27 }
 0x685   : > { %v4209_v62 = vpop.f32.mrf.mxu0  ;;  %v4253_v44 = vpop.f32.mrf.mxu1 }
 0x686   : > { %v10395_v61 = vadd.f32 %v4209_v62, %v4024_v31  ;;  %v10397_v42 = vadd.f32 %v4253_v44, %v4025_v26  ;;  %v3946_v52 = vpop.f32.mrf.mxu2  ;;  %v3990_v10 = vpop.f32.mrf.mxu3  ;;  %v7618_v31 = vld [vmem:[%s11092_s5 + $0x184] sm:$0xf0]  ;;  %v7054_v62 = vld [vmem:[%s11092_s5 + $0x188] sm:$0xf0] }
 0x687   : > { %6947 = vmatmul.msk.bf16.gmra.mxu2 %vm3898_vm9, %v10151_v38  ;;  %6954 = vmatmul.msk.bf16.gmra.mxu3 %vm3898_vm9, %v10151_v38  ;;  %v4028_v7 = vadd.f32 %v10369_v33, %v3946_v52  ;;  %v4029_v15 = vadd.f32 %v10371_v54, %v3990_v10  ;;  %v7053_v26 = vor.u32 %v7618_v31, %v7052_v1 }
 0x68d   : > { %7011 = vmatmul.msk.bf16.gmra.mxu0 %vm3898_vm9, %v10109_v21  ;;  %7018 = vmatmul.msk.bf16.gmra.mxu1 %vm3898_vm9, %v10109_v21  ;;  %v4211_v22 = vpop.f32.mrf.mxu0  ;;  %v4255_v38 = vpop.f32.mrf.mxu1  ;;  %v4895_v21 = vsel %vm3920_vm7, %v4861_v56, 0  ;;  %v7614_v56 = vld [vmem:[%s11092_s5 + $0x164] sm:$0xf0] }
 0x68e   : > { %v10412_v39 = vadd.f32 %v4211_v22, %v4026_v19  ;;  %v10414_v51 = vadd.f32 %v4255_v38, %v4027_v25  ;;  %v10416_v20 = vpop.f32.mrf.mxu2  ;;  %v10418_v4 = vpop.f32.mrf.mxu3  ;;  %4902 = vmatpush.bf16.msra.mxu2 %v4895_v21  ;;  %v7615_v19 = vld [vmem:[%s11092_s5 + $0x174] sm:$0xf]  ;;  %v7046_v22 = vld [vmem:[%s11092_s5 + $0x178] sm:$0xf0]  ;;  %v7036_v38 = vld [vmem:[%s11092_s5 + $0x160] sm:$0xf] }
 0x68f   : > { %v7049_v46 = vor.u32 %v7615_v19, %v7046_v22  ;;  %v7613_v21 = vld [vmem:[%s11092_s5 + $0x164] sm:$0xf]  ;;  %v7037_v36 = vor.u32 %v7614_v56, %v7036_v38 }
 0x690   : > { %v7041_v34 = vor.u32 %v7613_v21, %v7038_v2 }
 0x692   : > { %4903 = vmatpush.bf16.msra.mxu2 %v7069_v30 }
 0x695   : > { %v4214_v57 = vpop.f32.mrf.mxu0  ;;  %v4258_v35 = vpop.f32.mrf.mxu1 }
 0x696   : > { %v10445_v43 = vadd.f32 %v4214_v57, %v4028_v7  ;;  %v10447_v41 = vadd.f32 %v4258_v35, %v4029_v15  ;;  %v3951_v12 = vpop.f32.mrf.mxu2  ;;  %v3995_v48 = vpop.f32.mrf.mxu3  ;;  %4904 = vmatpush.bf16.msra.mxu2 %v7061_v17 }
 0x697   : > { %6948 = vmatmul.msk.bf16.gmra.mxu2 %vm3898_vm9, %v10240_v49  ;;  %6955 = vmatmul.msk.bf16.gmra.mxu3 %vm3898_vm9, %v10240_v49  ;;  %v7617_v49 = vld [vmem:[%s11092_s5 + $0x184] sm:$0xf]  ;;  %v4032_v30 = vadd.f32 %v10369_v33, %v3951_v12  ;;  %v4033_v6 = vadd.f32 %v10371_v54, %v3995_v48 }
 0x698   : > { %v7057_v44 = vor.u32 %v7617_v49, %v7054_v62 }
 0x69a   : > { %4905 = vmatpush.bf16.msra.mxu2 %v7053_v26  ;;  %4949 = vmatpush.bf16.msra.mxu3 %v7057_v44 }
 0x69d   : > { %7012 = vmatmul.msk.bf16.gmra.mxu0 %vm3898_vm9, %v10190_v55  ;;  %7019 = vmatmul.msk.bf16.gmra.mxu1 %vm3898_vm9, %v10190_v55  ;;  %v10472_v52 = vpop.f32.mrf.mxu0  ;;  %v10474_v10 = vpop.f32.mrf.mxu1  ;;  %v7044_v55 = vld [vmem:[%s11092_s5 + $0x170] sm:$0xf] }
 0x69e   : > { %v10476_v60 = vpop.f32.mrf.mxu2  ;;  %v10478_v63 = vpop.f32.mrf.mxu3  ;;  %v7045_v25 = vor.u32 %v7616_v5, %v7044_v55  ;;  %4950 = vmatpush.bf16.msra.mxu3 %v7049_v46 }
 0x6a0   : > { %4906 = vmatpush.bf16.msra.mxu2 %v7045_v25 }
 0x6a2   : > { %4951 = vmatpush.bf16.msra.mxu3 %v7041_v34 }
 0x6a4   : > { %4907 = vmatpush.bf16.msra.mxu2 %v7037_v36 }
 0x6a5   : > { %v4219_v8 = vpop.f32.mrf.mxu0  ;;  %v4263_v23 = vpop.f32.mrf.mxu1 }
 0x6a6   : > { %v10506_v7 = vadd.f32 %v4219_v8, %v4032_v30  ;;  %v10508_v15 = vadd.f32 %v4263_v23, %v4033_v6  ;;  %v3956_v57 = vpop.f32.mrf.mxu2  ;;  %v4000_v35 = vpop.f32.mrf.mxu3 }
 0x6a7   : > { %6949 = vmatmul.msk.bf16.gmra.mxu2 %vm3898_vm9, %v10334_v40  ;;  %6956 = vmatmul.msk.bf16.gmra.mxu3 %vm3898_vm9, %v10334_v40  ;;  %v4036_v48 = vadd.f32 %v10369_v33, %v3956_v57  ;;  %v4037_v40 = vadd.f32 %v10371_v54, %v4000_v35 }
 0x6ad   : > { %7013 = vmatmul.msk.bf16.gmra.mxu0 %vm3898_vm9, %v10271_v3  ;;  %7020 = vmatmul.msk.bf16.gmra.mxu1 %vm3898_vm9, %v10271_v3  ;;  %v10518_v59 = vpop.f32.mrf.mxu0  ;;  %v10520_v11 = vpop.f32.mrf.mxu1 }
 0x6ae   : > { %v10522_v0 = vpop.f32.mrf.mxu2  ;;  %v10524_v12 = vpop.f32.mrf.mxu3 }
 0x6b5   : > { %v4224_v17 = vpop.f32.mrf.mxu0  ;;  %v4268_v37 = vpop.f32.mrf.mxu1 }
 0x6b6   : > { %v10528_v27 = vadd.f32 %v4224_v17, %v4036_v48  ;;  %v10530_v1 = vadd.f32 %v4268_v37, %v4037_v40  ;;  %v3961_v3 = vpop.f32.mrf.mxu2  ;;  %v4005_v31 = vpop.f32.mrf.mxu3 }
 0x6b7   : > { %6950 = vmatmul.msk.bf16.gmra.mxu2 %vm3898_vm9, %v10326_v18  ;;  %6957 = vmatmul.msk.bf16.gmra.mxu3 %vm3898_vm9, %v10326_v18  ;;  %v4040_v18 = vadd.f32 %v10369_v33, %v3961_v3  ;;  %v4041_v55 = vadd.f32 %v10371_v54, %v4005_v31 }
 0x6bd   : > { %7014 = vmatmul.msk.bf16.gmra.mxu0 %vm3898_vm9, %v10350_v13  ;;  %7021 = vmatmul.msk.bf16.gmra.mxu1 %vm3898_vm9, %v10350_v13  ;;  %v10540_v49 = vpop.f32.mrf.mxu0  ;;  %v10542_v26 = vpop.f32.mrf.mxu1 }
 0x6be   : > { %v10544_v62 = vpop.f32.mrf.mxu2  ;;  %v10546_v44 = vpop.f32.mrf.mxu3 }
 0x6c7   : > { %7074 = vmatmul.msk.bf16.vlgmr.msra.gmra.mxu2 %vm3898_vm9, %v10058_v29  ;;  %7081 = vmatmul.msk.bf16.vlgmr.msra.gmra.mxu3 %vm3898_vm9, %v10058_v29 }
 0x6ca   : > { %v4229_v5 = vpop.f32.mrf.mxu0  ;;  %v4273_v13 = vpop.f32.mrf.mxu1 }
 0x6cb   : > { %v10554_v19 = vadd.f32 %v4229_v5, %v4040_v18  ;;  %v10556_v25 = vadd.f32 %v4273_v13, %v4041_v55  ;;  %v3966_v22 = vpop.f32.mrf.mxu2  ;;  %v4010_v38 = vpop.f32.mrf.mxu3 }
 0x6cc   : > { %v4044_v2 = vadd.f32 %v10369_v33, %v3966_v22  ;;  %v4045_v36 = vadd.f32 %v10371_v54, %v4010_v38 }
 0x6cd   : > { %7015 = vmatmul.msk.bf16.gmra.mxu0 %vm3898_vm9, %v10345_v9  ;;  %7022 = vmatmul.msk.bf16.gmra.mxu1 %vm3898_vm9, %v10345_v9 }
 0x6d2   : > { %v10562_v56 = vpop.f32.mrf.mxu0  ;;  %v10564_v29 = vpop.f32.mrf.mxu1 }
 0x6d3   : > { %v10566_v46 = vpop.f32.mrf.mxu2  ;;  %v10568_v21 = vpop.f32.mrf.mxu3 }
 0x6d4   : > { %11328 = vst [vmem:[#allocation40_spill] sm:$0xff] %v10566_v46 }
 0x6d5   : > { %11329 = vst [vmem:[#allocation38_spill] sm:$0xff] %v10568_v21 }
 0x6d7   : > { %7075 = vmatmul.msk.bf16.gmra.mxu2 %vm3898_vm9, %v10074_v53  ;;  %7082 = vmatmul.msk.bf16.gmra.mxu3 %vm3898_vm9, %v10074_v53 }
 0x6da   : > { %v4234_v34 = vpop.f32.mrf.mxu0  ;;  %v4278_v9 = vpop.f32.mrf.mxu1 }
 0x6db   : > { %v10576_v30 = vadd.f32 %v4234_v34, %v4044_v2  ;;  %v10578_v6 = vadd.f32 %v4278_v9, %v4045_v36  ;;  %v4431_v8 = vpop.f32.mrf.mxu2  ;;  %v4475_v23 = vpop.f32.mrf.mxu3 }
 0x6dc   : > { %v4510_v57 = vadd.f32 %v4431_v8, %v10375_v47  ;;  %v4511_v35 = vadd.f32 %v4475_v23, %v10377_v32 }
 0x6e2   : > { %v10582_v48 = vpop.f32.mrf.mxu0  ;;  %v10584_v40 = vpop.f32.mrf.mxu1 }
 0x6e3   : > { %11330 = vst [vmem:[#allocation41_spill] sm:$0xff] %v10582_v48  ;;  %v4433_v53 = vpop.f32.mrf.mxu2  ;;  %v4477_v17 = vpop.f32.mrf.mxu3 }
 0x6e4   : > { %11331 = vst [vmem:[#allocation42_spill] sm:$0xff] %v10584_v40  ;;  %v10587_v37 = vadd.f32 %v4433_v53, %v10389_v50  ;;  %v10590_v3 = vadd.f32 %v4477_v17, %v10391_v14 }
 0x6e7   : > { %7076 = vmatmul.msk.bf16.gmra.mxu2 %vm3898_vm9, %v10100_v16  ;;  %7083 = vmatmul.msk.bf16.gmra.mxu3 %vm3898_vm9, %v10100_v16 }
 0x6ea   : > { %v4682_v47 = vpop.f32.mrf.mxu0  ;;  %v4726_v32 = vpop.f32.mrf.mxu1 }
 0x6eb   : > { %v10596_v31 = vadd.f32 %v4682_v47, %v4510_v57  ;;  %v10598_v18 = vadd.f32 %v4726_v32, %v4511_v35  ;;  %v4436_v55 = vpop.f32.mrf.mxu2  ;;  %v4480_v5 = vpop.f32.mrf.mxu3 }
 0x6ec   : > { %v4514_v50 = vadd.f32 %v4436_v55, %v10395_v61  ;;  %v4515_v13 = vadd.f32 %v4480_v5, %v10397_v42 }
 0x6f2   : > { %v10602_v14 = vpop.f32.mrf.mxu0  ;;  %v10604_v22 = vpop.f32.mrf.mxu1 }
 0x6f3   : > { %v4438_v38 = vpop.f32.mrf.mxu2  ;;  %v4482_v2 = vpop.f32.mrf.mxu3  ;;  %v4763_v40 = vadd.f32 %v10602_v14, %v10587_v37 }
 0x6f4   : > { %v10607_v16 = vadd.f32 %v4438_v38, %v10412_v39  ;;  %v10610_v36 = vadd.f32 %v4482_v2, %v10414_v51 }
 0x6f7   : > { %7077 = vmatmul.msk.bf16.gmra.mxu2 %vm3898_vm9, %v10160_v28  ;;  %7084 = vmatmul.msk.bf16.gmra.mxu3 %vm3898_vm9, %v10160_v28 }
 0x6fa   : > { %v4687_v61 = vpop.f32.mrf.mxu0  ;;  %v4731_v42 = vpop.f32.mrf.mxu1 }
 0x6fb   : > { %v10616_v34 = vadd.f32 %v4687_v61, %v4514_v50  ;;  %v10618_v9 = vadd.f32 %v4731_v42, %v4515_v13  ;;  %v4441_v8 = vpop.f32.mrf.mxu2  ;;  %v4485_v23 = vpop.f32.mrf.mxu3 }
 0x6fc   : > { %v4518_v39 = vadd.f32 %v4441_v8, %v10445_v43  ;;  %v4519_v57 = vadd.f32 %v4485_v23, %v10447_v41 }
 0x702   : > { %v10622_v51 = vpop.f32.mrf.mxu0  ;;  %v10624_v35 = vpop.f32.mrf.mxu1 }
 0x703   : > { %v10626_v53 = vpop.f32.mrf.mxu2  ;;  %v10628_v17 = vpop.f32.mrf.mxu3 }
 0x707   : > { %7078 = vmatmul.msk.bf16.gmra.mxu2 %vm3898_vm9, %v10258_v58  ;;  %7085 = vmatmul.msk.bf16.gmra.mxu3 %vm3898_vm9, %v10258_v58 }
 0x70a   : > { %v4692_v28 = vpop.f32.mrf.mxu0  ;;  %v4736_v47 = vpop.f32.mrf.mxu1 }
 0x70b   : > { %v10634_v32 = vadd.f32 %v4692_v28, %v4518_v39  ;;  %v10636_v43 = vadd.f32 %v4736_v47, %v4519_v57  ;;  %v4446_v41 = vpop.f32.mrf.mxu2  ;;  %v4490_v55 = vpop.f32.mrf.mxu3 }
 0x70c   : > { %v4522_v5 = vadd.f32 %v4446_v41, %v10506_v7  ;;  %v4523_v50 = vadd.f32 %v4490_v55, %v10508_v15 }
 0x712   : > { %v10640_v13 = vpop.f32.mrf.mxu0  ;;  %v10642_v38 = vpop.f32.mrf.mxu1 }
 0x713   : > { %v10644_v2 = vpop.f32.mrf.mxu2  ;;  %v10646_v61 = vpop.f32.mrf.mxu3 }
 0x717   : > { %7079 = vmatmul.msk.bf16.gmra.mxu2 %vm3898_vm9, %v10341_v24  ;;  %7086 = vmatmul.msk.bf16.gmra.mxu3 %vm3898_vm9, %v10341_v24 }
 0x71a   : > { %v4697_v58 = vpop.f32.mrf.mxu0  ;;  %v4741_v42 = vpop.f32.mrf.mxu1 }
 0x71b   : > { %v10652_v8 = vadd.f32 %v4697_v58, %v4522_v5  ;;  %v10654_v7 = vadd.f32 %v4741_v42, %v4523_v50  ;;  %v4451_v15 = vpop.f32.mrf.mxu2  ;;  %v4495_v23 = vpop.f32.mrf.mxu3 }
 0x71c   : > { %v10657_v39 = vadd.f32 %v4451_v15, %v10528_v27  ;;  %v10660_v57 = vadd.f32 %v4495_v23, %v10530_v1 }
 0x723   : > { %v10662_v28 = vpop.f32.mrf.mxu2  ;;  %v10664_v47 = vpop.f32.mrf.mxu3 }
 0x727   : > { %7080 = vmatmul.msk.bf16.gmra.mxu2 %vm3898_vm9, %v10328_v45  ;;  %7087 = vmatmul.msk.bf16.gmra.mxu3 %vm3898_vm9, %v10328_v45 }
 0x72b   : > { %v4456_v24 = vpop.f32.mrf.mxu2  ;;  %v4500_v41 = vpop.f32.mrf.mxu3 }
 0x72c   : > { %v10671_v55 = vadd.f32 %v4456_v24, %v10554_v19  ;;  %v10674_v27 = vadd.f32 %v4500_v41, %v10556_v25 }
 0x733   : > { %v10676_v1 = vpop.f32.mrf.mxu2  ;;  %v10678_v5 = vpop.f32.mrf.mxu3 }
 0x73b   : > { %v4461_v50 = vpop.f32.mrf.mxu2  ;;  %v4505_v58 = vpop.f32.mrf.mxu3 }
 0x73c   : > { %v10681_v42 = vadd.f32 %v4461_v50, %v10576_v30  ;;  %v10684_v15 = vadd.f32 %v4505_v58, %v10578_v6  ;;  %v4764_v30 = vadd.f32 %v10604_v22, %v10590_v3  ;;  %v4767_v3 = vadd.f32 %v10622_v51, %v10607_v16 }
 0x73d   : > { %v4030_v16 = vadd.f32 %v10369_v33, %v10416_v20  ;;  %v4699_v20 = vpop.f32.mrf.mxu0 }
 0x73e   : > { %11332 = vst [vmem:[#allocation43_spill] sm:$0xff] %v10681_v42 }
 0x73f   : > { %11333 = vst [vmem:[#allocation45_spill] sm:$0xff] %v10684_v15 }
 0x743   : > { %v10686_v45 = vpop.f32.mrf.mxu2  ;;  %v10688_v23 = vpop.f32.mrf.mxu3 }
 0x744   : > { %11334 = vst [vmem:[#allocation44_spill] sm:$0xff] %v10686_v45 }
 0x745   : > { %11335 = vst [vmem:[#allocation14_spill] sm:$0xff] %v10688_v23 }
 0x74b   : > { %v4909_v19 = vpop.f32.mrf.mxu2  ;;  %v4953_v24 = vpop.f32.mrf.mxu3 }
 0x74c   : > { %v4988_v25 = vadd.f32 %v4909_v19, %v10596_v31  ;;  %v4989_v41 = vadd.f32 %v4953_v24, %v10598_v18 }
 0x74e   : > { %v5016_v15 = vmax.f32 %v4988_v25, 0.0  ;;  %v5017_v45 = vmax.f32 %v4989_v41, 0.0 }
 0x753   : > { %v4911_v50 = vpop.f32.mrf.mxu2  ;;  %v4955_v42 = vpop.f32.mrf.mxu3 }
 0x754   : > { %v4990_v6 = vadd.f32 %v4911_v50, %v4763_v40  ;;  %v4991_v58 = vadd.f32 %v4955_v42, %v4764_v30  ;;  %v4768_v40 = vadd.f32 %v10624_v35, %v10610_v36  ;;  %v4031_v36 = vadd.f32 %v10371_v54, %v10418_v4 }
 0x755   : > { %v4293_v30 = vadd.f32 %v10472_v52, %v4030_v16 }
 0x756   : > { %v5018_v48 = vmax.f32 %v4990_v6, 0.0  ;;  %v5019_v23 = vmax.f32 %v4991_v58, 0.0  ;;  %v4294_v50 = vadd.f32 %v10474_v10, %v4031_v36 }
 0x757   : > { %v4520_v6 = vadd.f32 %v10626_v53, %v4293_v30 }
 0x758   : > { %v10696_v21 = vpack.c.bf16 %v5018_v48, %v5016_v15  ;;  %v10698_v46 = vpack.c.bf16 %v5019_v23, %v5017_v45  ;;  %v4521_v58 = vadd.f32 %v10628_v17, %v4294_v50 }
 0x75b   : > { %v4914_v31 = vpop.f32.mrf.mxu2  ;;  %v4958_v18 = vpop.f32.mrf.mxu3 }
 0x75c   : > { %v4992_v19 = vadd.f32 %v4914_v31, %v10616_v34  ;;  %v4993_v37 = vadd.f32 %v4958_v18, %v10618_v9  ;;  %v4771_v31 = vadd.f32 %v10640_v13, %v4520_v6  ;;  %v4772_v18 = vadd.f32 %v10642_v38, %v4521_v58 }
 0x75d   : > { %v4034_v13 = vadd.f32 %v10369_v33, %v10476_v60  ;;  %v4035_v38 = vadd.f32 %v10371_v54, %v10478_v63 }
 0x75e   : > { %v5020_v48 = vmax.f32 %v4992_v19, 0.0  ;;  %v5021_v15 = vmax.f32 %v4993_v37, 0.0  ;;  %v4743_v19 = vpop.f32.mrf.mxu1 }
 0x763   : > { %v4916_v14 = vpop.f32.mrf.mxu2  ;;  %v4960_v22 = vpop.f32.mrf.mxu3 }
 0x764   : > { %v4994_v42 = vadd.f32 %v4916_v14, %v4767_v3  ;;  %v4995_v24 = vadd.f32 %v4960_v22, %v4768_v40 }
 0x766   : > { %v5022_v45 = vmax.f32 %v4994_v42, 0.0  ;;  %v5023_v23 = vmax.f32 %v4995_v24, 0.0  ;;  %v4702_v42 = vpop.f32.mrf.mxu0  ;;  %v4746_v24 = vpop.f32.mrf.mxu1 }
 0x768   : > { %v10706_v25 = vpack.c.bf16 %v5022_v45, %v5020_v48  ;;  %v10708_v41 = vpack.c.bf16 %v5023_v23, %v5021_v15  ;;  %v4297_v45 = vadd.f32 %v10518_v59, %v4034_v13  ;;  %v4298_v23 = vadd.f32 %v10520_v11, %v4035_v38 }
 0x76b   : > { %v4919_v34 = vpop.f32.mrf.mxu2  ;;  %v4963_v9 = vpop.f32.mrf.mxu3 }
 0x76c   : > { %v4996_v51 = vadd.f32 %v4919_v34, %v10634_v32  ;;  %v4997_v35 = vadd.f32 %v4963_v9, %v10636_v43  ;;  %v4524_v34 = vadd.f32 %v10644_v2, %v4297_v45  ;;  %v4525_v9 = vadd.f32 %v10646_v61, %v4298_v23 }
 0x76d   : > { %v4038_v61 = vadd.f32 %v10369_v33, %v10522_v0  ;;  %v4042_v45 = vadd.f32 %v10369_v33, %v10544_v62  ;;  %v4043_v23 = vadd.f32 %v10371_v54, %v10546_v44 }
 0x76e   : > { %v5024_v40 = vmax.f32 %v4996_v51, 0.0  ;;  %v5025_v43 = vmax.f32 %v4997_v35, 0.0  ;;  %v4775_v16 = vadd.f32 %v4699_v20, %v4524_v34  ;;  %v4776_v36 = vadd.f32 %v4743_v19, %v4525_v9  ;;  %v4704_v30 = vpop.f32.mrf.mxu0  ;;  %v4748_v50 = vpop.f32.mrf.mxu1 }
 0x76f   : > { %v4301_v20 = vadd.f32 %v10540_v49, %v4038_v61  ;;  %v4305_v34 = vadd.f32 %v10562_v56, %v4042_v45  ;;  %v4306_v9 = vadd.f32 %v10564_v29, %v4043_v23 }
 0x773   : > { %v4921_v37 = vpop.f32.mrf.mxu2  ;;  %v4965_v4 = vpop.f32.mrf.mxu3 }
 0x774   : > { %v4998_v3 = vadd.f32 %v4921_v37, %v4771_v31  ;;  %v4999_v32 = vadd.f32 %v4965_v4, %v4772_v18  ;;  %v4039_v18 = vadd.f32 %v10371_v54, %v10524_v12  ;;  %v4528_v37 = vadd.f32 %v10662_v28, %v4301_v20  ;;  %v11337_v20 = vld [vmem:[#allocation38_spill] sm:$0xff] }
 0x776   : > { %v5026_v14 = vmax.f32 %v4998_v3, 0.0  ;;  %v5027_v52 = vmax.f32 %v4999_v32, 0.0  ;;  %v4302_v19 = vadd.f32 %v10542_v26, %v4039_v18  ;;  %v4777_v3 = vadd.f32 %v4702_v42, %v10657_v39  ;;  %v11336_v18 = vld [vmem:[#allocation40_spill] sm:$0xff] }
 0x777   : > { %v4778_v32 = vadd.f32 %v4746_v24, %v10660_v57 }
 0x778   : > { %v10722_v22 = vpack.c.bf16 %v5026_v14, %v5024_v40  ;;  %v10724_v10 = vpack.c.bf16 %v5027_v52, %v5025_v43  ;;  %v4529_v4 = vadd.f32 %v10664_v47, %v4302_v19  ;;  %v4707_v40 = vpop.f32.mrf.mxu0  ;;  %v4751_v43 = vpop.f32.mrf.mxu1  ;;  %v4779_v14 = vadd.f32 %v4704_v30, %v4528_v37  ;;  %v11338_v37 = vld [vmem:[#allocation41_spill] sm:$0xff] }
 0x779   : > { %v4047_v19 = vadd.f32 %v10371_v54, %v11337_v20 }
 0x77a   : > { %v4780_v52 = vadd.f32 %v4748_v50, %v4529_v4 }
 0x77b   : > { %v4924_v53 = vpop.f32.mrf.mxu2  ;;  %v4968_v17 = vpop.f32.mrf.mxu3 }
 0x77c   : > { %v5000_v48 = vadd.f32 %v4924_v53, %v10652_v8  ;;  %v5001_v15 = vadd.f32 %v4968_v17, %v10654_v7 }
 0x77e   : > { %v5028_v6 = vmax.f32 %v5000_v48, 0.0  ;;  %v5029_v8 = vmax.f32 %v5001_v15, 0.0 }
 0x780   : > { %v4709_v39 = vpop.f32.mrf.mxu0  ;;  %v4753_v57 = vpop.f32.mrf.mxu1 }
 0x783   : > { %v4926_v60 = vpop.f32.mrf.mxu2  ;;  %v4970_v51 = vpop.f32.mrf.mxu3 }
 0x784   : > { %v5002_v35 = vadd.f32 %v4926_v60, %v4775_v16  ;;  %v5003_v63 = vadd.f32 %v4970_v51, %v4776_v36  ;;  %v4532_v16 = vadd.f32 %v10676_v1, %v4305_v34  ;;  %v4533_v36 = vadd.f32 %v10678_v5, %v4306_v9 }
 0x785   : > { %v4781_v60 = vadd.f32 %v4707_v40, %v10671_v55  ;;  %v4782_v51 = vadd.f32 %v4751_v43, %v10674_v27  ;;  %v4046_v27 = vadd.f32 %v10369_v33, %v11336_v18  ;;  %v7636_v18 = vld [vmem:[%s11095_s8 + $0x48] sm:$0xff] }
 0x786   : > { %v5030_v58 = vmax.f32 %v5002_v35, 0.0  ;;  %v5031_v7 = vmax.f32 %v5003_v63, 0.0  ;;  %v4783_v35 = vadd.f32 %v4709_v39, %v4532_v16  ;;  %v4784_v63 = vadd.f32 %v4753_v57, %v4533_v36  ;;  %5347 = vmatpush.bf16.msrb.mxu3 %v7636_v18  ;;  %v7671_v18 = vld [vmem:[%s11096_s9 + $0xc0] sm:$0xff] }
 0x787   : > { %v4309_v4 = vadd.f32 %v11338_v37, %v4046_v27  ;;  %v7627_v37 = vld [vmem:[%s11095_s8] sm:$0xff] }
 0x788   : > { %v10736_v31 = vpack.c.bf16 %v5030_v58, %v5028_v6  ;;  %v10738_v59 = vpack.c.bf16 %v5031_v7, %v5029_v8  ;;  %v4712_v58 = vpop.f32.mrf.mxu0  ;;  %v4756_v56 = vpop.f32.mrf.mxu1 }
 0x78b   : > { %v4929_v11 = vpop.f32.mrf.mxu2  ;;  %v4973_v2 = vpop.f32.mrf.mxu3 }
 0x78c   : > { %v5004_v0 = vadd.f32 %v4929_v11, %v4777_v3  ;;  %v5005_v53 = vadd.f32 %v4973_v2, %v4778_v32  ;;  %v11339_v3 = vld [vmem:[#allocation42_spill] sm:$0xff] }
 0x78d   : > { %v4310_v32 = vadd.f32 %v11339_v3, %v4047_v19  ;;  %v7637_v19 = vld [vmem:[%s11095_s8 + $0x50] sm:$0xff] }
 0x78e   : > { %v5032_v38 = vmax.f32 %v5004_v0, 0.0  ;;  %v5033_v26 = vmax.f32 %v5005_v53, 0.0  ;;  %v11341_v0 = vld [vmem:[#allocation14_spill] sm:$0xff] }
 0x78f   : > { %v4537_v53 = vadd.f32 %v11341_v0, %v4310_v32  ;;  %v7646_v0 = vld [vmem:[%s11095_s8 + $0x98] sm:$0xff] }
 0x790   : > { %v4714_v40 = vpop.f32.mrf.mxu0  ;;  %v4758_v43 = vpop.f32.mrf.mxu1 }
 0x793   : > { %v4931_v17 = vpop.f32.mrf.mxu2  ;;  %v4975_v12 = vpop.f32.mrf.mxu3 }
 0x794   : > { %v5006_v13 = vadd.f32 %v4931_v17, %v4779_v14  ;;  %v5007_v49 = vadd.f32 %v4975_v12, %v4780_v52  ;;  %v11340_v14 = vld [vmem:[#allocation44_spill] sm:$0xff]  ;;  %v11342_v17 = vld [vmem:[#allocation43_spill] sm:$0xff] }
 0x795   : > { %v4536_v52 = vadd.f32 %v11340_v14, %v4309_v4  ;;  %v4785_v12 = vadd.f32 %v4712_v58, %v11342_v17  ;;  %v7641_v58 = vld [vmem:[%s11095_s8 + $0x70] sm:$0xff]  ;;  %v7635_v4 = vld [vmem:[%s11095_s8 + $0x40] sm:$0xff] }
 0x796   : > { %v5034_v48 = vmax.f32 %v5006_v13, 0.0  ;;  %v5035_v28 = vmax.f32 %v5007_v49, 0.0  ;;  %v11343_v13 = vld [vmem:[#allocation45_spill] sm:$0xff]  ;;  %5348 = vmatpush.bf16.msrb.mxu3 %v7635_v4  ;;  %v7657_v4 = vld [vmem:[%s11096_s9 + $0x50] sm:$0xff] }
 0x797   : > { %v4786_v49 = vadd.f32 %v4756_v56, %v11343_v13  ;;  %v7631_v56 = vld [vmem:[%s11095_s8 + $0x20] sm:$0xff] }
 0x798   : > { %v10750_v15 = vpack.c.bf16 %v5034_v48, %v5032_v38  ;;  %v10752_v47 = vpack.c.bf16 %v5035_v28, %v5033_v26  ;;  %v4787_v38 = vadd.f32 %v4714_v40, %v4536_v52  ;;  %v4788_v26 = vadd.f32 %v4758_v43, %v4537_v53  ;;  %v7645_v53 = vld [vmem:[%s11095_s8 + $0x90] sm:$0xff] }
 0x79b   : > { %v4934_v42 = vpop.f32.mrf.mxu2  ;;  %v4978_v24 = vpop.f32.mrf.mxu3 }
 0x79c   : > { %v5008_v30 = vadd.f32 %v4934_v42, %v4781_v60  ;;  %v5009_v50 = vadd.f32 %v4978_v24, %v4782_v51  ;;  %v7623_v60 = vld [vmem:[%s11094_s7] sm:$0xff]  ;;  %v7624_v51 = vld [vmem:[%s11094_s7 + $0x8] sm:$0xff] }
 0x79e   : > { %v5036_v7 = vmax.f32 %v5008_v30, 0.0  ;;  %v5037_v29 = vmax.f32 %v5009_v50, 0.0  ;;  %v7643_v30 = vld [vmem:[%s11095_s8 + $0x80] sm:$0xff]  ;;  %v7633_v50 = vld [vmem:[%s11095_s8 + $0x30] sm:$0xff] }
 0x7a3   : > { %v4936_v62 = vpop.f32.mrf.mxu2  ;;  %v4980_v6 = vpop.f32.mrf.mxu3 }
 0x7a4   : > { %v5010_v8 = vadd.f32 %v4936_v62, %v4783_v35  ;;  %v5011_v44 = vadd.f32 %v4980_v6, %v4784_v63  ;;  %v7642_v62 = vld [vmem:[%s11095_s8 + $0x78] sm:$0xff]  ;;  %v7632_v6 = vld [vmem:[%s11095_s8 + $0x28] sm:$0xff] }
 0x7a6   : > { %v5038_v11 = vmax.f32 %v5010_v8, 0.0  ;;  %v5039_v1 = vmax.f32 %v5011_v44, 0.0 }
 0x7a8   : > { %v5054_v2 = vpack.c.bf16 %v5038_v11, %v5036_v7  ;;  %v5055_v5 = vpack.c.bf16 %v5039_v1, %v5037_v29  ;;  %v7640_v7 = vld [vmem:[%s11095_s8 + $0x68] sm:$0xff]  ;;  %v7630_v29 = vld [vmem:[%s11095_s8 + $0x18] sm:$0xff] }
 0x7ab   : > { %v4939_v61 = vpop.f32.mrf.mxu2  ;;  %v4983_v55 = vpop.f32.mrf.mxu3 }
 0x7ac   : > { %v5012_v33 = vadd.f32 %v4939_v61, %v4785_v12  ;;  %v5013_v48 = vadd.f32 %v4983_v55, %v4786_v49  ;;  %v7638_v61 = vld [vmem:[%s11095_s8 + $0x58] sm:$0xff]  ;;  %v7628_v55 = vld [vmem:[%s11095_s8 + $0x8] sm:$0xff] }
 0x7ae   : > { %v5040_v42 = vmax.f32 %v5012_v33, 0.0  ;;  %v5041_v24 = vmax.f32 %v5013_v48, 0.0 }
 0x7b3   : > { %v4941_v28 = vpop.f32.mrf.mxu2  ;;  %v4985_v54 = vpop.f32.mrf.mxu3 }
 0x7b4   : > { %v5014_v39 = vadd.f32 %v4941_v28, %v4787_v38  ;;  %v5015_v57 = vadd.f32 %v4985_v54, %v4788_v26 }
 0x7b6   : > { %v5042_v45 = vmax.f32 %v5014_v39, 0.0  ;;  %v5043_v23 = vmax.f32 %v5015_v57, 0.0 }
 0x7b8   : > { %v5056_v34 = vpack.c.bf16 %v5042_v45, %v5040_v42  ;;  %v5057_v9 = vpack.c.bf16 %v5043_v23, %v5041_v24 }
 0x7ba   : > { %v5087_v16 = vsel %vm2300_vm3, %v5056_v34, 0  ;;  %v5090_v36 = vsel %vm2300_vm3, %v5057_v9, 0 }
 0x7bb   : > { %5093 = vmatpush.bf16.msrb.mxu0 %v5087_v16  ;;  %5116 = vmatpush.bf16.msrb.mxu1 %v5090_v36 }
 0x7bf   : > { %5094 = vmatpush.bf16.msrb.mxu0 %v5054_v2  ;;  %5117 = vmatpush.bf16.msrb.mxu1 %v5055_v5 }
 0x7c3   : > { %5095 = vmatpush.bf16.msrb.mxu0 %v10750_v15  ;;  %5118 = vmatpush.bf16.msrb.mxu1 %v10752_v47 }
 0x7c7   : > { %5096 = vmatpush.bf16.msrb.mxu0 %v10736_v31  ;;  %5119 = vmatpush.bf16.msrb.mxu1 %v10738_v59 }
 0x7cb   : > { %5097 = vmatpush.bf16.msrb.mxu0 %v10722_v22  ;;  %5120 = vmatpush.bf16.msrb.mxu1 %v10724_v10 }
 0x7cf   : > { %5098 = vmatpush.bf16.msrb.mxu0 %v10706_v25  ;;  %5121 = vmatpush.bf16.msrb.mxu1 %v10708_v41 }
 0x7d3   : > { %5099 = vmatpush.bf16.msrb.mxu0 %v10696_v21  ;;  %5122 = vmatpush.bf16.msrb.mxu1 %v10698_v46 }
 0x7d6   : > { %7096 = vmatmul.msk.bf16.vlgmr.msrb.gmra.mxu0 %vm5076_vm10, %v7623_v60  ;;  %7099 = vmatmul.msk.bf16.vlgmr.msrb.gmra.mxu1 %vm5076_vm10, %v7623_v60 }
 0x7d7   : > { %5167 = vmatpush.bf16.msra.mxu0 %v5087_v16  ;;  %5190 = vmatpush.bf16.msra.mxu1 %v5090_v36 }
 0x7db   : > { %5168 = vmatpush.bf16.msra.mxu0 %v5054_v2  ;;  %5191 = vmatpush.bf16.msra.mxu1 %v5055_v5  ;;  %v7639_v2 = vld [vmem:[%s11095_s8 + $0x60] sm:$0xff]  ;;  %v7629_v5 = vld [vmem:[%s11095_s8 + $0x10] sm:$0xff] }
 0x7df   : > { %5169 = vmatpush.bf16.msra.mxu0 %v10750_v15  ;;  %5192 = vmatpush.bf16.msra.mxu1 %v10752_v47  ;;  %v7644_v15 = vld [vmem:[%s11095_s8 + $0x88] sm:$0xff]  ;;  %v7634_v47 = vld [vmem:[%s11095_s8 + $0x38] sm:$0xff] }
 0x7e0   : > { %5318 = vmatpush.bf16.msrb.mxu2 %v7634_v47  ;;  %v7656_v47 = vld [vmem:[%s11096_s9 + $0x48] sm:$0xff] }
 0x7e1   : > { %5618 = vmatpush.bf16.msra.mxu3 %v7656_v47 }
 0x7e3   : > { %5170 = vmatpush.bf16.msra.mxu0 %v10736_v31  ;;  %5193 = vmatpush.bf16.msra.mxu1 %v10738_v59  ;;  %v5062_v31 = vld [vmem:[%s11094_s7 + $0x10] sm:$0xf] }
 0x7e4   : > { %v5072_v59 = vunpack.c.l.b16 %v5062_v31  ;;  %5319 = vmatpush.bf16.msrb.mxu2 %v7633_v50  ;;  %v7655_v50 = vld [vmem:[%s11096_s9 + $0x40] sm:$0xff] }
 0x7e5   : > { %5619 = vmatpush.bf16.msra.mxu3 %v7655_v50 }
 0x7e6   : > { %7097 = vmatmul.msk.bf16.gmra.mxu0 %vm5076_vm10, %v7624_v51  ;;  %7100 = vmatmul.msk.bf16.gmra.mxu1 %vm5076_vm10, %v7624_v51 }
 0x7e7   : > { %5171 = vmatpush.bf16.msra.mxu0 %v10722_v22  ;;  %5194 = vmatpush.bf16.msra.mxu1 %v10724_v10  ;;  %v5075_v22 = vpack.c.b16 %v5072_v59, %v5072_v59 }
 0x7e8   : > { %5320 = vmatpush.bf16.msrb.mxu2 %v7632_v6  ;;  %v7654_v6 = vld [vmem:[%s11096_s9 + $0x38] sm:$0xff] }
 0x7e9   : > { %5620 = vmatpush.bf16.msra.mxu3 %v7654_v6 }
 0x7eb   : > { %5172 = vmatpush.bf16.msra.mxu0 %v10706_v25  ;;  %5195 = vmatpush.bf16.msra.mxu1 %v10708_v41  ;;  %v7625_v25 = vld [vmem:[%s11094_s7 + $0x14] sm:$0xff] }
 0x7ec   : > { %5321 = vmatpush.bf16.msrb.mxu2 %v7631_v56 }
 0x7ef   : > { %5173 = vmatpush.bf16.msra.mxu0 %v10696_v21  ;;  %5196 = vmatpush.bf16.msra.mxu1 %v10698_v46  ;;  %v7626_v21 = vld [vmem:[%s11094_s7 + $0x1c] sm:$0xff]  ;;  %v7106_v46 = vld [vmem:[%s11094_s7 + $0x24] sm:$0xf] }
 0x7f0   : > { %v5153_v41 = vunpack.c.l.b16 %v7106_v46  ;;  %5322 = vmatpush.bf16.msrb.mxu2 %v7630_v29  ;;  %v7660_v29 = vld [vmem:[%s11096_s9 + $0x68] sm:$0xff] }
 0x7f2   : > { %v5156_v10 = vpack.c.b16 %v5153_v41, %v5153_v41 }
 0x7f3   : > { %7692 = vmatpush.bf16.msrb.mxu1 %v7644_v15  ;;  %5445 = vmatpush.bf16.msrb.mxu0 %v7644_v15  ;;  %v7649_v15 = vld [vmem:[%s11096_s9 + $0x10] sm:$0xff] }
 0x7f4   : > { %5323 = vmatpush.bf16.msrb.mxu2 %v7629_v5 }
 0x7f6   : > { %7098 = vmatmul.msk.bf16.gmra.mxu0 %vm5076_vm10, %v5075_v22  ;;  %7101 = vmatmul.msk.bf16.gmra.mxu1 %vm5076_vm10, %v5075_v22 }
 0x7f7   : > { %7693 = vmatpush.bf16.msrb.mxu1 %v7643_v30  ;;  %5446 = vmatpush.bf16.msrb.mxu0 %v7643_v30  ;;  %v7648_v30 = vld [vmem:[%s11096_s9 + $0x8] sm:$0xff] }
 0x7f8   : > { %5324 = vmatpush.bf16.msrb.mxu2 %v7628_v55 }
 0x7fb   : > { %7694 = vmatpush.bf16.msrb.mxu1 %v7642_v62  ;;  %5447 = vmatpush.bf16.msrb.mxu0 %v7642_v62  ;;  %v7647_v62 = vld [vmem:[%s11096_s9] sm:$0xff] }
 0x7fc   : > { %5325 = vmatpush.bf16.msrb.mxu2 %v7627_v37  ;;  %v7664_v37 = vld [vmem:[%s11096_s9 + $0x88] sm:$0xff] }
 0x7ff   : > { %7695 = vmatpush.bf16.msrb.mxu1 %v7641_v58  ;;  %5448 = vmatpush.bf16.msrb.mxu0 %v7641_v58 }
 0x803   : > { %7696 = vmatpush.bf16.msrb.mxu1 %v7640_v7  ;;  %5449 = vmatpush.bf16.msrb.mxu0 %v7640_v7  ;;  %v7653_v7 = vld [vmem:[%s11096_s9 + $0x30] sm:$0xff] }
 0x804   : > { %5621 = vmatpush.bf16.msra.mxu3 %v7653_v7  ;;  %v7677_v7 = vld [vmem:[%s11098_s11 + $0x28] sm:$0xff] }
 0x806   : > { %7115 = vmatmul.msk.bf16.vlgmr.msra.gmra.mxu0 %vm5076_vm10, %v7625_v25  ;;  %7118 = vmatmul.msk.bf16.vlgmr.msra.gmra.mxu1 %vm5076_vm10, %v7625_v25 }
 0x807   : > { %7697 = vmatpush.bf16.msrb.mxu1 %v7639_v2  ;;  %5450 = vmatpush.bf16.msrb.mxu0 %v7639_v2  ;;  %v7659_v2 = vld [vmem:[%s11096_s9 + $0x60] sm:$0xff] }
 0x80b   : > { %7698 = vmatpush.bf16.msrb.mxu1 %v7638_v61  ;;  %5451 = vmatpush.bf16.msrb.mxu0 %v7638_v61 }
 0x80f   : > { %7699 = vmatpush.bf16.msrb.mxu1 %v7637_v19  ;;  %5452 = vmatpush.bf16.msrb.mxu0 %v7637_v19 }
 0x813   : > { %5474 = vmatpush.bf16.msra.mxu1 %v7646_v0 }
 0x816   : > { %7116 = vmatmul.msk.bf16.gmra.mxu0 %vm5076_vm10, %v7626_v21  ;;  %7119 = vmatmul.msk.bf16.gmra.mxu1 %vm5076_vm10, %v7626_v21  ;;  %v7651_v21 = vld [vmem:[%s11096_s9 + $0x20] sm:$0xff] }
 0x817   : > { %5475 = vmatpush.bf16.msra.mxu1 %v7645_v53  ;;  %5556 = vmatpush.bf16.msra.mxu2 %v7651_v21 }
 0x826   : > { %7117 = vmatmul.msk.bf16.gmra.mxu0 %vm5076_vm10, %v5156_v10  ;;  %7120 = vmatmul.msk.bf16.gmra.mxu1 %vm5076_vm10, %v5156_v10  ;;  %v7650_v10 = vld [vmem:[%s11096_s9 + $0x18] sm:$0xff] }
 0x827   : > { %5557 = vmatpush.bf16.msra.mxu2 %v7650_v10 }
 0x82b   : > { %5558 = vmatpush.bf16.msra.mxu2 %v7649_v15 }
 0x82f   : > { %5559 = vmatpush.bf16.msra.mxu2 %v7648_v30 }
 0x833   : > { %5560 = vmatpush.bf16.msra.mxu2 %v7647_v62 }
 0x853   : > { %v10832_v35 = vpop.f32.mrf.mxu0  ;;  %v10834_v63 = vpop.f32.mrf.mxu1 }
 0x85b   : > { %v5103_v8 = vpop.f32.mrf.mxu0  ;;  %v5126_v44 = vpop.f32.mrf.mxu1 }
 0x863   : > { %v5106_v11 = vpop.f32.mrf.mxu0  ;;  %v5129_v1 = vpop.f32.mrf.mxu1 }
 0x86b   : > { %v5108_v27 = vpop.f32.mrf.mxu0  ;;  %v5131_v20 = vpop.f32.mrf.mxu1 }
 0x873   : > { %v5111_v3 = vpop.f32.mrf.mxu0  ;;  %v5134_v32 = vpop.f32.mrf.mxu1 }
 0x87b   : > { %v5113_v40 = vpop.f32.mrf.mxu0  ;;  %v5136_v43 = vpop.f32.mrf.mxu1 }
 0x87c   : > { %v7670_v43 = vld [vmem:[%s11096_s9 + $0xb8] sm:$0xff] }
 0x883   : > { %v5175_v14 = vpop.f32.mrf.mxu0  ;;  %v5198_v52 = vpop.f32.mrf.mxu1 }
 0x884   : > { %v5212_v13 = vmax.f32 %v10832_v35, %v5175_v14  ;;  %v5213_v38 = vmax.f32 %v10834_v63, %v5198_v52  ;;  %v7663_v14 = vld [vmem:[%s11096_s9 + $0x80] sm:$0xff] }
 0x88b   : > { %v5177_v17 = vpop.f32.mrf.mxu0  ;;  %v5200_v12 = vpop.f32.mrf.mxu1 }
 0x88c   : > { %v5214_v49 = vmax.f32 %v5103_v8, %v5177_v17  ;;  %v5215_v26 = vmax.f32 %v5126_v44, %v5200_v12  ;;  %v7661_v8 = vld [vmem:[%s11096_s9 + $0x70] sm:$0xff] }
 0x88d   : > { %5677 = vmatpush.bf16.msra.mxu0 %v7661_v8  ;;  %v7669_v12 = vld [vmem:[%s11096_s9 + $0xb0] sm:$0xff] }
 0x88e   : > { %v5222_v33 = vpack.c.bf16 %v5214_v49, %v5212_v13  ;;  %v5223_v48 = vpack.c.bf16 %v5215_v26, %v5213_v38  ;;  %v7662_v13 = vld [vmem:[%s11096_s9 + $0x78] sm:$0xff] }
 0x890   : > { %5326 = vmatmul.bf16.vlgmr.msrb.gmra.mxu2 %v5222_v33  ;;  %7161 = vmatmul.msk.bf16.vlgmr.msrb.gmra.mxu3 %vm5308_vm11, %v5223_v48 }
 0x891   : > { %5453 = vmatmul.bf16.vlgmr.msrb.gmra.mxu0 %v5222_v33  ;;  %5795 = vmatpush.bf16.msrb.mxu2 %v7671_v18  ;;  %v7668_v33 = vld [vmem:[%s11096_s9 + $0xa8] sm:$0xff] }
 0x892   : > { %5678 = vmatpush.bf16.msra.mxu0 %v7660_v29  ;;  %v7675_v29 = vld [vmem:[%s11098_s11 + $0x18] sm:$0xff]  ;;  %v5904_v18 = vld [vmem:[%s11100_s13 + $0x28] sm:$0x3] }
 0x893   : > { %v5180_v28 = vpop.f32.mrf.mxu0  ;;  %v5203_v54 = vpop.f32.mrf.mxu1 }
 0x894   : > { %v5216_v42 = vmax.f32 %v5106_v11, %v5180_v28  ;;  %v5217_v45 = vmax.f32 %v5129_v1, %v5203_v54  ;;  %v7666_v11 = vld [vmem:[%s11096_s9 + $0x98] sm:$0xff]  ;;  %v7652_v1 = vld [vmem:[%s11096_s9 + $0x28] sm:$0xff] }
 0x895   : > { %5622 = vmatpush.bf16.msra.mxu3 %v7652_v1  ;;  %5796 = vmatpush.bf16.msrb.mxu2 %v7670_v43  ;;  %v7682_v43 = vld [vmem:[%s11100_s13 + $0x18] sm:$0xff] }
 0x896   : > { %5679 = vmatpush.bf16.msra.mxu0 %v7659_v2  ;;  %v7673_v2 = vld [vmem:[%s11098_s11 + $0x8] sm:$0xff] }
 0x899   : > { %5797 = vmatpush.bf16.msrb.mxu2 %v7669_v12 }
 0x89b   : > { %v5182_v39 = vpop.f32.mrf.mxu0  ;;  %v5205_v57 = vpop.f32.mrf.mxu1 }
 0x89c   : > { %v5218_v24 = vmax.f32 %v5108_v27, %v5182_v39  ;;  %v5219_v23 = vmax.f32 %v5131_v20, %v5205_v57  ;;  %v7665_v27 = vld [vmem:[%s11096_s9 + $0x90] sm:$0xff]  ;;  %v7658_v20 = vld [vmem:[%s11096_s9 + $0x58] sm:$0xff]  ;;  %v7667_v39 = vld [vmem:[%s11096_s9 + $0xa0] sm:$0xff] }
 0x89d   : > { %5680 = vmatpush.bf16.msra.mxu0 %v7658_v20  ;;  %5798 = vmatpush.bf16.msrb.mxu2 %v7668_v33 }
 0x89e   : > { %v5224_v34 = vpack.c.bf16 %v5218_v24, %v5216_v42  ;;  %v5225_v9 = vpack.c.bf16 %v5219_v23, %v5217_v45  ;;  %v5822_v23 = vld [vmem:[%s11098_s11 + $0x38] sm:$0xf] }
 0x8a0   : > { %5331 = vmatmul.bf16.gmra.mxu2 %v5224_v34  ;;  %7162 = vmatmul.msk.bf16.gmra.mxu3 %vm5308_vm11, %v5225_v9 }
 0x8a1   : > { %5458 = vmatmul.bf16.gmra.mxu0 %v5224_v34  ;;  %5799 = vmatpush.bf16.msrb.mxu2 %v7667_v39  ;;  %v7740_v39 = vld [vmem:[%s11099_s12] ss:$0 sm:$0xff] }
 0x8a2   : > { %5681 = vmatpush.bf16.msra.mxu0 %v7657_v4  ;;  %v7683_v4 = vld [vmem:[%s11100_s13 + $0x20] sm:$0xff] }
 0x8a3   : > { %v5185_v16 = vpop.f32.mrf.mxu0  ;;  %v5208_v36 = vpop.f32.mrf.mxu1 }
 0x8a4   : > { %v5220_v60 = vmax.f32 %v5111_v3, %v5185_v16  ;;  %v5221_v31 = vmax.f32 %v5134_v32, %v5208_v36 }
 0x8a6   : > { %v5226_v51 = vpack.c.bf16 %v5220_v60, %v5220_v60  ;;  %v5227_v25 = vpack.c.bf16 %v5221_v31, %v5221_v31 }
 0x8a8   : > { %5463 = vmatmul.bf16.vlgmr.msrb.gmra.mxu1 %v5226_v51 }
 0x8a9   : > { %5736 = vmatpush.bf16.msrb.mxu1 %v7666_v11  ;;  %v7674_v11 = vld [vmem:[%s11098_s11 + $0x10] sm:$0xff] }
 0x8ab   : > { %v5210_v59 = vpop.f32.mrf.mxu1  ;;  %v5187_v22 = vpop.f32.mrf.mxu0 }
 0x8ac   : > { %v7678_v22 = vld [vmem:[%s11098_s11 + $0x30] sm:$0xff] }
 0x8ad   : > { %5737 = vmatpush.bf16.msrb.mxu1 %v7665_v27  ;;  %v5930_v27 = vunpack.c.l.b16 %v5904_v18 }
 0x8b0   : > { %5336 = vmatmul.bf16.gmra.mxu2 %v5226_v51  ;;  %7163 = vmatmul.msk.bf16.gmra.mxu3 %vm5308_vm11, %v5227_v25 }
 0x8b1   : > { %5738 = vmatpush.bf16.msrb.mxu1 %v7664_v37 }
 0x8b5   : > { %5739 = vmatpush.bf16.msrb.mxu1 %v7663_v14  ;;  %v7739_v14 = vld [vmem:[%s11097_s10] ss:$0 sm:$0xff] }
 0x8b8   : > { %7224 = vmatmul.msk.bf16.vlgmr.msra.gmra.mxu1 %vm5308_vm11, %v5223_v48 }
 0x8b9   : > { %5740 = vmatpush.bf16.msrb.mxu1 %v7662_v13 }
 0x8c8   : > { %7225 = vmatmul.msk.bf16.gmra.mxu1 %vm5308_vm11, %v5225_v9  ;;  %v5856_v9 = vunpack.c.l.b16 %v5822_v23 }
 0x8ca   : > { %v5864_v60 = vpack.c.b16 %v5856_v9, %v5856_v9 }
 0x8cc   : > { %v5877_v31 = vsel %vm3471_vm5, %v5864_v60, 0 }
 0x8cd   : > { %5879 = vmatpush.bf16.msrb.mxu3 %v5877_v31 }
 0x8d1   : > { %5880 = vmatpush.bf16.msrb.mxu3 %v7678_v22 }
 0x8d5   : > { %5881 = vmatpush.bf16.msrb.mxu3 %v7677_v7 }
 0x8d8   : > { %7226 = vmatmul.msk.bf16.gmra.mxu1 %vm5308_vm11, %v5227_v25 }
 0x90e   : > { %v5454_v19 = vpop.f32.mrf.mxu0 }
 0x913   : > { %v5327_v46 = vpop.f32.mrf.mxu2  ;;  %v5350_v41 = vpop.f32.mrf.mxu3 }
 0x914   : > { %v5351_v52 = vadd.f32 %v5350_v41, %v5327_v46 }
 0x916   : > { %v5456_v17 = vpop.f32.mrf.mxu0 }
 0x91b   : > { %v10910_v35 = vpop.f32.mrf.mxu2  ;;  %v5352_v63 = vpop.f32.mrf.mxu3 }
 0x91c   : > { %v5353_v28 = vadd.f32 %v5352_v63, %v10910_v35 }
 0x91e   : > { %v5459_v24 = vpop.f32.mrf.mxu0 }
 0x923   : > { %v10927_v44 = vpop.f32.mrf.mxu2  ;;  %v10929_v58 = vpop.f32.mrf.mxu3 }
 0x924   : > { %v5356_v16 = vadd.f32 %v10929_v58, %v10927_v44 }
 0x925   : > { %v10931_v56 = vpop.f32.mrf.mxu1 }
 0x926   : > { %v5461_v46 = vpop.f32.mrf.mxu0 }
 0x92b   : > { %v10948_v5 = vpop.f32.mrf.mxu2  ;;  %v10950_v61 = vpop.f32.mrf.mxu3 }
 0x92c   : > { %v5358_v41 = vadd.f32 %v10950_v61, %v10948_v5  ;;  %v7672_v5 = vld [vmem:[%s11098_s11] sm:$0xff] }
 0x92d   : > { %v5466_v55 = vpop.f32.mrf.mxu1 }
 0x933   : > { %v5337_v3 = vpop.f32.mrf.mxu2  ;;  %v5360_v32 = vpop.f32.mrf.mxu3 }
 0x934   : > { %v5361_v30 = vadd.f32 %v5360_v32, %v5337_v3 }
 0x935   : > { %v5477_v40 = vpop.f32.mrf.mxu1 }
 0x936   : > { %v5478_v0 = vadd.f32 %v5477_v40, %v5454_v19  ;;  %v5936_v19 = vpack.c.b16 %v5930_v27, %v5930_v27 }
 0x938   : > { %v5491_v53 = vmax.f32 %v5351_v52, %v5478_v0  ;;  %v5946_v37 = vsel %vm3920_vm7, %v5936_v19, 0  ;;  %v7681_v52 = vld [vmem:[%s11100_s13 + $0x10] sm:$0xff] }
 0x939   : > { %5950 = vmatpush.bf16.msrb.mxu0 %v5946_v37 }
 0x93a   : > { %v5496_v49 = vpack.c.bf16 %v5491_v53, %v5491_v53 }
 0x93b   : > { %v5339_v38 = vpop.f32.mrf.mxu2  ;;  %v5362_v26 = vpop.f32.mrf.mxu3 }
 0x93c   : > { %5502 = vst.msk [vmem:[#allocation3] sm:$0xf] %vm5501_vm12, %v5496_v49 }
 0x93d   : > { %v5479_v48 = vpop.f32.mrf.mxu1  ;;  %5951 = vmatpush.bf16.msrb.mxu0 %v7683_v4 }
 0x93e   : > { %v5480_v54 = vadd.f32 %v5479_v48, %v5456_v17 }
 0x940   : > { %v5492_v57 = vmax.f32 %v5353_v28, %v5480_v54  ;;  %v7680_v28 = vld [vmem:[%s11100_s13 + $0x8] sm:$0xff]  ;;  %v7679_v54 = vld [vmem:[%s11100_s13] sm:$0xff] }
 0x941   : > { %5952 = vmatpush.bf16.msrb.mxu0 %v7682_v43 }
 0x942   : > { %v5497_v42 = vpack.c.bf16 %v5492_v57, %v5492_v57 }
 0x943   : > { %v5508_v45 = vld [vmem:[#allocation3] sm:$0xf] }
 0x944   : > { %5503 = vst.msk [vmem:[#allocation3 + $0x4] sm:$0xf] %vm5501_vm12, %v5497_v42  ;;  %7247 = vmatmul.msk.bf16.vlgmr.msra.gmra.mxu2 %vm5549_vm13, %v5508_v45 }
 0x945   : > { %v5482_v34 = vpop.f32.mrf.mxu1  ;;  %5953 = vmatpush.bf16.msrb.mxu0 %v7681_v52 }
 0x946   : > { %v5483_v36 = vadd.f32 %v5482_v34, %v5459_v24  ;;  %v7741_v34 = vld [vmem:[%s11101_s14] ss:$0 sm:$0xff] }
 0x948   : > { %v5493_v51 = vmax.f32 %v5356_v16, %v5483_v36 }
 0x949   : > { %5954 = vmatpush.bf16.msrb.mxu0 %v7680_v28 }
 0x94a   : > { %v5498_v59 = vpack.c.bf16 %v5493_v51, %v5493_v51 }
 0x94b   : > { %v5570_v25 = vld [vmem:[#allocation3 + $0x4] sm:$0xf] }
 0x94c   : > { %5504 = vst.msk [vmem:[#allocation3 + $0x8] sm:$0xf] %vm5501_vm12, %v5498_v59  ;;  %7278 = vmatmul.msk.bf16.vlgmr.msra.gmra.mxu3 %vm5549_vm13, %v5570_v25 }
 0x94d   : > { %v5484_v21 = vpop.f32.mrf.mxu1  ;;  %5955 = vmatpush.bf16.msrb.mxu0 %v7679_v54 }
 0x94e   : > { %v5485_v10 = vadd.f32 %v5484_v21, %v5461_v46 }
 0x950   : > { %v5494_v15 = vmax.f32 %v5358_v41, %v5485_v10 }
 0x952   : > { %v5499_v47 = vpack.c.bf16 %v5494_v15, %v5494_v15 }
 0x953   : > { %v5629_v35 = vld [vmem:[#allocation3 + $0x8] sm:$0xf] }
 0x954   : > { %5505 = vst.msk [vmem:[#allocation3 + $0xc] sm:$0xf] %vm5501_vm12, %v5499_v47  ;;  %7309 = vmatmul.msk.bf16.vlgmr.msra.gmra.mxu0 %vm5549_vm13, %v5629_v35 }
 0x955   : > { %v5487_v63 = vpop.f32.mrf.mxu1 }
 0x956   : > { %v5488_v50 = vadd.f32 %v5487_v63, %v10931_v56  ;;  %v7676_v56 = vld [vmem:[%s11098_s11 + $0x20] sm:$0xff] }
 0x957   : > { %5882 = vmatpush.bf16.msrb.mxu3 %v7676_v56 }
 0x958   : > { %v5495_v62 = vmax.f32 %v5361_v30, %v5488_v50 }
 0x95a   : > { %v5500_v6 = vpack.c.bf16 %v5495_v62, %v5495_v62 }
 0x95b   : > { %v5688_v8 = vld [vmem:[#allocation3 + $0xc] sm:$0xf]  ;;  %5883 = vmatpush.bf16.msrb.mxu3 %v7675_v29 }
 0x95c   : > { %5506 = vst.msk [vmem:[#allocation3 + $0x10] sm:$0xf] %vm5501_vm12, %v5500_v6  ;;  %7340 = vmatmul.msk.bf16.vlgmr.msrb.gmra.mxu1 %vm5549_vm13, %v5688_v8 }
 0x95d   : > { %v5489_v44 = vpop.f32.mrf.mxu1 }
 0x95f   : > { %5884 = vmatpush.bf16.msrb.mxu3 %v7674_v11 }
 0x963   : > { %v5747_v58 = vld [vmem:[#allocation3 + $0x10] sm:$0xf]  ;;  %5885 = vmatpush.bf16.msrb.mxu3 %v7673_v2 }
 0x964   : > { %7371 = vmatmul.msk.bf16.vlgmr.msrb.gmra.mxu2 %vm5549_vm13, %v5747_v58 }
 0x967   : > { %5886 = vmatpush.bf16.msrb.mxu3 %v7672_v5 }
 0x9c7   : > { %v5562_v1 = vpop.f32.mrf.mxu2 }
 0x9c8   : > { %v5569_v0 = vadd.f32 %v7739_v14, %v5562_v1 }
 0x9cf   : > { %v5564_v61 = vpop.f32.mrf.mxu2  ;;  %v5624_v55 = vpop.f32.mrf.mxu3 }
 0x9d0   : > { %v5628_v53 = vadd.f32 %v5624_v55, %v5569_v0 }
 0x9d1   : > { %v5683_v20 = vpop.f32.mrf.mxu0 }
 0x9d2   : > { %v5687_v12 = vadd.f32 %v5683_v20, %v5628_v53 }
 0x9d7   : > { %v5626_v3 = vpop.f32.mrf.mxu3 }
 0x9d9   : > { %v5742_v32 = vpop.f32.mrf.mxu1  ;;  %v5685_v40 = vpop.f32.mrf.mxu0 }
 0x9da   : > { %v5746_v13 = vadd.f32 %v5742_v32, %v5687_v12 }
 0x9e1   : > { %v5744_v17 = vpop.f32.mrf.mxu1 }
 0x9e7   : > { %v5801_v49 = vpop.f32.mrf.mxu2 }
 0x9e8   : > { %v5805_v38 = vadd.f32 %v5801_v49, %v5746_v13 }
 0x9ea   : > { %v5806_v26 = vmax.f32 %v5805_v38, 0.0 }
 0x9ec   : > { %v5807_v33 = vpack.c.bf16 %v5806_v26, %v5806_v26 }
 0x9ee   : > { %7400 = vmatmul.msk.bf16.vlgmr.msrb.gmra.mxu3 %vm5872_vm14, %v5807_v33 }
 0x9ef   : > { %v5803_v48 = vpop.f32.mrf.mxu2 }
 0xa71   : > { %v5888_v57 = vpop.f32.mrf.mxu3 }
 0xa72   : > { %v5889_v42 = vadd.f32 %v7740_v39, %v5888_v57 }
 0xa74   : > { %v5892_v24 = vmax.f32 %v5889_v42, 0.0 }
 0xa76   : > { %v5893_v45 = vpack.c.bf16 %v5892_v24, %v5892_v24 }
 0xa78   : > { %7421 = vmatmul.msk.bf16.vlgmr.msrb.gmra.mxu0 %vm3898_vm9, %v5893_v45 }
 0xa79   : > { %v5890_v23 = vpop.f32.mrf.mxu3 }
 0xaf5   : > { %v5957_v9 = vpop.f32.mrf.mxu0 }
 0xaf6   : > { %v5958_v16 = vadd.f32 %v7741_v34, %v5957_v9 }
 0xaf8   : > { %5962 = vst.msk [vmem:[%s488_s17] sm:$0xff] %vm5961_vm15, %v5958_v16 }
 0xaf9   : > { %7783 = shalt.err (!%p7780_p3)
}
 0xafa   : > { %7700 = dma.vmem_to_hbm [thread:$0]  (%p7938_p5), %s5977_s16, 128, %s5979_s23, %s5964_s22  }
 0xafd   : > { %v5959_v36 = vpop.f32.mrf.mxu0 }
 0xafe PF: > { %s11344_s20 = sld [smem:[#allocation9_spill]] }
 0xaff   : > { %s11345_s26 = sld [smem:[#allocation7_spill]] }
 0xb04   : > { %p7706_p4 = scmp.ge.s32.totalorder %s11344_s20, 2 }
 0xb05   : > { %s5990_s17 = sand.u32 1, %s11345_s26  }
 0xb06   : > { %p7703_p7 = pnand %p7706_p4, %p7942_p6  ;;  %s5991_s27 = scalar_lea.sflag [#allocation5], %s5990_s17 }
 0xb08   : > { %p7704_p8 = pneg %p7703_p7 }
 0xb0a   : > { %7801 = dma.done.wait (%p7704_p8), %s5991_s27, 128  }
 0xb0b   : > { %7803 = vsyncadd (%p7704_p8), %s5991_s27, 4294967168  ;;  %s11347_s21 = sld [smem:[#allocation10_spill]]  ;;  %s11350_s18 = smov %s7810_s19 }
 0xb0c   : > { %s11348_s0 = sld [smem:[#allocation8_spill]] }
 0xb0d   : > { %s11349_s20 = sld [smem:[#allocation11_spill]] }
 0xb11   : > { %p25_p9 = scmp.ge.s32.totalorder %s11347_s21, 4  }
 0xb12   : > { %s11351_s19 = smov %s11348_s0 }
 0xb13   :  { %27 = sbr.rel (!%p25_p9) target bundleno = 5 (0x5), region = 131 }
 0xb18   :  { %5997 = vsyncpa [#allocation5], 1 }
 0xb19   :  { %5999 = vsyncpa [#allocation5 + $0x1], 1 }

</bundles_post_ra>
